<compile_context>
chip_gen: v5e
topology: v5e:2x2
jax: 0.10.0
libtpu: 0.0.40
codegen_flags: <defaults>
</compile_context>

<pallas_src>
import jax
import jax.numpy as jnp
from jax.experimental import pallas as pl
from jax.experimental.pallas import tpu as pltpu


def _gru_recurrence_kernel(gi_ref, h0_ref, whh_rz_ref, whh_n_ref, bhh_n_ref,
                           out_ref, hlast_ref, h_scratch):
    """One grid step = one chunk of T time steps.

    gi_ref:    (B, T, 3H) f32  precomputed x_t @ W_ih^T + b_ih (+ b_hh r/z)
    h0_ref:    (B, H)          initial hidden state
    whh_rz_ref:(H, 2H) bf16    W_hh^T columns for the r and z gates (resident)
    whh_n_ref: (H, H)  bf16    W_hh^T columns for the n gate (resident)
    bhh_n_ref: (1, H)  f32     b_hh n-part (must stay inside r * (...))
    out_ref:   (B, T, H)       per-step hidden outputs for this chunk
    hlast_ref: (B, H)          final hidden state (resident, last chunk only)
    h_scratch: (B, H) f32      running hidden state across chunks
    """
    c = pl.program_id(0)

    # Initialize the running hidden state from h0 on the first chunk.
    @pl.when(c == 0)
    def _():
        h_scratch[...] = h0_ref[...].astype(jnp.float32)

    T = gi_ref.shape[1]
    H = h_scratch.shape[-1]

    whh_rz = whh_rz_ref[...]          # (H, 2H) bf16, resident across chunks
    whh_n = whh_n_ref[...]            # (H, H)  bf16
    bhh_n = bhh_n_ref[...]            # (1, H)  f32

    h = h_scratch[...]                # (B, H) f32 carry, lives in vregs

    # Dense-store group: 8 sublanes of the output (T, H) tile at a time.
    group = 8 if T % 8 == 0 else 1

    # Static (fully unrolled) time loop; all slice indices are compile-time
    # constants and lane/sublane aligned.
    # TODO(synk): for very long chunks (T >> 128) switch the inner loop to
    # lax.fori_loop(..., unroll=8) to bound code size.
    for g0 in range(0, T, group):
        hs = []
        for t in range(g0, g0 + group):
            # Per-step load of the gate pre-activations (bounds live range to
            # ~2 vregs instead of keeping the whole chunk resident).
            gi_t = gi_ref[:, t, :].astype(jnp.float32)      # (B, 3H)

            h_b = h.astype(jnp.bfloat16)
            # Split recurrent matmul: r/z columns and n columns.  The EUP
            # sigmoids on gh_rz can overlap with the MXU n-gate matmul.
            gh_rz = jnp.dot(h_b, whh_rz, preferred_element_type=jnp.float32)
            gh_n = jnp.dot(h_b, whh_n, preferred_element_type=jnp.float32)

            # PyTorch gate order: r, z, n.  b_hh r/z already folded into gi.
            r = jax.nn.sigmoid(gi_t[:, 0:H] + gh_rz[:, 0:H])
            z = jax.nn.sigmoid(gi_t[:, H:2 * H] + gh_rz[:, H:2 * H])
            n = jnp.tanh(gi_t[:, 2 * H:3 * H] + r * (gh_n + bhh_n))

            # h' = (1-z)*n + z*h  ==  n + z*(h - n)
            h = n + z * (h - n)
            hs.append(h)

        # One dense, unmasked store per group instead of `group` masked
        # single-sublane stores.
        if group > 1:
            block = jnp.stack(hs, axis=1)                   # (B, group, H)
        else:
            block = hs[0][:, None, :]
        out_ref[:, g0:g0 + group, :] = block.astype(out_ref.dtype)

    # Persist the carry for the next chunk.
    h_scratch[...] = h

    # Final hidden state: write only once, on the last chunk.
    @pl.when(c == pl.num_programs(0) - 1)
    def _():
        hlast_ref[...] = h.astype(hlast_ref.dtype)


def _pick_time_chunk(S, B, H, out_itemsize, max_chunk=128,
                     vmem_budget=40 << 20):
    """Largest time-chunk T that divides S, keeps blocks (8,128)-legal and
    keeps the double-buffered gi/out chunks within a conservative VMEM budget
    (safe for v7x's 64 MiB as well as v5e/v6e's 128 MiB)."""
    if S % 8 != 0:
        return S  # whole sequence as one chunk (block dim == array dim legal)

    def chunk_vmem(T):
        gi = 2 * B * T * 3 * H * 4          # gi, f32, double-buffered
        out = 2 * B * T * H * out_itemsize  # output chunk, double-buffered
        wts = 3 * H * H * 2                 # bf16 recurrent weights
        return gi + out + wts

    t = 8
    while (t * 2 <= max_chunk and S % (t * 2) == 0
           and chunk_vmem(t * 2) < vmem_budget):
        t *= 2
    return t


def gru_decoder_forward(x, hidden_state, w_ih, w_hh, b_ih, b_hh, *,
                        time_chunk=None):
    """Pallas GRU forward (batch_first), matching torch.nn.GRU semantics.

    x:            (B, S, 2H)
    hidden_state: (1, B, H)
    w_ih:         (3H, 2H)   PyTorch weight_ih_l0
    w_hh:         (3H, H)    PyTorch weight_hh_l0
    b_ih, b_hh:   (3H,)
    returns (d, hidden_state): (B, S, H), (1, B, H)
    """
    B, S, I = x.shape
    H = w_hh.shape[1]

    b_ih_f = b_ih.astype(jnp.float32)
    b_hh_f = b_hh.astype(jnp.float32)

    # ---- Hoisted input projection (out of the serial recurrence) ----------
    # Fold the r/z parts of b_hh into the hoisted bias (they add linearly);
    # only the n-part of b_hh must stay in-kernel inside r * (...).
    b_fold = b_ih_f + jnp.concatenate(
        [b_hh_f[:2 * H], jnp.zeros((H,), jnp.float32)])
    gi = jnp.einsum("bsi,gi->bsg", x, w_ih,
                    preferred_element_type=jnp.float32) + b_fold
    # gi: (B, S, 3H), float32

    # Recurrent weights: bf16 (MXU-native), split into r/z and n column blocks.
    whh_t = jnp.transpose(w_hh).astype(jnp.bfloat16)        # (H, 3H)
    whh_rz = whh_t[:, :2 * H]                               # (H, 2H)
    whh_n = whh_t[:, 2 * H:]                                # (H, H)
    bhh_n = b_hh_f[2 * H:].reshape(1, H)                    # (1, H)
    h0 = hidden_state[0]                                    # (B, H)

    out_itemsize = jnp.dtype(x.dtype).itemsize
    T = time_chunk if time_chunk is not None else _pick_time_chunk(
        S, B, H, out_itemsize)
    assert S % T == 0, "time_chunk must divide the sequence length"
    num_chunks = S // T

    out, h_last = pl.pallas_call(
        _gru_recurrence_kernel,
        out_shape=(
            jax.ShapeDtypeStruct((B, S, H), x.dtype),   # d (batch_first)
            jax.ShapeDtypeStruct((B, H), x.dtype),      # final hidden
        ),
        grid_spec=pltpu.PrefetchScalarGridSpec(
            num_scalar_prefetch=0,
            grid=(num_chunks,),
            in_specs=[
                pl.BlockSpec((B, T, 3 * H), lambda c: (0, c, 0)),   # gi chunk
                pl.BlockSpec((B, H), lambda c: (0, 0)),             # h0
                pl.BlockSpec((H, 2 * H), lambda c: (0, 0)),         # W_hh^T rz
                pl.BlockSpec((H, H), lambda c: (0, 0)),             # W_hh^T n
                pl.BlockSpec((1, H), lambda c: (0, 0)),             # b_hh n
            ],
            out_specs=(
                pl.BlockSpec((B, T, H), lambda c: (0, c, 0)),       # d chunk
                pl.BlockSpec((B, H), lambda c: (0, 0)),             # final h
            ),
            scratch_shapes=[pltpu.VMEM((B, H), jnp.float32)],
        ),
        compiler_params=pltpu.CompilerParams(
            dimension_semantics=("arbitrary",)),   # sequential recurrence
    )(gi, h0, whh_rz, whh_n, bhh_n)

    return out, h_last[None]                       # (B, S, H), (1, B, H)


def gru_reference(x, hidden_state, w_ih, w_hh, b_ih, b_hh):
    """Pure-JAX f32 reference matching torch.nn.GRU semantics."""
    B, S, I = x.shape
    H = w_hh.shape[1]
    h = hidden_state[0]

    def step(h, x_t):
        gi = x_t @ w_ih.T + b_ih
        gh = h @ w_hh.T + b_hh
        i_r, i_z, i_n = gi[:, :H], gi[:, H:2 * H], gi[:, 2 * H:]
        h_r, h_z, h_n = gh[:, :H], gh[:, H:2 * H], gh[:, 2 * H:]
        r = jax.nn.sigmoid(i_r + h_r)
        z = jax.nn.sigmoid(i_z + h_z)
        n = jnp.tanh(i_n + r * h_n)
        h_new = (1.0 - z) * n + z * h
        return h_new, h_new

    h_last, outs = jax.lax.scan(step, h, jnp.transpose(x, (1, 0, 2)))
    return jnp.transpose(outs, (1, 0, 2)), h_last[None]


if __name__ == "__main__":
    # Shapes implied by the module: hidden_dim = 256, GRU input = 2 * hidden_dim.
    B, S, H = 2, 16, 256
    I = 2 * H

    key = jax.random.PRNGKey(0)
    kx, kh, k1, k2, k3, k4 = jax.random.split(key, 6)

    x = jax.random.normal(kx, (B, S, I), dtype=jnp.float32)
    h0 = jax.random.normal(kh, (1, B, H), dtype=jnp.float32)

    # PyTorch GRU default init: U(-1/sqrt(H), 1/sqrt(H)).
    bound = 1.0 / (H ** 0.5)
    w_ih = jax.random.uniform(k1, (3 * H, I), jnp.float32, -bound, bound)
    w_hh = jax.random.uniform(k2, (3 * H, H), jnp.float32, -bound, bound)
    b_ih = jax.random.uniform(k3, (3 * H,), jnp.float32, -bound, bound)
    b_hh = jax.random.uniform(k4, (3 * H,), jnp.float32, -bound, bound)

    d_ref, h_ref = gru_reference(x, h0, w_ih, w_hh, b_ih, b_hh)

    # bf16 recurrent weights on the MXU -> looser tolerance vs the f32
    # reference (error accumulates over S steps through saturating gates).
    tol = dict(atol=5e-2, rtol=5e-2)

    # time_chunk=8 -> grid of 2 chunks, exercises the cross-chunk hidden carry
    # and the grouped dense output store.
    d, h_last = gru_decoder_forward(x, h0, w_ih, w_hh, b_ih, b_hh, time_chunk=8)
    d = jax.block_until_ready(d)
    h_last = jax.block_until_ready(h_last)
    assert d.shape == (B, S, H) and h_last.shape == (1, B, H)
    assert jnp.allclose(d, d_ref, **tol)
    assert jnp.allclose(h_last, h_ref, **tol)

    # Default (auto-picked) chunk size: whole sequence in one chunk here.
    d2, h_last2 = gru_decoder_forward(x, h0, w_ih, w_hh, b_ih, b_hh)
    d2 = jax.block_until_ready(d2)
    h_last2 = jax.block_until_ready(h_last2)
    assert jnp.allclose(d2, d_ref, **tol)
    assert jnp.allclose(h_last2, h_ref, **tol)

    print("KERNEL_OK")
</pallas_src>

<mosaic_0001>
module attributes {stable_mosaic.version = 11 : i64} {
  func.func @_gru_recurrence_kernel(%arg0: i32, %arg1: memref<2x8x768xf32, #tpu.memory_space<vmem>>, %arg2: memref<2x256xf32, #tpu.memory_space<vmem>>, %arg3: memref<256x512xbf16, #tpu.memory_space<vmem>>, %arg4: memref<256x256xbf16, #tpu.memory_space<vmem>>, %arg5: memref<1x256xf32, #tpu.memory_space<vmem>>, %arg6: memref<2x8x256xf32, #tpu.memory_space<vmem>>, %arg7: memref<2x256xf32, #tpu.memory_space<vmem>>, %arg8: memref<2x256xf32, #tpu.memory_space<vmem>>) attributes {dimension_semantics = [#tpu.dimension_semantics<arbitrary>], iteration_bounds = array<i64: 2>, scalar_prefetch = 0 : i64, scratch_operands = 1 : i64, tpu.core_type = #tpu.core_type<tc>, window_params = [{transform_indices = @transform_0, window_bounds = array<i64: 2, 8, 768>}, {pipeline_mode = #tpu.pipeline_mode<synchronous>, transform_indices = @transform_1, window_bounds = array<i64: 2, 256>}, {pipeline_mode = #tpu.pipeline_mode<synchronous>, transform_indices = @transform_2, window_bounds = array<i64: 256, 512>}, {pipeline_mode = #tpu.pipeline_mode<synchronous>, transform_indices = @transform_3, window_bounds = array<i64: 256, 256>}, {pipeline_mode = #tpu.pipeline_mode<synchronous>, transform_indices = @transform_4, window_bounds = array<i64: 1, 256>}, {transform_indices = @transform_5, window_bounds = array<i64: 2, 8, 256>}, {pipeline_mode = #tpu.pipeline_mode<synchronous>, transform_indices = @transform_6, window_bounds = array<i64: 2, 256>}]} {
    %c0_i32 = arith.constant 0 : i32
    %0 = arith.cmpi eq, %arg0, %c0_i32 : i32
    %1 = arith.extui %0 : i1 to i32
    %c0_i32_0 = arith.constant 0 : i32
    %2 = arith.cmpi ne, %1, %c0_i32_0 : i32
    scf.if %2 {
      %c0_62 = arith.constant 0 : index
      %c0_63 = arith.constant 0 : index
      %261 = vector.load %arg2[%c0_62, %c0_63] : memref<2x256xf32, #tpu.memory_space<vmem>>, vector<2x256xf32>
      %c0_64 = arith.constant 0 : index
      %c0_65 = arith.constant 0 : index
      %262 = vector.load %arg8[%c0_64, %c0_65] : memref<2x256xf32, #tpu.memory_space<vmem>>, vector<2x256xf32>
      tpu.vector_store %arg8[%c0_64, %c0_65], %261 {strides = array<i32>} : memref<2x256xf32, #tpu.memory_space<vmem>>, vector<2x256xf32>,
    } else {
    }
    %c0 = arith.constant 0 : index
    %c0_1 = arith.constant 0 : index
    %3 = vector.load %arg3[%c0, %c0_1] : memref<256x512xbf16, #tpu.memory_space<vmem>>, vector<256x512xbf16>
    %c0_2 = arith.constant 0 : index
    %c0_3 = arith.constant 0 : index
    %4 = vector.load %arg4[%c0_2, %c0_3] : memref<256x256xbf16, #tpu.memory_space<vmem>>, vector<256x256xbf16>
    %c0_4 = arith.constant 0 : index
    %c0_5 = arith.constant 0 : index
    %5 = vector.load %arg5[%c0_4, %c0_5] : memref<1x256xf32, #tpu.memory_space<vmem>>, vector<1x256xf32>
    %c0_6 = arith.constant 0 : index
    %c0_7 = arith.constant 0 : index
    %6 = vector.load %arg8[%c0_6, %c0_7] : memref<2x256xf32, #tpu.memory_space<vmem>>, vector<2x256xf32>
    %c0_8 = arith.constant 0 : index
    %c0_9 = arith.constant 0 : index
    %c0_10 = arith.constant 0 : index
    %7 = vector.load %arg1[%c0_8, %c0_9, %c0_10] : memref<2x8x768xf32, #tpu.memory_space<vmem>>, vector<2x1x768xf32>
    %8 = vector.shape_cast %7 : vector<2x1x768xf32> to vector<2x768xf32>
    %9 = arith.truncf %6 : vector<2x256xf32> to vector<2x256xbf16>
    %cst = arith.constant dense<0.000000e+00> : vector<2x512xf32>
    %10 = tpu.matmul %9, %3, %cst {dimension_numbers = #tpu.dot_dimension_numbers<[1], [0], [0], [1], [0, 0, 1, 1], [], []>} : vector<2x256xbf16>, vector<256x512xbf16>, vector<2x512xf32> -> vector<2x512xf32>
    %cst_11 = arith.constant dense<0.000000e+00> : vector<2x256xf32>
    %11 = tpu.matmul %9, %4, %cst_11 {dimension_numbers = #tpu.dot_dimension_numbers<[1], [0], [0], [1], [0, 0, 1, 1], [], []>} : vector<2x256xbf16>, vector<256x256xbf16>, vector<2x256xf32> -> vector<2x256xf32>
    %12 = vector.extract_strided_slice %8 {offsets = [0, 0], sizes = [2, 256], strides = [1, 1]} : vector<2x768xf32> to vector<2x256xf32>
    %13 = vector.extract_strided_slice %10 {offsets = [0, 0], sizes = [2, 256], strides = [1, 1]} : vector<2x512xf32> to vector<2x256xf32>
    %14 = arith.addf %12, %13 : vector<2x256xf32>
    %15 = arith.negf %14 : vector<2x256xf32>
    %16 = math.exp %15 : vector<2x256xf32>
    %cst_12 = arith.constant 1.000000e+00 : f32
    %17 = vector.broadcast %cst_12 : f32 to vector<2x256xf32>
    %18 = arith.addf %17, %16 : vector<2x256xf32>
    %19 = arith.divf %17, %18 : vector<2x256xf32>
    %20 = vector.extract_strided_slice %8 {offsets = [0, 256], sizes = [2, 256], strides = [1, 1]} : vector<2x768xf32> to vector<2x256xf32>
    %21 = vector.extract_strided_slice %10 {offsets = [0, 256], sizes = [2, 256], strides = [1, 1]} : vector<2x512xf32> to vector<2x256xf32>
    %22 = arith.addf %20, %21 : vector<2x256xf32>
    %23 = arith.negf %22 : vector<2x256xf32>
    %24 = math.exp %23 : vector<2x256xf32>
    %cst_13 = arith.constant 1.000000e+00 : f32
    %25 = vector.broadcast %cst_13 : f32 to vector<2x256xf32>
    %26 = arith.addf %25, %24 : vector<2x256xf32>
    %27 = arith.divf %25, %26 : vector<2x256xf32>
    %28 = vector.extract_strided_slice %8 {offsets = [0, 512], sizes = [2, 256], strides = [1, 1]} : vector<2x768xf32> to vector<2x256xf32>
    %29 = vector.broadcast %5 : vector<1x256xf32> to vector<2x256xf32>
    %30 = arith.addf %11, %29 : vector<2x256xf32>
    %31 = arith.mulf %19, %30 : vector<2x256xf32>
    %32 = arith.addf %28, %31 : vector<2x256xf32>
    %33 = math.tanh %32 : vector<2x256xf32>
    %34 = arith.subf %6, %33 : vector<2x256xf32>
    %35 = arith.mulf %27, %34 : vector<2x256xf32>
    %36 = arith.addf %33, %35 : vector<2x256xf32>
    %c0_14 = arith.constant 0 : index
    %c1 = arith.constant 1 : index
    %c0_15 = arith.constant 0 : index
    %37 = vector.load %arg1[%c0_14, %c1, %c0_15] : memref<2x8x768xf32, #tpu.memory_space<vmem>>, vector<2x1x768xf32>
    %38 = vector.shape_cast %37 : vector<2x1x768xf32> to vector<2x768xf32>
    %39 = arith.truncf %36 : vector<2x256xf32> to vector<2x256xbf16>
    %cst_16 = arith.constant dense<0.000000e+00> : vector<2x512xf32>
    %40 = tpu.matmul %39, %3, %cst_16 {dimension_numbers = #tpu.dot_dimension_numbers<[1], [0], [0], [1], [0, 0, 1, 1], [], []>} : vector<2x256xbf16>, vector<256x512xbf16>, vector<2x512xf32> -> vector<2x512xf32>
    %cst_17 = arith.constant dense<0.000000e+00> : vector<2x256xf32>
    %41 = tpu.matmul %39, %4, %cst_17 {dimension_numbers = #tpu.dot_dimension_numbers<[1], [0], [0], [1], [0, 0, 1, 1], [], []>} : vector<2x256xbf16>, vector<256x256xbf16>, vector<2x256xf32> -> vector<2x256xf32>
    %42 = vector.extract_strided_slice %38 {offsets = [0, 0], sizes = [2, 256], strides = [1, 1]} : vector<2x768xf32> to vector<2x256xf32>
    %43 = vector.extract_strided_slice %40 {offsets = [0, 0], sizes = [2, 256], strides = [1, 1]} : vector<2x512xf32> to vector<2x256xf32>
    %44 = arith.addf %42, %43 : vector<2x256xf32>
    %45 = arith.negf %44 : vector<2x256xf32>
    %46 = math.exp %45 : vector<2x256xf32>
    %cst_18 = arith.constant 1.000000e+00 : f32
    %47 = vector.broadcast %cst_18 : f32 to vector<2x256xf32>
    %48 = arith.addf %47, %46 : vector<2x256xf32>
    %49 = arith.divf %47, %48 : vector<2x256xf32>
    %50 = vector.extract_strided_slice %38 {offsets = [0, 256], sizes = [2, 256], strides = [1, 1]} : vector<2x768xf32> to vector<2x256xf32>
    %51 = vector.extract_strided_slice %40 {offsets = [0, 256], sizes = [2, 256], strides = [1, 1]} : vector<2x512xf32> to vector<2x256xf32>
    %52 = arith.addf %50, %51 : vector<2x256xf32>
    %53 = arith.negf %52 : vector<2x256xf32>
    %54 = math.exp %53 : vector<2x256xf32>
    %cst_19 = arith.constant 1.000000e+00 : f32
    %55 = vector.broadcast %cst_19 : f32 to vector<2x256xf32>
    %56 = arith.addf %55, %54 : vector<2x256xf32>
    %57 = arith.divf %55, %56 : vector<2x256xf32>
    %58 = vector.extract_strided_slice %38 {offsets = [0, 512], sizes = [2, 256], strides = [1, 1]} : vector<2x768xf32> to vector<2x256xf32>
    %59 = vector.broadcast %5 : vector<1x256xf32> to vector<2x256xf32>
    %60 = arith.addf %41, %59 : vector<2x256xf32>
    %61 = arith.mulf %49, %60 : vector<2x256xf32>
    %62 = arith.addf %58, %61 : vector<2x256xf32>
    %63 = math.tanh %62 : vector<2x256xf32>
    %64 = arith.subf %36, %63 : vector<2x256xf32>
    %65 = arith.mulf %57, %64 : vector<2x256xf32>
    %66 = arith.addf %63, %65 : vector<2x256xf32>
    %c0_20 = arith.constant 0 : index
    %c2 = arith.constant 2 : index
    %c0_21 = arith.constant 0 : index
    %67 = vector.load %arg1[%c0_20, %c2, %c0_21] : memref<2x8x768xf32, #tpu.memory_space<vmem>>, vector<2x1x768xf32>
    %68 = vector.shape_cast %67 : vector<2x1x768xf32> to vector<2x768xf32>
    %69 = arith.truncf %66 : vector<2x256xf32> to vector<2x256xbf16>
    %cst_22 = arith.constant dense<0.000000e+00> : vector<2x512xf32>
    %70 = tpu.matmul %69, %3, %cst_22 {dimension_numbers = #tpu.dot_dimension_numbers<[1], [0], [0], [1], [0, 0, 1, 1], [], []>} : vector<2x256xbf16>, vector<256x512xbf16>, vector<2x512xf32> -> vector<2x512xf32>
    %cst_23 = arith.constant dense<0.000000e+00> : vector<2x256xf32>
    %71 = tpu.matmul %69, %4, %cst_23 {dimension_numbers = #tpu.dot_dimension_numbers<[1], [0], [0], [1], [0, 0, 1, 1], [], []>} : vector<2x256xbf16>, vector<256x256xbf16>, vector<2x256xf32> -> vector<2x256xf32>
    %72 = vector.extract_strided_slice %68 {offsets = [0, 0], sizes = [2, 256], strides = [1, 1]} : vector<2x768xf32> to vector<2x256xf32>
    %73 = vector.extract_strided_slice %70 {offsets = [0, 0], sizes = [2, 256], strides = [1, 1]} : vector<2x512xf32> to vector<2x256xf32>
    %74 = arith.addf %72, %73 : vector<2x256xf32>
    %75 = arith.negf %74 : vector<2x256xf32>
    %76 = math.exp %75 : vector<2x256xf32>
    %cst_24 = arith.constant 1.000000e+00 : f32
    %77 = vector.broadcast %cst_24 : f32 to vector<2x256xf32>
    %78 = arith.addf %77, %76 : vector<2x256xf32>
    %79 = arith.divf %77, %78 : vector<2x256xf32>
    %80 = vector.extract_strided_slice %68 {offsets = [0, 256], sizes = [2, 256], strides = [1, 1]} : vector<2x768xf32> to vector<2x256xf32>
    %81 = vector.extract_strided_slice %70 {offsets = [0, 256], sizes = [2, 256], strides = [1, 1]} : vector<2x512xf32> to vector<2x256xf32>
    %82 = arith.addf %80, %81 : vector<2x256xf32>
    %83 = arith.negf %82 : vector<2x256xf32>
    %84 = math.exp %83 : vector<2x256xf32>
    %cst_25 = arith.constant 1.000000e+00 : f32
    %85 = vector.broadcast %cst_25 : f32 to vector<2x256xf32>
    %86 = arith.addf %85, %84 : vector<2x256xf32>
    %87 = arith.divf %85, %86 : vector<2x256xf32>
    %88 = vector.extract_strided_slice %68 {offsets = [0, 512], sizes = [2, 256], strides = [1, 1]} : vector<2x768xf32> to vector<2x256xf32>
    %89 = vector.broadcast %5 : vector<1x256xf32> to vector<2x256xf32>
    %90 = arith.addf %71, %89 : vector<2x256xf32>
    %91 = arith.mulf %79, %90 : vector<2x256xf32>
    %92 = arith.addf %88, %91 : vector<2x256xf32>
    %93 = math.tanh %92 : vector<2x256xf32>
    %94 = arith.subf %66, %93 : vector<2x256xf32>
    %95 = arith.mulf %87, %94 : vector<2x256xf32>
    %96 = arith.addf %93, %95 : vector<2x256xf32>
    %c0_26 = arith.constant 0 : index
    %c3 = arith.constant 3 : index
    %c0_27 = arith.constant 0 : index
    %97 = vector.load %arg1[%c0_26, %c3, %c0_27] : memref<2x8x768xf32, #tpu.memory_space<vmem>>, vector<2x1x768xf32>
    %98 = vector.shape_cast %97 : vector<2x1x768xf32> to vector<2x768xf32>
    %99 = arith.truncf %96 : vector<2x256xf32> to vector<2x256xbf16>
    %cst_28 = arith.constant dense<0.000000e+00> : vector<2x512xf32>
    %100 = tpu.matmul %99, %3, %cst_28 {dimension_numbers = #tpu.dot_dimension_numbers<[1], [0], [0], [1], [0, 0, 1, 1], [], []>} : vector<2x256xbf16>, vector<256x512xbf16>, vector<2x512xf32> -> vector<2x512xf32>
    %cst_29 = arith.constant dense<0.000000e+00> : vector<2x256xf32>
    %101 = tpu.matmul %99, %4, %cst_29 {dimension_numbers = #tpu.dot_dimension_numbers<[1], [0], [0], [1], [0, 0, 1, 1], [], []>} : vector<2x256xbf16>, vector<256x256xbf16>, vector<2x256xf32> -> vector<2x256xf32>
    %102 = vector.extract_strided_slice %98 {offsets = [0, 0], sizes = [2, 256], strides = [1, 1]} : vector<2x768xf32> to vector<2x256xf32>
    %103 = vector.extract_strided_slice %100 {offsets = [0, 0], sizes = [2, 256], strides = [1, 1]} : vector<2x512xf32> to vector<2x256xf32>
    %104 = arith.addf %102, %103 : vector<2x256xf32>
    %105 = arith.negf %104 : vector<2x256xf32>
    %106 = math.exp %105 : vector<2x256xf32>
    %cst_30 = arith.constant 1.000000e+00 : f32
    %107 = vector.broadcast %cst_30 : f32 to vector<2x256xf32>
    %108 = arith.addf %107, %106 : vector<2x256xf32>
    %109 = arith.divf %107, %108 : vector<2x256xf32>
    %110 = vector.extract_strided_slice %98 {offsets = [0, 256], sizes = [2, 256], strides = [1, 1]} : vector<2x768xf32> to vector<2x256xf32>
    %111 = vector.extract_strided_slice %100 {offsets = [0, 256], sizes = [2, 256], strides = [1, 1]} : vector<2x512xf32> to vector<2x256xf32>
    %112 = arith.addf %110, %111 : vector<2x256xf32>
    %113 = arith.negf %112 : vector<2x256xf32>
    %114 = math.exp %113 : vector<2x256xf32>
    %cst_31 = arith.constant 1.000000e+00 : f32
    %115 = vector.broadcast %cst_31 : f32 to vector<2x256xf32>
    %116 = arith.addf %115, %114 : vector<2x256xf32>
    %117 = arith.divf %115, %116 : vector<2x256xf32>
    %118 = vector.extract_strided_slice %98 {offsets = [0, 512], sizes = [2, 256], strides = [1, 1]} : vector<2x768xf32> to vector<2x256xf32>
    %119 = vector.broadcast %5 : vector<1x256xf32> to vector<2x256xf32>
    %120 = arith.addf %101, %119 : vector<2x256xf32>
    %121 = arith.mulf %109, %120 : vector<2x256xf32>
    %122 = arith.addf %118, %121 : vector<2x256xf32>
    %123 = math.tanh %122 : vector<2x256xf32>
    %124 = arith.subf %96, %123 : vector<2x256xf32>
    %125 = arith.mulf %117, %124 : vector<2x256xf32>
    %126 = arith.addf %123, %125 : vector<2x256xf32>
    %c0_32 = arith.constant 0 : index
    %c4 = arith.constant 4 : index
    %c0_33 = arith.constant 0 : index
    %127 = vector.load %arg1[%c0_32, %c4, %c0_33] : memref<2x8x768xf32, #tpu.memory_space<vmem>>, vector<2x1x768xf32>
    %128 = vector.shape_cast %127 : vector<2x1x768xf32> to vector<2x768xf32>
    %129 = arith.truncf %126 : vector<2x256xf32> to vector<2x256xbf16>
    %cst_34 = arith.constant dense<0.000000e+00> : vector<2x512xf32>
    %130 = tpu.matmul %129, %3, %cst_34 {dimension_numbers = #tpu.dot_dimension_numbers<[1], [0], [0], [1], [0, 0, 1, 1], [], []>} : vector<2x256xbf16>, vector<256x512xbf16>, vector<2x512xf32> -> vector<2x512xf32>
    %cst_35 = arith.constant dense<0.000000e+00> : vector<2x256xf32>
    %131 = tpu.matmul %129, %4, %cst_35 {dimension_numbers = #tpu.dot_dimension_numbers<[1], [0], [0], [1], [0, 0, 1, 1], [], []>} : vector<2x256xbf16>, vector<256x256xbf16>, vector<2x256xf32> -> vector<2x256xf32>
    %132 = vector.extract_strided_slice %128 {offsets = [0, 0], sizes = [2, 256], strides = [1, 1]} : vector<2x768xf32> to vector<2x256xf32>
    %133 = vector.extract_strided_slice %130 {offsets = [0, 0], sizes = [2, 256], strides = [1, 1]} : vector<2x512xf32> to vector<2x256xf32>
    %134 = arith.addf %132, %133 : vector<2x256xf32>
    %135 = arith.negf %134 : vector<2x256xf32>
    %136 = math.exp %135 : vector<2x256xf32>
    %cst_36 = arith.constant 1.000000e+00 : f32
    %137 = vector.broadcast %cst_36 : f32 to vector<2x256xf32>
    %138 = arith.addf %137, %136 : vector<2x256xf32>
    %139 = arith.divf %137, %138 : vector<2x256xf32>
    %140 = vector.extract_strided_slice %128 {offsets = [0, 256], sizes = [2, 256], strides = [1, 1]} : vector<2x768xf32> to vector<2x256xf32>
    %141 = vector.extract_strided_slice %130 {offsets = [0, 256], sizes = [2, 256], strides = [1, 1]} : vector<2x512xf32> to vector<2x256xf32>
    %142 = arith.addf %140, %141 : vector<2x256xf32>
    %143 = arith.negf %142 : vector<2x256xf32>
    %144 = math.exp %143 : vector<2x256xf32>
    %cst_37 = arith.constant 1.000000e+00 : f32
    %145 = vector.broadcast %cst_37 : f32 to vector<2x256xf32>
    %146 = arith.addf %145, %144 : vector<2x256xf32>
    %147 = arith.divf %145, %146 : vector<2x256xf32>
    %148 = vector.extract_strided_slice %128 {offsets = [0, 512], sizes = [2, 256], strides = [1, 1]} : vector<2x768xf32> to vector<2x256xf32>
    %149 = vector.broadcast %5 : vector<1x256xf32> to vector<2x256xf32>
    %150 = arith.addf %131, %149 : vector<2x256xf32>
    %151 = arith.mulf %139, %150 : vector<2x256xf32>
    %152 = arith.addf %148, %151 : vector<2x256xf32>
    %153 = math.tanh %152 : vector<2x256xf32>
    %154 = arith.subf %126, %153 : vector<2x256xf32>
    %155 = arith.mulf %147, %154 : vector<2x256xf32>
    %156 = arith.addf %153, %155 : vector<2x256xf32>
    %c0_38 = arith.constant 0 : index
    %c5 = arith.constant 5 : index
    %c0_39 = arith.constant 0 : index
    %157 = vector.load %arg1[%c0_38, %c5, %c0_39] : memref<2x8x768xf32, #tpu.memory_space<vmem>>, vector<2x1x768xf32>
    %158 = vector.shape_cast %157 : vector<2x1x768xf32> to vector<2x768xf32>
    %159 = arith.truncf %156 : vector<2x256xf32> to vector<2x256xbf16>
    %cst_40 = arith.constant dense<0.000000e+00> : vector<2x512xf32>
    %160 = tpu.matmul %159, %3, %cst_40 {dimension_numbers = #tpu.dot_dimension_numbers<[1], [0], [0], [1], [0, 0, 1, 1], [], []>} : vector<2x256xbf16>, vector<256x512xbf16>, vector<2x512xf32> -> vector<2x512xf32>
    %cst_41 = arith.constant dense<0.000000e+00> : vector<2x256xf32>
    %161 = tpu.matmul %159, %4, %cst_41 {dimension_numbers = #tpu.dot_dimension_numbers<[1], [0], [0], [1], [0, 0, 1, 1], [], []>} : vector<2x256xbf16>, vector<256x256xbf16>, vector<2x256xf32> -> vector<2x256xf32>
    %162 = vector.extract_strided_slice %158 {offsets = [0, 0], sizes = [2, 256], strides = [1, 1]} : vector<2x768xf32> to vector<2x256xf32>
    %163 = vector.extract_strided_slice %160 {offsets = [0, 0], sizes = [2, 256], strides = [1, 1]} : vector<2x512xf32> to vector<2x256xf32>
    %164 = arith.addf %162, %163 : vector<2x256xf32>
    %165 = arith.negf %164 : vector<2x256xf32>
    %166 = math.exp %165 : vector<2x256xf32>
    %cst_42 = arith.constant 1.000000e+00 : f32
    %167 = vector.broadcast %cst_42 : f32 to vector<2x256xf32>
    %168 = arith.addf %167, %166 : vector<2x256xf32>
    %169 = arith.divf %167, %168 : vector<2x256xf32>
    %170 = vector.extract_strided_slice %158 {offsets = [0, 256], sizes = [2, 256], strides = [1, 1]} : vector<2x768xf32> to vector<2x256xf32>
    %171 = vector.extract_strided_slice %160 {offsets = [0, 256], sizes = [2, 256], strides = [1, 1]} : vector<2x512xf32> to vector<2x256xf32>
    %172 = arith.addf %170, %171 : vector<2x256xf32>
    %173 = arith.negf %172 : vector<2x256xf32>
    %174 = math.exp %173 : vector<2x256xf32>
    %cst_43 = arith.constant 1.000000e+00 : f32
    %175 = vector.broadcast %cst_43 : f32 to vector<2x256xf32>
    %176 = arith.addf %175, %174 : vector<2x256xf32>
    %177 = arith.divf %175, %176 : vector<2x256xf32>
    %178 = vector.extract_strided_slice %158 {offsets = [0, 512], sizes = [2, 256], strides = [1, 1]} : vector<2x768xf32> to vector<2x256xf32>
    %179 = vector.broadcast %5 : vector<1x256xf32> to vector<2x256xf32>
    %180 = arith.addf %161, %179 : vector<2x256xf32>
    %181 = arith.mulf %169, %180 : vector<2x256xf32>
    %182 = arith.addf %178, %181 : vector<2x256xf32>
    %183 = math.tanh %182 : vector<2x256xf32>
    %184 = arith.subf %156, %183 : vector<2x256xf32>
    %185 = arith.mulf %177, %184 : vector<2x256xf32>
    %186 = arith.addf %183, %185 : vector<2x256xf32>
    %c0_44 = arith.constant 0 : index
    %c6 = arith.constant 6 : index
    %c0_45 = arith.constant 0 : index
    %187 = vector.load %arg1[%c0_44, %c6, %c0_45] : memref<2x8x768xf32, #tpu.memory_space<vmem>>, vector<2x1x768xf32>
    %188 = vector.shape_cast %187 : vector<2x1x768xf32> to vector<2x768xf32>
    %189 = arith.truncf %186 : vector<2x256xf32> to vector<2x256xbf16>
    %cst_46 = arith.constant dense<0.000000e+00> : vector<2x512xf32>
    %190 = tpu.matmul %189, %3, %cst_46 {dimension_numbers = #tpu.dot_dimension_numbers<[1], [0], [0], [1], [0, 0, 1, 1], [], []>} : vector<2x256xbf16>, vector<256x512xbf16>, vector<2x512xf32> -> vector<2x512xf32>
    %cst_47 = arith.constant dense<0.000000e+00> : vector<2x256xf32>
    %191 = tpu.matmul %189, %4, %cst_47 {dimension_numbers = #tpu.dot_dimension_numbers<[1], [0], [0], [1], [0, 0, 1, 1], [], []>} : vector<2x256xbf16>, vector<256x256xbf16>, vector<2x256xf32> -> vector<2x256xf32>
    %192 = vector.extract_strided_slice %188 {offsets = [0, 0], sizes = [2, 256], strides = [1, 1]} : vector<2x768xf32> to vector<2x256xf32>
    %193 = vector.extract_strided_slice %190 {offsets = [0, 0], sizes = [2, 256], strides = [1, 1]} : vector<2x512xf32> to vector<2x256xf32>
    %194 = arith.addf %192, %193 : vector<2x256xf32>
    %195 = arith.negf %194 : vector<2x256xf32>
    %196 = math.exp %195 : vector<2x256xf32>
    %cst_48 = arith.constant 1.000000e+00 : f32
    %197 = vector.broadcast %cst_48 : f32 to vector<2x256xf32>
    %198 = arith.addf %197, %196 : vector<2x256xf32>
    %199 = arith.divf %197, %198 : vector<2x256xf32>
    %200 = vector.extract_strided_slice %188 {offsets = [0, 256], sizes = [2, 256], strides = [1, 1]} : vector<2x768xf32> to vector<2x256xf32>
    %201 = vector.extract_strided_slice %190 {offsets = [0, 256], sizes = [2, 256], strides = [1, 1]} : vector<2x512xf32> to vector<2x256xf32>
    %202 = arith.addf %200, %201 : vector<2x256xf32>
    %203 = arith.negf %202 : vector<2x256xf32>
    %204 = math.exp %203 : vector<2x256xf32>
    %cst_49 = arith.constant 1.000000e+00 : f32
    %205 = vector.broadcast %cst_49 : f32 to vector<2x256xf32>
    %206 = arith.addf %205, %204 : vector<2x256xf32>
    %207 = arith.divf %205, %206 : vector<2x256xf32>
    %208 = vector.extract_strided_slice %188 {offsets = [0, 512], sizes = [2, 256], strides = [1, 1]} : vector<2x768xf32> to vector<2x256xf32>
    %209 = vector.broadcast %5 : vector<1x256xf32> to vector<2x256xf32>
    %210 = arith.addf %191, %209 : vector<2x256xf32>
    %211 = arith.mulf %199, %210 : vector<2x256xf32>
    %212 = arith.addf %208, %211 : vector<2x256xf32>
    %213 = math.tanh %212 : vector<2x256xf32>
    %214 = arith.subf %186, %213 : vector<2x256xf32>
    %215 = arith.mulf %207, %214 : vector<2x256xf32>
    %216 = arith.addf %213, %215 : vector<2x256xf32>
    %c0_50 = arith.constant 0 : index
    %c7 = arith.constant 7 : index
    %c0_51 = arith.constant 0 : index
    %217 = vector.load %arg1[%c0_50, %c7, %c0_51] : memref<2x8x768xf32, #tpu.memory_space<vmem>>, vector<2x1x768xf32>
    %218 = vector.shape_cast %217 : vector<2x1x768xf32> to vector<2x768xf32>
    %219 = arith.truncf %216 : vector<2x256xf32> to vector<2x256xbf16>
    %cst_52 = arith.constant dense<0.000000e+00> : vector<2x512xf32>
    %220 = tpu.matmul %219, %3, %cst_52 {dimension_numbers = #tpu.dot_dimension_numbers<[1], [0], [0], [1], [0, 0, 1, 1], [], []>} : vector<2x256xbf16>, vector<256x512xbf16>, vector<2x512xf32> -> vector<2x512xf32>
    %cst_53 = arith.constant dense<0.000000e+00> : vector<2x256xf32>
    %221 = tpu.matmul %219, %4, %cst_53 {dimension_numbers = #tpu.dot_dimension_numbers<[1], [0], [0], [1], [0, 0, 1, 1], [], []>} : vector<2x256xbf16>, vector<256x256xbf16>, vector<2x256xf32> -> vector<2x256xf32>
    %222 = vector.extract_strided_slice %218 {offsets = [0, 0], sizes = [2, 256], strides = [1, 1]} : vector<2x768xf32> to vector<2x256xf32>
    %223 = vector.extract_strided_slice %220 {offsets = [0, 0], sizes = [2, 256], strides = [1, 1]} : vector<2x512xf32> to vector<2x256xf32>
    %224 = arith.addf %222, %223 : vector<2x256xf32>
    %225 = arith.negf %224 : vector<2x256xf32>
    %226 = math.exp %225 : vector<2x256xf32>
    %cst_54 = arith.constant 1.000000e+00 : f32
    %227 = vector.broadcast %cst_54 : f32 to vector<2x256xf32>
    %228 = arith.addf %227, %226 : vector<2x256xf32>
    %229 = arith.divf %227, %228 : vector<2x256xf32>
    %230 = vector.extract_strided_slice %218 {offsets = [0, 256], sizes = [2, 256], strides = [1, 1]} : vector<2x768xf32> to vector<2x256xf32>
    %231 = vector.extract_strided_slice %220 {offsets = [0, 256], sizes = [2, 256], strides = [1, 1]} : vector<2x512xf32> to vector<2x256xf32>
    %232 = arith.addf %230, %231 : vector<2x256xf32>
    %233 = arith.negf %232 : vector<2x256xf32>
    %234 = math.exp %233 : vector<2x256xf32>
    %cst_55 = arith.constant 1.000000e+00 : f32
    %235 = vector.broadcast %cst_55 : f32 to vector<2x256xf32>
    %236 = arith.addf %235, %234 : vector<2x256xf32>
    %237 = arith.divf %235, %236 : vector<2x256xf32>
    %238 = vector.extract_strided_slice %218 {offsets = [0, 512], sizes = [2, 256], strides = [1, 1]} : vector<2x768xf32> to vector<2x256xf32>
    %239 = vector.broadcast %5 : vector<1x256xf32> to vector<2x256xf32>
    %240 = arith.addf %221, %239 : vector<2x256xf32>
    %241 = arith.mulf %229, %240 : vector<2x256xf32>
    %242 = arith.addf %238, %241 : vector<2x256xf32>
    %243 = math.tanh %242 : vector<2x256xf32>
    %244 = arith.subf %216, %243 : vector<2x256xf32>
    %245 = arith.mulf %237, %244 : vector<2x256xf32>
    %246 = arith.addf %243, %245 : vector<2x256xf32>
    %247 = vector.shape_cast %36 : vector<2x256xf32> to vector<2x1x256xf32>
    %248 = vector.shape_cast %66 : vector<2x256xf32> to vector<2x1x256xf32>
    %249 = vector.shape_cast %96 : vector<2x256xf32> to vector<2x1x256xf32>
    %250 = vector.shape_cast %126 : vector<2x256xf32> to vector<2x1x256xf32>
    %251 = vector.shape_cast %156 : vector<2x256xf32> to vector<2x1x256xf32>
    %252 = vector.shape_cast %186 : vector<2x256xf32> to vector<2x1x256xf32>
    %253 = vector.shape_cast %216 : vector<2x256xf32> to vector<2x1x256xf32>
    %254 = vector.shape_cast %246 : vector<2x256xf32> to vector<2x1x256xf32>
    %255 = tpu.concatenate %247, %248, %249, %250, %251, %252, %253, %254 in 1 : vector<2x1x256xf32>, vector<2x1x256xf32>, vector<2x1x256xf32>, vector<2x1x256xf32>, vector<2x1x256xf32>, vector<2x1x256xf32>, vector<2x1x256xf32>, vector<2x1x256xf32> -> vector<2x8x256xf32>
    %c0_56 = arith.constant 0 : index
    %c0_57 = arith.constant 0 : index
    %c0_58 = arith.constant 0 : index
    %256 = vector.load %arg6[%c0_56, %c0_57, %c0_58] : memref<2x8x256xf32, #tpu.memory_space<vmem>>, vector<2x8x256xf32>
    tpu.vector_store %arg6[%c0_56, %c0_57, %c0_58], %255 {strides = array<i32>} : memref<2x8x256xf32, #tpu.memory_space<vmem>>, vector<2x8x256xf32>,
    %c0_59 = arith.constant 0 : index
    %c0_60 = arith.constant 0 : index
    %257 = vector.load %arg8[%c0_59, %c0_60] : memref<2x256xf32, #tpu.memory_space<vmem>>, vector<2x256xf32>
    tpu.vector_store %arg8[%c0_59, %c0_60], %246 {strides = array<i32>} : memref<2x256xf32, #tpu.memory_space<vmem>>, vector<2x256xf32>,
    %c1_i32 = arith.constant 1 : i32
    %258 = arith.cmpi eq, %arg0, %c1_i32 : i32
    %259 = arith.extui %258 : i1 to i32
    %c0_i32_61 = arith.constant 0 : i32
    %260 = arith.cmpi ne, %259, %c0_i32_61 : i32
    scf.if %260 {
      %c0_62 = arith.constant 0 : index
      %c0_63 = arith.constant 0 : index
      %261 = vector.load %arg7[%c0_62, %c0_63] : memref<2x256xf32, #tpu.memory_space<vmem>>, vector<2x256xf32>
      tpu.vector_store %arg7[%c0_62, %c0_63], %246 {strides = array<i32>} : memref<2x256xf32, #tpu.memory_space<vmem>>, vector<2x256xf32>,
    } else {
    }
    return
  }
  func.func @transform_0(%arg0: i32) -> (i32, i32, i32) {
    %c0_i32 = arith.constant 0 : i32
    %c0_i32_0 = arith.constant 0 : i32
    %c0_i32_1 = arith.constant 0 : i32
    return %c0_i32, %arg0, %c0_i32_0 : i32, i32, i32
  }
  func.func @transform_1(%arg0: i32) -> (i32, i32) {
    %c0_i32 = arith.constant 0 : i32
    %c0_i32_0 = arith.constant 0 : i32
    %c0_i32_1 = arith.constant 0 : i32
    return %c0_i32, %c0_i32_0 : i32, i32
  }
  func.func @transform_2(%arg0: i32) -> (i32, i32) {
    %c0_i32 = arith.constant 0 : i32
    %c0_i32_0 = arith.constant 0 : i32
    %c0_i32_1 = arith.constant 0 : i32
    return %c0_i32, %c0_i32_0 : i32, i32
  }
  func.func @transform_3(%arg0: i32) -> (i32, i32) {
    %c0_i32 = arith.constant 0 : i32
    %c0_i32_0 = arith.constant 0 : i32
    %c0_i32_1 = arith.constant 0 : i32
    return %c0_i32, %c0_i32_0 : i32, i32
  }
  func.func @transform_4(%arg0: i32) -> (i32, i32) {
    %c0_i32 = arith.constant 0 : i32
    %c0_i32_0 = arith.constant 0 : i32
    %c0_i32_1 = arith.constant 0 : i32
    return %c0_i32, %c0_i32_0 : i32, i32
  }
  func.func @transform_5(%arg0: i32) -> (i32, i32, i32) {
    %c0_i32 = arith.constant 0 : i32
    %c0_i32_0 = arith.constant 0 : i32
    %c0_i32_1 = arith.constant 0 : i32
    return %c0_i32, %arg0, %c0_i32_0 : i32, i32, i32
  }
  func.func @transform_6(%arg0: i32) -> (i32, i32) {
    %c0_i32 = arith.constant 0 : i32
    %c0_i32_0 = arith.constant 0 : i32
    %c0_i32_1 = arith.constant 0 : i32
    return %c0_i32, %c0_i32_0 : i32, i32
  }
}

</mosaic_0001>

<bundles_post_ra>
// kernel: tpu_custom_call.1
= control target key start
LH: loop header
LB: loop body
LE: loop exit
PB: predicated region body
PF: predicated region fallthrough
CT: control target
= control target key end

     0   :  { %s6495_s0 = inlined_call_operand.hbm [shape: f32[2,16,768], index: 0, kind: input, shape index: {}]   ;;  %s6496_s1 = inlined_call_operand.hbm [shape: f32[2,256], index: 1, kind: input, shape index: {}]   ;;  %s6497_s2 = inlined_call_operand.hbm [shape: bf16[256,512], index: 2, kind: input, shape index: {}]   ;;  %s6498_s3 = inlined_call_operand.hbm [shape: bf16[256,256], index: 3, kind: input, shape index: {}]   ;;  %s6499_s4 = inlined_call_operand.vmem [shape: f32[1,256], index: 4, kind: input, shape index: {}]   ;;  %s6500_s5 = inlined_call_operand.hbm [shape: f32[2,16,256], index: 5, kind: output, shape index: {0}]   ;;  %s6501_s6 = inlined_call_operand.hbm [shape: f32[2,256], index: 6, kind: output, shape index: {1}]  }
   0x1   :  { %6689 = sst [smem:[#allocation115_spill]] %s6496_s1 }
   0x2   :  { %6690 = sst [smem:[#allocation116_spill]] %s6497_s2 }
   0x3   :  { %6691 = sst [smem:[#allocation117_spill]] %s6498_s3 }
   0x4   :  { %12 = vsyncpa [#allocation4], 0 }
   0x5   :  { %14 = vsyncpa [#allocation4 + $0x1], 0 }
   0x6   :  { %15 = vsyncpa [#allocation7], 0 }
   0x7   :  { %16 = vsyncpa [#allocation10], 0 }
   0x8   :  { %17 = vsyncpa [#allocation5], 0 }
   0x9   :  { %19 = vsyncpa [#allocation5 + $0x1], 0 }
   0xa   :  { %20 = vsyncpa [#allocation13], 0  ;;  %s4773_s21 = smov 0   ;;  %s4775_s22 = smov 0  }
   0xb   :  { %s4777_s23 = smov 0   ;;  %s4779_s24 = smov 0  }
   0xc LB: > { %s4794_s25 = sadd.s32 4294967295, %s4722_s24   ;;  %s3675_s26 = sadd.s32 4294967294, %s4722_s24   ;;  %s4722_s24 = sphi %s4779_s24, %s7255_s24   ;;  %s4718_s23 = sphi %s4777_s23, %s7259_s23   ;;  %s4714_s22 = sphi %s4775_s22, %s7258_s22   ;;  %s4710_s21 = sphi %s4773_s21, %s7257_s21  }
   0xd   : > { %s4798_s27 = sadd.s32 1, %s4722_s24   ;;  %s33_s28 = sadd.s32 1, %s4718_s23 }
   0xe   : > { %6692 = sst [smem:[#allocation19_spill]] %s4798_s27  ;;  %s30_s29 = ssub.s32 %s4722_s24, %s4798_s27 }
   0xf   : > { %p40_p0 = scmp.ne.s32.totalorder %s4718_s23, %s4714_s22  ;;  %p31_p1 = scmp.eq.s32.totalorder %s30_s29, 0 }
  0x10   : > { %p41_p2 = scmp.eq.s32.totalorder %s4722_s24, 0  ;;  %p46_p3 = scmp.ne.s32.totalorder %s4714_s22, %s4710_s21 }
  0x11   : > { %p47_p4 = scmp.eq.s32.totalorder %s4794_s25, 0  ;;  %p6505_p7 = scmp.eq.s32.totalorder %s4794_s25, 1 }
  0x12   : > { %s4810_s30 = scalar_select %p31_p1, %s4718_s23, %s33_s28  }
  0x13   : > { %p4812_p5 = por %p41_p2, %p40_p0  ;;  %p4818_p6 = por %p47_p4, %p46_p3 }
  0x14   : > { %6693 = sst [smem:[#allocation20_spill]] %s4810_s30  ;;  %p160_p8 = scmp.eq.s32.totalorder %s3675_s26, 1 }
  0x15   : > { %p3676_p9 = scmp.ge.s32.totalorder %s4722_s24, 1  ;;  %p188_p10 = scmp.lt.s32.totalorder %s4722_s24, 3 }
  0x16   : > { %p4827_p11 = por %p6505_p7, %p40_p0  ;;  %p4831_p12 = por %p160_p8, %p46_p3 }
  0x17   : > { %p4835_p13 = pnand %p3676_p9, %p188_p10  ;;  %s6700_s1 = sld [smem:[#allocation115_spill]] }
  0x18   : > { %s6697_s10 = scalar_select %p4831_p12, 1, 0 }
  0x19   : > { %p4262_p0 = pneg %p4835_p13  ;;  %s4724_s15 = smov [#allocation6]  }
  0x1a   : > { %6698 = sst [smem:[#allocation21_spill]] %s6697_s10  ;;  %s202_s16 = sshll.u32 %s4724_s15, 4  ;;  %s203_s16 = int_to_ptr.vmem [resolvable:$true] %s202_s16 }
  0x1b   : > { %p4848_p3 = pnand %p4262_p0, %p47_p4  ;;  %p4283_p8 = scmp.lt.s32.totalorder %s4722_s24, 2 }
  0x1c   : > { %s6702_s2 = sld [smem:[#allocation116_spill]]  ;;  %s4725_s28 = smov [#allocation8]  }
  0x1d   : > { %s200_s14 = sshll.u32 %s6700_s1, 4  ;;  %p4860_p9 = pnand %p4283_p8, %p4812_p5  ;;  %s201_s14 = int_to_ptr.hbm [resolvable:$true] %s200_s14 }
  0x1e   : > { %4265 = dma.hbm_to_vmem [thread:$0]  (!%p4848_p3), %s201_s14, 64, %s203_s16, [#allocation7]  }
  0x1f   : > { %s213_s29 = sshll.u32 %s4725_s28, 4  ;;  %s6704_s3 = sld [smem:[#allocation117_spill]]  ;;  %s214_s29 = int_to_ptr.vmem [resolvable:$true] %s213_s29 }
  0x20   : > { %s4726_s18 = smov 256   ;;  %s4727_s19 = smov 16  }
  0x21   : > { %s4728_s14 = smov [#allocation9]   ;;  %s4729_s16 = smov 128  }
  0x22   : > { %s211_s20 = sshll.u32 %s6702_s2, 4  ;;  %s227_s7 = sshll.u32 %s4728_s14, 4  ;;  %s212_s20 = int_to_ptr.hbm [resolvable:$true] %s211_s20  ;;  %s228_s7 = int_to_ptr.vmem [resolvable:$true] %s227_s7 }
  0x23   : > { %4268 = dma.hbm_to_vmem [thread:$0]  (!%p4848_p3), %s212_s20, 8192, %s214_s29, [#allocation7], %s4726_s18, %s4726_s18, %s4727_s19  }
  0x24   : > { %s4730_s1 = smov 8   ;;  %s244_s2 = sand.u32 1, %s4718_s23  }
  0x25   : > { %s225_s15 = sshll.u32 %s6704_s3, 4  ;;  %s4240_s28 = smul.u32 48, %s4722_s24  ;;  %s226_s15 = int_to_ptr.hbm [resolvable:$true] %s225_s15 }
  0x26   : > { %4271 = dma.hbm_to_vmem [thread:$0]  (!%p4848_p3), %s226_s15, 4096, %s228_s7, [#allocation10], %s4729_s16, %s4729_s16, %s4730_s1  }
  0x27   : > { %s4239_s30 = smul.u32 96, %s244_s2  ;;  %s253_s12 = scalar_lea.hbm %s6495_s0, %s4240_s28 }
  0x28   : > { %s254_s13 = sshll.u32 %s253_s12, 4  ;;  %s245_s29 = scalar_lea.sflag [#allocation4], %s244_s2  ;;  %s255_s13 = int_to_ptr.hbm [resolvable:$true] %s254_s13 }
  0x29   : > { %s248_s3 = scalar_lea.vmem [#allocation3], %s4239_s30  ;;  %s4586_s18 = sshra.s32 %s255_s13, 4  ;;  %s4587_s18 = int_to_ptr.hbm [resolvable:$true] %s4586_s18 }
  0x2a   : > { %s256_s20 = sshll.u32 %s248_s3, 4  ;;  %s4588_s19 = scalar_lea.hbm %s4587_s18, 96  ;;  %s257_s20 = int_to_ptr.vmem [resolvable:$true] %s256_s20 }
  0x2b   : > { %p4589_p5 = scmp.ne.s32.totalorder %s4587_s18, %s4588_s19  ;;  %p4590_p10 = pneg %p4860_p9 }
  0x2c   : > { %s4593_s15 = scalar_lea.hbm %s6495_s0, 192  ;;  %p4594_p8 = scmp.lt.s32.totalorder %s4587_s18, %s6495_s0 }
  0x2d   : > { %p4591_p0 = pnand %p4590_p10, %p4589_p5  ;;  %p4595_p2 = scmp.lt.s32.totalorder %s4593_s15, %s4588_s19 }
  0x2f   : > { %p4592_p3 = pneg %p4591_p0  ;;  %p4596_p7 = por %p4595_p2, %p4594_p8 }
  0x31   : > { %p4597_p1 = pnand %p4596_p7, %p4592_p3 }
  0x33   : > { %4600 = shalt.err (!%p4597_p1)
}
  0x34   : > { %s4731_s2 = smov 1536   ;;  %s4732_s3 = smov 768  }
  0x35   : > { %s4733_s30 = smov 48   ;;  %268 = sbr.rel (%p4835_p13) target bundleno = 1819 (0x71b), region = 40 }
  0x36   : > { %4275 = dma.hbm_to_vmem [thread:$0]  (!%p4860_p9), %s255_s13, 1536, %s257_s20, %s245_s29, %s4731_s2, %s4732_s3, %s4733_s30  }
  0x3a   : > { %s4889_s14 = sand.u32 1, %s4714_s22  }
  0x3b   : > { %s4241_s7 = smul.u32 96, %s4889_s14  ;;  %s271_s16 = scalar_lea.sflag [#allocation4], %s4889_s14 }
  0x3d   : > { %s4893_s28 = scalar_lea.vmem [#allocation3], %s4241_s7 }
  0x3e   : > { %4689 = dma.done.wait (%p4818_p6), %s271_s16, 1536  }
  0x3f   : > { %4691 = vsyncadd (%p4818_p6), %s271_s16, 4294965760 }
  0x40   : > { %4693 = dma.done.wait (%p47_p4), [#allocation7], 8256  }
  0x41   : > { %4695 = vsyncadd (%p47_p4), [#allocation7], 4294959040 }
  0x42   : > { %4697 = dma.done.wait (%p47_p4), [#allocation10], 4096  }
  0x43   : > { %4699 = vsyncadd (%p47_p4), [#allocation10], 4294963200  ;;  %s3686_s11 = sshll.u32 %s4889_s14, 5  ;;  %p6705_p7 = scmp.ne.s32.totalorder %s4794_s25, 0 }
  0x44   : > { %s4908_s26 = scalar_lea.vmem [#allocation11], %s3686_s11 }
  0x45   : > { %322 = sbr.rel (%p6705_p7) target bundleno = 76 (0x4c), region = 60 }
  0x4a   : > { %v323_v0 = vld [vmem:[#allocation6] sm:$0xf] }
  0x4b   : > { %324 = vst [vmem:[#allocation2] sm:$0xf] %v323_v0 }
  0x4c PF: > { %v3804_v1 = vld [vmem:[#allocation8 + $0xe0] sm:$0xf]  ;;  %v4172_v2 = vld [vmem:[#allocation8 + $0xec] sm:$0xf0]  ;;  %v4170_v3 = vld [vmem:[#allocation8 + $0xe4] sm:$0xf] }
  0x4d   : > { %v4912_v4 = vor.u32 %v4172_v2, %v3804_v1  ;;  %v3806_v5 = vld [vmem:[#allocation8 + $0xf0] sm:$0xf0]  ;;  %v4202_v6 = vld [vmem:[#allocation8 + $0x1e4] sm:$0xf]  ;;  %v3932_v10 = vld [vmem:[#allocation8 + $0x1e0] sm:$0xf] }
  0x4e   : > { %v3934_v7 = vld [vmem:[#allocation8 + $0x1f0] sm:$0xf0]  ;;  %v4914_v8 = vor.u32 %v4170_v3, %v3806_v5  ;;  %v4204_v11 = vld [vmem:[#allocation8 + $0x1ec] sm:$0xf0]  ;;  %v3788_v12 = vld [vmem:[#allocation8 + $0xc0] sm:$0xf] }
  0x4f   : > { %6706 = vst [vmem:[#allocation22_spill] sm:$0xff] %v4912_v4  ;;  %v4916_v9 = vor.u32 %v4202_v6, %v3934_v7  ;;  %758 = vmatpush.bf16.msra.mxu0 %v4912_v4  ;;  %v4919_v13 = vor.u32 %v4204_v11, %v3932_v10  ;;  %v4168_v14 = vld [vmem:[#allocation8 + $0xcc] sm:$0xf0]  ;;  %v4166_v15 = vld [vmem:[#allocation8 + $0xc4] sm:$0xf]  ;;  %vm865_vm0 = vcmask 1040384  }
  0x50   : > { %6707 = vst [vmem:[#allocation23_spill] sm:$0xff] %v4914_v8  ;;  %v3790_v16 = vld [vmem:[#allocation8 + $0xd0] sm:$0xf0]  ;;  %784 = vmatpush.bf16.msra.mxu2 %v4914_v8  ;;  %v4923_v17 = vor.u32 %v4168_v14, %v3788_v12  ;;  %v4198_v19 = vld [vmem:[#allocation8 + $0x1c4] sm:$0xf]  ;;  %vm867_vm1 = vcmask 1041409  }
  0x51   : > { %6708 = vst [vmem:[#allocation24_spill] sm:$0xff] %v4916_v9  ;;  %797 = vmatpush.bf16.msra.mxu3 %v4916_v9  ;;  %v4925_v18 = vor.u32 %v4166_v15, %v3790_v16  ;;  %v3918_v20 = vld [vmem:[#allocation8 + $0x1d0] sm:$0xf0]  ;;  %v3916_v21 = vld [vmem:[#allocation8 + $0x1c0] sm:$0xf]  ;;  %771 = vmatpush.bf16.msra.mxu1 %v4919_v13  ;;  %p4134_p4 = scmp.ne.s32.totalorder %s4794_s25, 1 }
  0x52   : > { %6709 = vst [vmem:[#allocation25_spill] sm:$0xff] %v4919_v13  ;;  %v4928_v22 = vor.u32 %v4198_v19, %v3918_v20  ;;  %v4200_v23 = vld [vmem:[#allocation8 + $0x1cc] sm:$0xf0]  ;;  %v3772_v24 = vld [vmem:[#allocation8 + $0xa0] sm:$0xf] }
  0x53   : > { %6710 = vst [vmem:[#allocation26_spill] sm:$0xff] %v4923_v17  ;;  %v4164_v25 = vld [vmem:[#allocation8 + $0xac] sm:$0xf0]  ;;  %v4930_v26 = vor.u32 %v4200_v23, %v3916_v21  ;;  %v4162_v27 = vld [vmem:[#allocation8 + $0xa4] sm:$0xf]  ;;  %759 = vmatpush.bf16.msra.mxu0 %v4923_v17 }
  0x54   : > { %6711 = vst [vmem:[#allocation27_spill] sm:$0xff] %v4925_v18  ;;  %v3774_v28 = vld [vmem:[#allocation8 + $0xb0] sm:$0xf0]  ;;  %v4194_v29 = vld [vmem:[#allocation8 + $0x1a4] sm:$0xf]  ;;  %v4933_v30 = vor.u32 %v4164_v25, %v3772_v24  ;;  %785 = vmatpush.bf16.msra.mxu2 %v4925_v18 }
  0x55   : > { %6712 = vst [vmem:[#allocation28_spill] sm:$0xff] %v4928_v22  ;;  %v3902_v31 = vld [vmem:[#allocation8 + $0x1b0] sm:$0xf0]  ;;  %v3900_v32 = vld [vmem:[#allocation8 + $0x1a0] sm:$0xf]  ;;  %798 = vmatpush.bf16.msra.mxu3 %v4928_v22  ;;  %v4937_v34 = vor.u32 %v4162_v27, %v3774_v28  ;;  %772 = vmatpush.bf16.msra.mxu1 %v4930_v26 }
  0x56   : > { %6713 = vst [vmem:[#allocation29_spill] sm:$0xff] %v4930_v26  ;;  %v4196_v33 = vld [vmem:[#allocation8 + $0x1ac] sm:$0xf0]  ;;  %v4939_v35 = vor.u32 %v4194_v29, %v3902_v31  ;;  %v3756_v36 = vld [vmem:[#allocation8 + $0x80] sm:$0xf] }
  0x57   : > { %6714 = vst [vmem:[#allocation30_spill] sm:$0xff] %v4933_v30  ;;  %v4160_v37 = vld [vmem:[#allocation8 + $0x8c] sm:$0xf0]  ;;  %v4158_v38 = vld [vmem:[#allocation8 + $0x84] sm:$0xf]  ;;  %v4942_v39 = vor.u32 %v4196_v33, %v3900_v32  ;;  %760 = vmatpush.bf16.msra.mxu0 %v4933_v30 }
  0x58   : > { %6715 = vst [vmem:[#allocation31_spill] sm:$0xff] %v4937_v34  ;;  %v3758_v40 = vld [vmem:[#allocation8 + $0x90] sm:$0xf0]  ;;  %v4190_v41 = vld [vmem:[#allocation8 + $0x184] sm:$0xf]  ;;  %v4945_v45 = vor.u32 %v4160_v37, %v3756_v36  ;;  %786 = vmatpush.bf16.msra.mxu2 %v4937_v34 }
  0x59   : > { %6716 = vst [vmem:[#allocation32_spill] sm:$0xff] %v4939_v35  ;;  %v3886_v42 = vld [vmem:[#allocation8 + $0x190] sm:$0xf0]  ;;  %v3884_v43 = vld [vmem:[#allocation8 + $0x180] sm:$0xf]  ;;  %799 = vmatpush.bf16.msra.mxu3 %v4939_v35  ;;  %v4949_v46 = vor.u32 %v4158_v38, %v3758_v40  ;;  %773 = vmatpush.bf16.msra.mxu1 %v4942_v39 }
  0x5a   : > { %6717 = vst [vmem:[#allocation33_spill] sm:$0xff] %v4942_v39  ;;  %v4192_v44 = vld [vmem:[#allocation8 + $0x18c] sm:$0xf0]  ;;  %v4951_v47 = vor.u32 %v4190_v41, %v3886_v42  ;;  %v3740_v48 = vld [vmem:[#allocation8 + $0x60] sm:$0xf] }
  0x5b   : > { %6718 = vst [vmem:[#allocation34_spill] sm:$0xff] %v4945_v45  ;;  %v4156_v49 = vld [vmem:[#allocation8 + $0x6c] sm:$0xf0]  ;;  %v4154_v50 = vld [vmem:[#allocation8 + $0x64] sm:$0xf]  ;;  %v4954_v51 = vor.u32 %v4192_v44, %v3884_v43  ;;  %761 = vmatpush.bf16.msra.mxu0 %v4945_v45 }
  0x5c   : > { %6719 = vst [vmem:[#allocation35_spill] sm:$0xff] %v4949_v46  ;;  %v3742_v52 = vld [vmem:[#allocation8 + $0x70] sm:$0xf0]  ;;  %v4186_v53 = vld [vmem:[#allocation8 + $0x164] sm:$0xf]  ;;  %v4957_v57 = vor.u32 %v4156_v49, %v3740_v48  ;;  %787 = vmatpush.bf16.msra.mxu2 %v4949_v46 }
  0x5d   : > { %6720 = vst [vmem:[#allocation36_spill] sm:$0xff] %v4951_v47  ;;  %v3870_v54 = vld [vmem:[#allocation8 + $0x170] sm:$0xf0]  ;;  %v3868_v55 = vld [vmem:[#allocation8 + $0x160] sm:$0xf]  ;;  %800 = vmatpush.bf16.msra.mxu3 %v4951_v47  ;;  %v4961_v58 = vor.u32 %v4154_v50, %v3742_v52  ;;  %774 = vmatpush.bf16.msra.mxu1 %v4954_v51 }
  0x5e   : > { %6721 = vst [vmem:[#allocation37_spill] sm:$0xff] %v4954_v51  ;;  %v4188_v56 = vld [vmem:[#allocation8 + $0x16c] sm:$0xf0]  ;;  %v4963_v59 = vor.u32 %v4186_v53, %v3870_v54  ;;  %v3724_v60 = vld [vmem:[#allocation8 + $0x40] sm:$0xf] }
  0x5f   : > { %6722 = vst [vmem:[#allocation38_spill] sm:$0xff] %v4957_v57  ;;  %v4152_v61 = vld [vmem:[#allocation8 + $0x4c] sm:$0xf0]  ;;  %v4150_v62 = vld [vmem:[#allocation8 + $0x44] sm:$0xf]  ;;  %v4966_v63 = vor.u32 %v4188_v56, %v3868_v55  ;;  %762 = vmatpush.bf16.msra.mxu0 %v4957_v57 }
  0x60   : > { %6723 = vst [vmem:[#allocation39_spill] sm:$0xff] %v4961_v58  ;;  %v3726_v0 = vld [vmem:[#allocation8 + $0x50] sm:$0xf0]  ;;  %v4182_v1 = vld [vmem:[#allocation8 + $0x144] sm:$0xf]  ;;  %v4969_v6 = vor.u32 %v4152_v61, %v3724_v60  ;;  %788 = vmatpush.bf16.msra.mxu2 %v4961_v58 }
  0x61   : > { %6724 = vst [vmem:[#allocation40_spill] sm:$0xff] %v4963_v59  ;;  %v3854_v2 = vld [vmem:[#allocation8 + $0x150] sm:$0xf0]  ;;  %v3852_v3 = vld [vmem:[#allocation8 + $0x140] sm:$0xf]  ;;  %801 = vmatpush.bf16.msra.mxu3 %v4963_v59  ;;  %v4973_v7 = vor.u32 %v4150_v62, %v3726_v0  ;;  %775 = vmatpush.bf16.msra.mxu1 %v4966_v63 }
  0x62   : > { %6725 = vst [vmem:[#allocation41_spill] sm:$0xff] %v4966_v63  ;;  %v4184_v5 = vld [vmem:[#allocation8 + $0x14c] sm:$0xf0]  ;;  %v4975_v10 = vor.u32 %v4182_v1, %v3854_v2  ;;  %v3708_v11 = vld [vmem:[#allocation8 + $0x20] sm:$0xf] }
  0x63   : > { %6726 = vst [vmem:[#allocation42_spill] sm:$0xff] %v4969_v6  ;;  %v4148_v12 = vld [vmem:[#allocation8 + $0x2c] sm:$0xf0]  ;;  %v4146_v14 = vld [vmem:[#allocation8 + $0x24] sm:$0xf]  ;;  %v4978_v15 = vor.u32 %v4184_v5, %v3852_v3  ;;  %763 = vmatpush.bf16.msra.mxu0 %v4969_v6 }
  0x64   : > { %6727 = vst [vmem:[#allocation43_spill] sm:$0xff] %v4973_v7  ;;  %v3710_v16 = vld [vmem:[#allocation8 + $0x30] sm:$0xf0]  ;;  %v4178_v19 = vld [vmem:[#allocation8 + $0x124] sm:$0xf]  ;;  %v4981_v24 = vor.u32 %v4148_v12, %v3708_v11  ;;  %789 = vmatpush.bf16.msra.mxu2 %v4973_v7 }
  0x65   : > { %6728 = vst [vmem:[#allocation44_spill] sm:$0xff] %v4975_v10  ;;  %v3838_v20 = vld [vmem:[#allocation8 + $0x130] sm:$0xf0]  ;;  %v3836_v21 = vld [vmem:[#allocation8 + $0x120] sm:$0xf]  ;;  %802 = vmatpush.bf16.msra.mxu3 %v4975_v10  ;;  %v4985_v28 = vor.u32 %v4146_v14, %v3710_v16  ;;  %776 = vmatpush.bf16.msra.mxu1 %v4978_v15 }
  0x66   : > { %6729 = vst [vmem:[#allocation45_spill] sm:$0xff] %v4978_v15  ;;  %v4180_v23 = vld [vmem:[#allocation8 + $0x12c] sm:$0xf0]  ;;  %v3692_v25 = vld [vmem:[#allocation8] sm:$0xf]  ;;  %v4987_v29 = vor.u32 %v4178_v19, %v3838_v20 }
  0x67   : > { %6730 = vst [vmem:[#allocation46_spill] sm:$0xff] %v4981_v24  ;;  %v4144_v27 = vld [vmem:[#allocation8 + $0xc] sm:$0xf0]  ;;  %v4142_v31 = vld [vmem:[#allocation8 + $0x4] sm:$0xf]  ;;  %v4990_v36 = vor.u32 %v4180_v23, %v3836_v21  ;;  %764 = vmatpush.bf16.msra.mxu0 %v4981_v24 }
  0x68   : > { %6731 = vst [vmem:[#allocation47_spill] sm:$0xff] %v4985_v28  ;;  %v3694_v32 = vld [vmem:[#allocation8 + $0x10] sm:$0xf0]  ;;  %v4174_v33 = vld [vmem:[#allocation8 + $0x104] sm:$0xf]  ;;  %v4993_v44 = vor.u32 %v4144_v27, %v3692_v25  ;;  %790 = vmatpush.bf16.msra.mxu2 %v4985_v28 }
  0x69   : > { %6732 = vst [vmem:[#allocation48_spill] sm:$0xff] %v4987_v29  ;;  %v3822_v37 = vld [vmem:[#allocation8 + $0x110] sm:$0xf0]  ;;  %v3812_v38 = vld [vmem:[#allocation8 + $0xe8] sm:$0xf]  ;;  %803 = vmatpush.bf16.msra.mxu3 %v4987_v29  ;;  %v4997_v52 = vor.u32 %v4142_v31, %v3694_v32  ;;  %777 = vmatpush.bf16.msra.mxu1 %v4990_v36 }
  0x6a   : > { %6733 = vst [vmem:[#allocation49_spill] sm:$0xff] %v4990_v36  ;;  %v4173_v40 = vld [vmem:[#allocation8 + $0xf4] sm:$0xf0]  ;;  %v4171_v41 = vld [vmem:[#allocation8 + $0xec] sm:$0xf]  ;;  %v4999_v53 = vor.u32 %v4174_v33, %v3822_v37 }
  0x6b   : > { %v3814_v42 = vld [vmem:[#allocation8 + $0xf8] sm:$0xf0]  ;;  %v4203_v43 = vld [vmem:[#allocation8 + $0x1ec] sm:$0xf]  ;;  %6734 = vst [vmem:[#allocation50_spill] sm:$0xff] %v4993_v44  ;;  %v5002_v56 = vor.u32 %v4173_v40, %v3812_v38  ;;  %765 = vmatpush.bf16.msra.mxu0 %v4993_v44 }
  0x6c   : > { %v3942_v48 = vld [vmem:[#allocation8 + $0x1f8] sm:$0xf0]  ;;  %v3820_v49 = vld [vmem:[#allocation8 + $0x100] sm:$0xf]  ;;  %v4176_v50 = vld [vmem:[#allocation8 + $0x10c] sm:$0xf0]  ;;  %v5004_v60 = vor.u32 %v4171_v41, %v3814_v42  ;;  %791 = vmatpush.bf16.msra.mxu2 %v4997_v52 }
  0x6d   : > { %6735 = vst [vmem:[#allocation51_spill] sm:$0xff] %v4997_v52  ;;  %v3940_v54 = vld [vmem:[#allocation8 + $0x1e8] sm:$0xf]  ;;  %v4205_v55 = vld [vmem:[#allocation8 + $0x1f4] sm:$0xf0]  ;;  %v5006_v62 = vor.u32 %v4203_v43, %v3942_v48  ;;  %v5008_v0 = vor.u32 %v4176_v50, %v3820_v49  ;;  %804 = vmatpush.bf16.msra.mxu3 %v4999_v53 }
  0x6e   : > { %6736 = vst [vmem:[#allocation52_spill] sm:$0xff] %v4999_v53  ;;  %v3796_v61 = vld [vmem:[#allocation8 + $0xc8] sm:$0xf]  ;;  %v4169_v1 = vld [vmem:[#allocation8 + $0xd4] sm:$0xf0]  ;;  %v5011_v5 = vor.u32 %v4205_v55, %v3940_v54 }
  0x6f   : > { %6737 = vst [vmem:[#allocation53_spill] sm:$0xff] %v5002_v56  ;;  %v4167_v2 = vld [vmem:[#allocation8 + $0xcc] sm:$0xf]  ;;  %v3798_v3 = vld [vmem:[#allocation8 + $0xd8] sm:$0xf0]  ;;  %810 = vmatpush.bf16.msrb.mxu0 %v5002_v56  ;;  %v5019_v20 = vor.u32 %v4169_v1, %v3796_v61  ;;  %778 = vmatpush.bf16.msra.mxu1 %v5008_v0 }
  0x70   : > { %6738 = vst [vmem:[#allocation54_spill] sm:$0xff] %v5004_v60  ;;  %v4199_v11 = vld [vmem:[#allocation8 + $0x1cc] sm:$0xf]  ;;  %v3926_v12 = vld [vmem:[#allocation8 + $0x1d8] sm:$0xf0]  ;;  %836 = vmatpush.bf16.msrb.mxu2 %v5004_v60  ;;  %v5021_v21 = vor.u32 %v4167_v2, %v3798_v3 }
  0x71   : > { %6739 = vst [vmem:[#allocation55_spill] sm:$0xff] %v5006_v62  ;;  %v3924_v14 = vld [vmem:[#allocation8 + $0x1c8] sm:$0xf]  ;;  %v4201_v16 = vld [vmem:[#allocation8 + $0x1d4] sm:$0xf0]  ;;  %849 = vmatpush.bf16.msrb.mxu3 %v5006_v62  ;;  %v5026_v25 = vor.u32 %v4199_v11, %v3926_v12 }
  0x72   : > { %6740 = vst [vmem:[#allocation56_spill] sm:$0xff] %v5008_v0  ;;  %v5015_v19 = vld [vmem:[#allocation2] sm:$0xf]  ;;  %v3780_v23 = vld [vmem:[#allocation8 + $0xa8] sm:$0xf]  ;;  %v5029_v33 = vor.u32 %v4201_v16, %v3924_v14 }
  0x73   : > { %6741 = vst [vmem:[#allocation57_spill] sm:$0xff] %v5011_v5  ;;  %v4165_v27 = vld [vmem:[#allocation8 + $0xb4] sm:$0xf0]  ;;  %v4163_v31 = vld [vmem:[#allocation8 + $0xac] sm:$0xf]  ;;  %823 = vmatpush.bf16.msrb.mxu1 %v5011_v5  ;;  %811 = vmatpush.bf16.msrb.mxu0 %v5019_v20 }
  0x74   : > { %6742 = vst [vmem:[#allocation58_spill] sm:$0xff] %v5015_v19  ;;  %v3782_v32 = vld [vmem:[#allocation8 + $0xb8] sm:$0xf0]  ;;  %v4195_v37 = vld [vmem:[#allocation8 + $0x1ac] sm:$0xf]  ;;  %837 = vmatpush.bf16.msrb.mxu2 %v5021_v21  ;;  %v5033_v42 = vor.u32 %v4165_v27, %v3780_v23 }
  0x75   : > { %6743 = vst [vmem:[#allocation59_spill] sm:$0xff] %v5019_v20  ;;  %v3910_v38 = vld [vmem:[#allocation8 + $0x1b8] sm:$0xf0]  ;;  %v3908_v40 = vld [vmem:[#allocation8 + $0x1a8] sm:$0xf]  ;;  %v5035_v43 = vor.u32 %v4163_v31, %v3782_v32  ;;  %850 = vmatpush.bf16.msrb.mxu3 %v5026_v25 }
  0x76   : > { %6744 = vst [vmem:[#allocation60_spill] sm:$0xff] %v5021_v21  ;;  %v4197_v41 = vld [vmem:[#allocation8 + $0x1b4] sm:$0xf0]  ;;  %v3764_v48 = vld [vmem:[#allocation8 + $0x88] sm:$0xf]  ;;  %v5038_v50 = vor.u32 %v4195_v37, %v3910_v38 }
  0x77   : > { %431 = vst [vmem:[#allocation1] ss:$4 sm:$0xff] %v5015_v19  ;;  %v4161_v49 = vld [vmem:[#allocation8 + $0x94] sm:$0xf0]  ;;  %v4159_v54 = vld [vmem:[#allocation8 + $0x8c] sm:$0xf]  ;;  %824 = vmatpush.bf16.msrb.mxu1 %v5029_v33  ;;  %v5041_v1 = vor.u32 %v4197_v41, %v3908_v40  ;;  %812 = vmatpush.bf16.msrb.mxu0 %v5033_v42 }
  0x78   : > { %6745 = vst [vmem:[#allocation61_spill] sm:$0xff] %v5026_v25  ;;  %v3766_v55 = vld [vmem:[#allocation8 + $0x98] sm:$0xf0]  ;;  %v4191_v61 = vld [vmem:[#allocation8 + $0x18c] sm:$0xf]  ;;  %v5043_v12 = vor.u32 %v4161_v49, %v3764_v48  ;;  %838 = vmatpush.bf16.msrb.mxu2 %v5035_v43 }
  0x79   : > { %6746 = vst [vmem:[#allocation62_spill] sm:$0xff] %v5029_v33  ;;  %v3894_v2 = vld [vmem:[#allocation8 + $0x198] sm:$0xf0]  ;;  %v3892_v3 = vld [vmem:[#allocation8 + $0x188] sm:$0xf]  ;;  %v5047_v23 = vor.u32 %v4159_v54, %v3766_v55  ;;  %851 = vmatpush.bf16.msrb.mxu3 %v5038_v50 }
  0x7a   : > { %6747 = vst [vmem:[#allocation63_spill] sm:$0xff] %v5033_v42  ;;  %v4193_v11 = vld [vmem:[#allocation8 + $0x194] sm:$0xf0]  ;;  %v3748_v32 = vld [vmem:[#allocation8 + $0x68] sm:$0xf]  ;;  %v5054_v37 = vor.u32 %v4191_v61, %v3894_v2 }
  0x7b   : > { %6748 = vst [vmem:[#allocation64_spill] sm:$0xff] %v5035_v43  ;;  %v4157_v38 = vld [vmem:[#allocation8 + $0x74] sm:$0xf0]  ;;  %v4155_v40 = vld [vmem:[#allocation8 + $0x6c] sm:$0xf]  ;;  %825 = vmatpush.bf16.msrb.mxu1 %v5041_v1  ;;  %v5057_v48 = vor.u32 %v4193_v11, %v3892_v3  ;;  %813 = vmatpush.bf16.msrb.mxu0 %v5043_v12 }
  0x7c   : > { %6749 = vst [vmem:[#allocation65_spill] sm:$0xff] %v5038_v50  ;;  %v3750_v41 = vld [vmem:[#allocation8 + $0x78] sm:$0xf0]  ;;  %v4187_v49 = vld [vmem:[#allocation8 + $0x16c] sm:$0xf]  ;;  %839 = vmatpush.bf16.msrb.mxu2 %v5047_v23  ;;  %v5064_v61 = vor.u32 %v4157_v38, %v3748_v32 }
  0x7d   : > { %6750 = vst [vmem:[#allocation66_spill] sm:$0xff] %v5041_v1  ;;  %v3878_v54 = vld [vmem:[#allocation8 + $0x178] sm:$0xf0]  ;;  %v3876_v55 = vld [vmem:[#allocation8 + $0x168] sm:$0xf]  ;;  %v5066_v2 = vor.u32 %v4155_v40, %v3750_v41  ;;  %852 = vmatpush.bf16.msrb.mxu3 %v5054_v37 }
  0x7e   : > { %6751 = vst [vmem:[#allocation67_spill] sm:$0xff] %v5043_v12  ;;  %v432_v14 = vld.sshfl [vmem:[#allocation1] sm:$0xff pattern:$0x73625140]  ;;  %v3732_v3 = vld [vmem:[#allocation8 + $0x48] sm:$0xf]  ;;  %v5069_v11 = vor.u32 %v4187_v49, %v3878_v54 }
  0x7f   : > { %v433_v16 = vld.sshfl [vmem:[#allocation1 + $0x8] sm:$0xff pattern:$0x73625140]  ;;  %6752 = vst [vmem:[#allocation68_spill] sm:$0xff] %v5047_v23  ;;  %v5049_v27 = vpack.c.bf16 %v432_v14, %v432_v14  ;;  %v4151_v19 = vld [vmem:[#allocation8 + $0x4c] sm:$0xf]  ;;  %826 = vmatpush.bf16.msrb.mxu1 %v5057_v48  ;;  %814 = vmatpush.bf16.msrb.mxu0 %v5064_v61 }
  0x80   : > { %v5051_v31 = vpack.c.bf16 %v433_v16, %v433_v16  ;;  %6753 = vst [vmem:[#allocation69_spill] sm:$0xff] %v5054_v37  ;;  %v4189_v14 = vld [vmem:[#allocation8 + $0x174] sm:$0xf0]  ;;  %v3734_v50 = vld [vmem:[#allocation8 + $0x58] sm:$0xf0]  ;;  %840 = vmatpush.bf16.msrb.mxu2 %v5066_v2 }
  0x81   : > { %6754 = vst [vmem:[#allocation70_spill] sm:$0xff] %v5057_v48  ;;  %792 = vmatmul.bf16.vlgmr.msra.gmra.mxu2 %v5049_v27  ;;  %766 = vmatmul.bf16.vlgmr.msra.gmra.mxu0 %v5049_v27  ;;  %v4153_v16 = vld [vmem:[#allocation8 + $0x54] sm:$0xf0]  ;;  %v5073_v1 = vor.u32 %v4189_v14, %v3876_v55  ;;  %v4183_v12 = vld [vmem:[#allocation8 + $0x14c] sm:$0xf]  ;;  %v5079_v41 = vor.u32 %v4151_v19, %v3734_v50 }
  0x82   : > { %805 = vmatmul.bf16.vlgmr.msra.gmra.mxu3 %v5051_v31  ;;  %6755 = vst [vmem:[#allocation71_spill] sm:$0xff] %v5064_v61  ;;  %779 = vmatmul.bf16.vlgmr.msra.gmra.mxu1 %v5051_v31  ;;  %v3862_v23 = vld [vmem:[#allocation8 + $0x158] sm:$0xf0]  ;;  %v3860_v32 = vld [vmem:[#allocation8 + $0x148] sm:$0xf]  ;;  %v5077_v40 = vor.u32 %v4153_v16, %v3732_v3 }
  0x83   : > { %6756 = vst [vmem:[#allocation72_spill] sm:$0xff] %v5066_v2  ;;  %v4185_v38 = vld [vmem:[#allocation8 + $0x154] sm:$0xf0]  ;;  %v3716_v49 = vld [vmem:[#allocation8 + $0x28] sm:$0xf]  ;;  %853 = vmatpush.bf16.msrb.mxu3 %v5069_v11  ;;  %v5082_v54 = vor.u32 %v4183_v12, %v3862_v23  ;;  %827 = vmatpush.bf16.msrb.mxu1 %v5073_v1 }
  0x84   : > { %6757 = vst [vmem:[#allocation73_spill] sm:$0xff] %v5069_v11  ;;  %v4149_v37 = vld [vmem:[#allocation8 + $0x34] sm:$0xf0]  ;;  %v4147_v55 = vld [vmem:[#allocation8 + $0x2c] sm:$0xf]  ;;  %v5085_v48 = vor.u32 %v4185_v38, %v3860_v32  ;;  %815 = vmatpush.bf16.msrb.mxu0 %v5077_v40  ;;  %841 = vmatpush.bf16.msrb.mxu2 %v5079_v41 }
  0x85   : > { %6758 = vst [vmem:[#allocation74_spill] sm:$0xff] %v5073_v1  ;;  %v3718_v14 = vld [vmem:[#allocation8 + $0x38] sm:$0xf0]  ;;  %v4179_v43 = vld [vmem:[#allocation8 + $0x12c] sm:$0xf]  ;;  %v5089_v19 = vor.u32 %v4149_v37, %v3716_v49 }
  0x86   : > { %6759 = vst [vmem:[#allocation75_spill] sm:$0xff] %v5077_v40  ;;  %v3846_v61 = vld [vmem:[#allocation8 + $0x138] sm:$0xf0]  ;;  %v3844_v42 = vld [vmem:[#allocation8 + $0x128] sm:$0xf]  ;;  %v5091_v50 = vor.u32 %v4147_v55, %v3718_v14 }
  0x87   : > { %6760 = vst [vmem:[#allocation76_spill] sm:$0xff] %v5079_v41  ;;  %v4181_v2 = vld [vmem:[#allocation8 + $0x134] sm:$0xf0]  ;;  %v3700_v12 = vld [vmem:[#allocation8 + $0x8] sm:$0xf]  ;;  %854 = vmatpush.bf16.msrb.mxu3 %v5082_v54  ;;  %v5094_v16 = vor.u32 %v4179_v43, %v3846_v61  ;;  %828 = vmatpush.bf16.msrb.mxu1 %v5085_v48 }
  0x88   : > { %6761 = vst [vmem:[#allocation77_spill] sm:$0xff] %v5082_v54  ;;  %v4145_v23 = vld [vmem:[#allocation8 + $0x14] sm:$0xf0]  ;;  %v4143_v3 = vld [vmem:[#allocation8 + $0xc] sm:$0xf]  ;;  %v5097_v1 = vor.u32 %v4181_v2, %v3844_v42  ;;  %816 = vmatpush.bf16.msrb.mxu0 %v5089_v19  ;;  %842 = vmatpush.bf16.msrb.mxu2 %v5091_v50 }
  0x89   : > { %6762 = vst [vmem:[#allocation78_spill] sm:$0xff] %v5085_v48  ;;  %v3702_v32 = vld [vmem:[#allocation8 + $0x18] sm:$0xf0]  ;;  %v4175_v38 = vld [vmem:[#allocation8 + $0x10c] sm:$0xf]  ;;  %v5101_v54 = vor.u32 %v4145_v23, %v3700_v12 }
  0x8a   : > { %6763 = vst [vmem:[#allocation79_spill] sm:$0xff] %v5089_v19  ;;  %v3830_v11 = vld [vmem:[#allocation8 + $0x118] sm:$0xf0]  ;;  %v4008_v40 = vld [vmem:[#allocation9 + $0x70] sm:$0xf]  ;;  %v5103_v43 = vor.u32 %v4143_v3, %v3702_v32 }
  0x8b   : > { %6764 = vst [vmem:[#allocation80_spill] sm:$0xff] %v5091_v50  ;;  %v4221_v41 = vld [vmem:[#allocation9 + $0x74] sm:$0xf0]  ;;  %v4220_v37 = vld [vmem:[#allocation9 + $0x74] sm:$0xf]  ;;  %855 = vmatpush.bf16.msrb.mxu3 %v5094_v16  ;;  %v5106_v42 = vor.u32 %v4175_v38, %v3830_v11  ;;  %829 = vmatpush.bf16.msrb.mxu1 %v5097_v1 }
  0x8c   : > { %6765 = vst [vmem:[#allocation81_spill] sm:$0xff] %v5094_v16  ;;  %v4010_v49 = vld [vmem:[#allocation9 + $0x78] sm:$0xf0]  ;;  %v4236_v55 = vld [vmem:[#allocation9 + $0xf4] sm:$0xf]  ;;  %v5108_v2 = vor.u32 %v4221_v41, %v4008_v40  ;;  %817 = vmatpush.bf16.msrb.mxu0 %v5101_v54  ;;  %843 = vmatpush.bf16.msrb.mxu2 %v5103_v43 }
  0x8d   : > { %6766 = vst [vmem:[#allocation82_spill] sm:$0xff] %v5097_v1  ;;  %v4074_v14 = vld [vmem:[#allocation9 + $0xf8] sm:$0xf0]  ;;  %v3828_v61 = vld [vmem:[#allocation8 + $0x108] sm:$0xf]  ;;  %v5111_v21 = vor.u32 %v4220_v37, %v4010_v49 }
  0x8e   : > { %6767 = vst [vmem:[#allocation83_spill] sm:$0xff] %v5101_v54  ;;  %v4177_v25 = vld [vmem:[#allocation8 + $0x114] sm:$0xf0]  ;;  %v4072_v48 = vld [vmem:[#allocation9 + $0xf0] sm:$0xf]  ;;  %v5113_v19 = vor.u32 %v4236_v55, %v4074_v14 }
  0x8f   : > { %6768 = vst [vmem:[#allocation84_spill] sm:$0xff] %v5103_v43  ;;  %v4237_v33 = vld [vmem:[#allocation9 + $0xf4] sm:$0xf0]  ;;  %v4000_v12 = vld [vmem:[#allocation9 + $0x60] sm:$0xf]  ;;  %v5115_v32 = vor.u32 %v4177_v25, %v3828_v61  ;;  %856 = vmatpush.bf16.msrb.mxu3 %v5106_v42 }
  0x90   : > { %6769 = vst [vmem:[#allocation85_spill] sm:$0xff] %v5106_v42  ;;  %v4219_v23 = vld [vmem:[#allocation9 + $0x64] sm:$0xf0]  ;;  %v4218_v3 = vld [vmem:[#allocation9 + $0x64] sm:$0xf]  ;;  %v5119_v11 = vor.u32 %v4237_v33, %v4072_v48  ;;  %1131 = vmatpush.bf16.msra.mxu0 %v5108_v2  ;;  %1157 = vmatpush.bf16.msra.mxu2 %v5111_v21 }
  0x91   : > { %6770 = vst [vmem:[#allocation86_spill] sm:$0xff] %v5108_v2  ;;  %v4002_v50 = vld [vmem:[#allocation9 + $0x68] sm:$0xf0]  ;;  %v4234_v20 = vld [vmem:[#allocation9 + $0xe4] sm:$0xf]  ;;  %v5123_v40 = vor.u32 %v4219_v23, %v4000_v12  ;;  %830 = vmatpush.bf16.msrb.mxu1 %v5115_v32  ;;  %844 = vmatmul.bf16.vlgmr.msrb.gmra.mxu2 %v5049_v27 }
  0x92   : > { %6771 = vst [vmem:[#allocation87_spill] sm:$0xff] %v5111_v21  ;;  %v4066_v16 = vld [vmem:[#allocation9 + $0xe8] sm:$0xf0]  ;;  %v4064_v41 = vld [vmem:[#allocation9 + $0xe0] sm:$0xf]  ;;  %v5127_v25 = vor.u32 %v4218_v3, %v4002_v50  ;;  %857 = vmatmul.bf16.vlgmr.msrb.gmra.mxu3 %v5051_v31  ;;  %818 = vmatmul.bf16.vlgmr.msrb.gmra.mxu0 %v5049_v27 }
  0x93   : > { %6772 = vst [vmem:[#allocation88_spill] sm:$0xff] %v5113_v19  ;;  %v4235_v38 = vld [vmem:[#allocation9 + $0xe4] sm:$0xf0]  ;;  %1170 = vmatpush.bf16.msra.mxu3 %v5113_v19  ;;  %v5129_v37 = vor.u32 %v4234_v20, %v4066_v16  ;;  %v3992_v49 = vld [vmem:[#allocation9 + $0x50] sm:$0xf] }
  0x94   : > { %6773 = vst [vmem:[#allocation89_spill] sm:$0xff] %v5115_v32  ;;  %v4217_v55 = vld [vmem:[#allocation9 + $0x54] sm:$0xf0]  ;;  %v4216_v33 = vld [vmem:[#allocation9 + $0x54] sm:$0xf]  ;;  %v5135_v12 = vor.u32 %v4235_v38, %v4064_v41  ;;  %1132 = vmatpush.bf16.msra.mxu0 %v5123_v40  ;;  %1158 = vmatpush.bf16.msra.mxu2 %v5127_v25 }
  0x95   : > { %6774 = vst [vmem:[#allocation90_spill] sm:$0xff] %v5119_v11  ;;  %v3994_v48 = vld [vmem:[#allocation9 + $0x58] sm:$0xf0]  ;;  %v4232_v14 = vld [vmem:[#allocation9 + $0xd4] sm:$0xf]  ;;  %1144 = vmatpush.bf16.msra.mxu1 %v5119_v11  ;;  %v5138_v20 = vor.u32 %v4217_v55, %v3992_v49 }
  0x96   : > { %6775 = vst [vmem:[#allocation91_spill] sm:$0xff] %v5123_v40  ;;  %v4058_v61 = vld [vmem:[#allocation9 + $0xd8] sm:$0xf0]  ;;  %v4056_v50 = vld [vmem:[#allocation9 + $0xd0] sm:$0xf]  ;;  %v5142_v23 = vor.u32 %v4216_v33, %v3994_v48  ;;  %831 = vmatmul.bf16.vlgmr.msrb.gmra.mxu1 %v5051_v31 }
  0x97   : > { %6776 = vst [vmem:[#allocation92_spill] sm:$0xff] %v5127_v25  ;;  %v4233_v16 = vld [vmem:[#allocation9 + $0xd4] sm:$0xf0]  ;;  %1171 = vmatpush.bf16.msra.mxu3 %v5129_v37  ;;  %v5144_v3 = vor.u32 %v4232_v14, %v4058_v61  ;;  %v3984_v19 = vld [vmem:[#allocation9 + $0x40] sm:$0xf] }
  0x98   : > { %6777 = vst [vmem:[#allocation93_spill] sm:$0xff] %v5129_v37  ;;  %v4215_v21 = vld [vmem:[#allocation9 + $0x44] sm:$0xf0]  ;;  %v4214_v2 = vld [vmem:[#allocation9 + $0x44] sm:$0xf]  ;;  %v5149_v55 = vor.u32 %v4233_v16, %v4056_v50  ;;  %1133 = vmatpush.bf16.msra.mxu0 %v5138_v20  ;;  %1159 = vmatpush.bf16.msra.mxu2 %v5142_v23 }
  0x99   : > { %6778 = vst [vmem:[#allocation94_spill] sm:$0xff] %v5135_v12  ;;  %v3986_v41 = vld [vmem:[#allocation9 + $0x48] sm:$0xf0]  ;;  %v4230_v38 = vld [vmem:[#allocation9 + $0xc4] sm:$0xf]  ;;  %1145 = vmatpush.bf16.msra.mxu1 %v5135_v12  ;;  %v5152_v33 = vor.u32 %v4215_v21, %v3984_v19 }
  0x9a   : > { %6779 = vst [vmem:[#allocation95_spill] sm:$0xff] %v5138_v20  ;;  %v4050_v49 = vld [vmem:[#allocation9 + $0xc8] sm:$0xf0]  ;;  %v4048_v48 = vld [vmem:[#allocation9 + $0xc0] sm:$0xf]  ;;  %v5156_v61 = vor.u32 %v4214_v2, %v3986_v41 }
  0x9b   : > { %6780 = vst [vmem:[#allocation96_spill] sm:$0xff] %v5142_v23  ;;  %v4231_v14 = vld [vmem:[#allocation9 + $0xc4] sm:$0xf0]  ;;  %1172 = vmatpush.bf16.msra.mxu3 %v5144_v3  ;;  %v5158_v37 = vor.u32 %v4230_v38, %v4050_v49  ;;  %v3976_v25 = vld [vmem:[#allocation9 + $0x30] sm:$0xf] }
  0x9c   : > { %6781 = vst [vmem:[#allocation97_spill] sm:$0xff] %v5144_v3  ;;  %v4213_v40 = vld [vmem:[#allocation9 + $0x34] sm:$0xf0]  ;;  %v4212_v11 = vld [vmem:[#allocation9 + $0x34] sm:$0xf]  ;;  %v5161_v21 = vor.u32 %v4231_v14, %v4048_v48  ;;  %1134 = vmatpush.bf16.msra.mxu0 %v5152_v33  ;;  %1160 = vmatpush.bf16.msra.mxu2 %v5156_v61 }
  0x9d   : > { %6782 = vst [vmem:[#allocation98_spill] sm:$0xff] %v5149_v55  ;;  %v3978_v12 = vld [vmem:[#allocation9 + $0x38] sm:$0xf0]  ;;  %v4228_v50 = vld [vmem:[#allocation9 + $0xb4] sm:$0xf]  ;;  %1146 = vmatpush.bf16.msra.mxu1 %v5149_v55  ;;  %v5164_v19 = vor.u32 %v4213_v40, %v3976_v25 }
  0x9e   : > { %6783 = vst [vmem:[#allocation99_spill] sm:$0xff] %v5152_v33  ;;  %v4042_v16 = vld [vmem:[#allocation9 + $0xb8] sm:$0xf0]  ;;  %v4040_v23 = vld [vmem:[#allocation9 + $0xb0] sm:$0xf]  ;;  %v5168_v2 = vor.u32 %v4212_v11, %v3978_v12 }
  0x9f   : > { %6784 = vst [vmem:[#allocation100_spill] sm:$0xff] %v5156_v61  ;;  %v4229_v3 = vld [vmem:[#allocation9 + $0xb4] sm:$0xf0]  ;;  %1173 = vmatpush.bf16.msra.mxu3 %v5158_v37  ;;  %v5170_v41 = vor.u32 %v4228_v50, %v4042_v16  ;;  %v3968_v38 = vld [vmem:[#allocation9 + $0x20] sm:$0xf] }
  0xa0   : > { %6785 = vst [vmem:[#allocation101_spill] sm:$0xff] %v5158_v37  ;;  %v4211_v49 = vld [vmem:[#allocation9 + $0x24] sm:$0xf0]  ;;  %v4210_v20 = vld [vmem:[#allocation9 + $0x24] sm:$0xf]  ;;  %v5173_v40 = vor.u32 %v4229_v3, %v4040_v23  ;;  %1135 = vmatpush.bf16.msra.mxu0 %v5164_v19  ;;  %1161 = vmatpush.bf16.msra.mxu2 %v5168_v2 }
  0xa1   : > { %6786 = vst [vmem:[#allocation102_spill] sm:$0xff] %v5161_v21  ;;  %v3970_v55 = vld [vmem:[#allocation9 + $0x28] sm:$0xf0]  ;;  %v4226_v48 = vld [vmem:[#allocation9 + $0xa4] sm:$0xf]  ;;  %1147 = vmatpush.bf16.msra.mxu1 %v5161_v21  ;;  %v5176_v25 = vor.u32 %v4211_v49, %v3968_v38 }
  0xa2   : > { %6787 = vst [vmem:[#allocation103_spill] sm:$0xff] %v5164_v19  ;;  %v4034_v14 = vld [vmem:[#allocation9 + $0xa8] sm:$0xf0]  ;;  %v4032_v61 = vld [vmem:[#allocation9 + $0xa0] sm:$0xf]  ;;  %v5180_v11 = vor.u32 %v4210_v20, %v3970_v55 }
  0xa3   : > { %6788 = vst [vmem:[#allocation104_spill] sm:$0xff] %v5168_v2  ;;  %v4227_v37 = vld [vmem:[#allocation9 + $0xa4] sm:$0xf0]  ;;  %1174 = vmatpush.bf16.msra.mxu3 %v5170_v41  ;;  %v5182_v12 = vor.u32 %v4226_v48, %v4034_v14  ;;  %v3960_v50 = vld [vmem:[#allocation9 + $0x10] sm:$0xf] }
  0xa4   : > { %6789 = vst [vmem:[#allocation105_spill] sm:$0xff] %v5170_v41  ;;  %v4209_v16 = vld [vmem:[#allocation9 + $0x14] sm:$0xf0]  ;;  %v4208_v33 = vld [vmem:[#allocation9 + $0x14] sm:$0xf]  ;;  %v5185_v38 = vor.u32 %v4227_v37, %v4032_v61  ;;  %1136 = vmatpush.bf16.msra.mxu0 %v5176_v25  ;;  %1162 = vmatpush.bf16.msra.mxu2 %v5180_v11 }
  0xa5   : > { %6790 = vst [vmem:[#allocation106_spill] sm:$0xff] %v5173_v40  ;;  %v3962_v21 = vld [vmem:[#allocation9 + $0x18] sm:$0xf0]  ;;  %v4224_v23 = vld [vmem:[#allocation9 + $0x94] sm:$0xf]  ;;  %1148 = vmatpush.bf16.msra.mxu1 %v5173_v40  ;;  %v5188_v49 = vor.u32 %v4209_v16, %v3960_v50 }
  0xa6   : > { %6791 = vst [vmem:[#allocation107_spill] sm:$0xff] %v5180_v11  ;;  %v4026_v3 = vld [vmem:[#allocation9 + $0x98] sm:$0xf0]  ;;  %v4024_v2 = vld [vmem:[#allocation9 + $0x90] sm:$0xf]  ;;  %v5192_v20 = vor.u32 %v4208_v33, %v3962_v21 }
  0xa7   : > { %6792 = vst [vmem:[#allocation108_spill] sm:$0xff] %v5182_v12  ;;  %v4225_v41 = vld [vmem:[#allocation9 + $0x94] sm:$0xf0]  ;;  %1175 = vmatpush.bf16.msra.mxu3 %v5182_v12  ;;  %v5194_v55 = vor.u32 %v4224_v23, %v4026_v3  ;;  %v3952_v48 = vld [vmem:[#allocation9] sm:$0xf]  ;;  %v6802_v3 = vld [vmem:[#allocation67_spill] sm:$0xff] }
  0xa8   : > { %v4207_v14 = vld [vmem:[#allocation9 + $0x4] sm:$0xf0]  ;;  %v4206_v19 = vld [vmem:[#allocation9 + $0x4] sm:$0xf]  ;;  %v3954_v40 = vld [vmem:[#allocation9 + $0x8] sm:$0xf0]  ;;  %v5197_v50 = vor.u32 %v4225_v41, %v4024_v2  ;;  %1137 = vmatpush.bf16.msra.mxu0 %v5188_v49  ;;  %1163 = vmatpush.bf16.msra.mxu2 %v5192_v20 }
  0xa9   : > { %v4222_v37 = vld [vmem:[#allocation9 + $0x84] sm:$0xf]  ;;  %v4018_v61 = vld [vmem:[#allocation9 + $0x88] sm:$0xf0]  ;;  %1149 = vmatpush.bf16.msra.mxu1 %v5185_v38  ;;  %v5200_v16 = vor.u32 %v4207_v14, %v3952_v48  ;;  %v4016_v11 = vld [vmem:[#allocation9 + $0x80] sm:$0xf]  ;;  %v5204_v33 = vor.u32 %v4206_v19, %v3954_v40 }
  0xaa   : > { %v4223_v12 = vld [vmem:[#allocation9 + $0x84] sm:$0xf0]  ;;  %v5206_v21 = vor.u32 %v4222_v37, %v4018_v61  ;;  %v6797_v2 = vld [vmem:[#allocation61_spill] sm:$0xff]  ;;  %v6798_v41 = vld [vmem:[#allocation63_spill] sm:$0xff] }
  0xab   : > { %1176 = vmatpush.bf16.msra.mxu3 %v5194_v55  ;;  %v5209_v23 = vor.u32 %v4223_v12, %v4016_v11  ;;  %v6796_v19 = vld [vmem:[#allocation62_spill] sm:$0xff]  ;;  %v6799_v40 = vld [vmem:[#allocation64_spill] sm:$0xff]  ;;  %v6801_v12 = vld [vmem:[#allocation65_spill] sm:$0xff] }
  0xac   : > { %6793 = vst [vmem:[#allocation109_spill] sm:$0xff] %v5206_v21  ;;  %1138 = vmatpush.bf16.msra.mxu0 %v5200_v16  ;;  %1164 = vmatpush.bf16.msra.mxu2 %v5204_v33  ;;  %v6800_v11 = vld [vmem:[#allocation66_spill] sm:$0xff]  ;;  %v6803_v48 = vld [vmem:[#allocation68_spill] sm:$0xff]  ;;  %v6805_v37 = vld [vmem:[#allocation69_spill] sm:$0xff] }
  0xad   : > { %1150 = vmatpush.bf16.msra.mxu1 %v5197_v50  ;;  %v6804_v14 = vld [vmem:[#allocation70_spill] sm:$0xff]  ;;  %v6806_v61 = vld [vmem:[#allocation71_spill] sm:$0xff] }
  0xaf   : > { %1177 = vmatpush.bf16.msra.mxu3 %v5206_v21  ;;  %1139 = vmatmul.bf16.vlgmr.msra.gmra.mxu0 %v5049_v27 }
  0xb0   : > { %1268 = vmatpush.bf16.msrb.mxu0 %v4912_v4  ;;  %1294 = vmatpush.bf16.msrb.mxu2 %v4914_v8 }
  0xb1   : > { %1151 = vmatpush.bf16.msra.mxu1 %v5209_v23  ;;  %1165 = vmatmul.bf16.vlgmr.msra.gmra.mxu2 %v5049_v27  ;;  %v6794_v27 = vld [vmem:[#allocation59_spill] sm:$0xff] }
  0xb2   : > { %1178 = vmatmul.bf16.vlgmr.msra.gmra.mxu3 %v5051_v31 }
  0xb3   : > { %1307 = vmatpush.bf16.msrb.mxu3 %v4916_v9 }
  0xb4   : > { %1152 = vmatmul.bf16.vlgmr.msra.gmra.mxu1 %v5051_v31  ;;  %1269 = vmatpush.bf16.msrb.mxu0 %v4923_v17  ;;  %v6795_v31 = vld [vmem:[#allocation60_spill] sm:$0xff] }
  0xb5   : > { %1281 = vmatpush.bf16.msrb.mxu1 %v4919_v13  ;;  %1295 = vmatpush.bf16.msrb.mxu2 %v4925_v18 }
  0xb7   : > { %1308 = vmatpush.bf16.msrb.mxu3 %v4928_v22 }
  0xb8   : > { %1270 = vmatpush.bf16.msrb.mxu0 %v4933_v30 }
  0xb9   : > { %1282 = vmatpush.bf16.msrb.mxu1 %v4930_v26  ;;  %1296 = vmatpush.bf16.msrb.mxu2 %v4937_v34 }
  0xbb   : > { %1309 = vmatpush.bf16.msrb.mxu3 %v4939_v35 }
  0xbc   : > { %1271 = vmatpush.bf16.msrb.mxu0 %v4945_v45 }
  0xbd   : > { %1283 = vmatpush.bf16.msrb.mxu1 %v4942_v39  ;;  %1297 = vmatpush.bf16.msrb.mxu2 %v4949_v46 }
  0xbf   : > { %1310 = vmatpush.bf16.msrb.mxu3 %v4951_v47 }
  0xc0   : > { %1272 = vmatpush.bf16.msrb.mxu0 %v4957_v57 }
  0xc1   : > { %1284 = vmatpush.bf16.msrb.mxu1 %v4954_v51  ;;  %1298 = vmatpush.bf16.msrb.mxu2 %v4961_v58 }
  0xc3   : > { %1311 = vmatpush.bf16.msrb.mxu3 %v4963_v59 }
  0xc4   : > { %1273 = vmatpush.bf16.msrb.mxu0 %v4969_v6 }
  0xc5   : > { %1285 = vmatpush.bf16.msrb.mxu1 %v4966_v63  ;;  %1299 = vmatpush.bf16.msrb.mxu2 %v4973_v7 }
  0xc7   : > { %1312 = vmatpush.bf16.msrb.mxu3 %v4975_v10 }
  0xc8   : > { %1274 = vmatpush.bf16.msrb.mxu0 %v4981_v24 }
  0xc9   : > { %1286 = vmatpush.bf16.msrb.mxu1 %v4978_v15  ;;  %1300 = vmatpush.bf16.msrb.mxu2 %v4985_v28 }
  0xcb   : > { %1313 = vmatpush.bf16.msrb.mxu3 %v4987_v29 }
  0xcc   : > { %1275 = vmatpush.bf16.msrb.mxu0 %v4993_v44 }
  0xcd   : > { %1287 = vmatpush.bf16.msrb.mxu1 %v4990_v36  ;;  %1301 = vmatpush.bf16.msrb.mxu2 %v4997_v52 }
  0xcf   : > { %1314 = vmatpush.bf16.msrb.mxu3 %v4999_v53 }
  0xd0   : > { %1320 = vmatpush.bf16.msra.mxu0 %v5002_v56 }
  0xd1   : > { %1346 = vmatpush.bf16.msra.mxu2 %v5004_v60  ;;  %1288 = vmatpush.bf16.msrb.mxu1 %v5008_v0 }
  0xd3   : > { %1359 = vmatpush.bf16.msra.mxu3 %v5006_v62 }
  0xd4   : > { %1321 = vmatpush.bf16.msra.mxu0 %v6794_v27 }
  0xd5   : > { %1333 = vmatpush.bf16.msra.mxu1 %v5011_v5  ;;  %1347 = vmatpush.bf16.msra.mxu2 %v6795_v31  ;;  %v6807_v31 = vld [vmem:[#allocation72_spill] sm:$0xff] }
  0xd7   : > { %1360 = vmatpush.bf16.msra.mxu3 %v6797_v2  ;;  %v6808_v2 = vld [vmem:[#allocation74_spill] sm:$0xff] }
  0xd8   : > { %1322 = vmatpush.bf16.msra.mxu0 %v6798_v41  ;;  %v6809_v41 = vld [vmem:[#allocation73_spill] sm:$0xff] }
  0xd9   : > { %1334 = vmatpush.bf16.msra.mxu1 %v6796_v19  ;;  %1348 = vmatpush.bf16.msra.mxu2 %v6799_v40  ;;  %v6810_v40 = vld [vmem:[#allocation75_spill] sm:$0xff] }
  0xdb   : > { %1361 = vmatpush.bf16.msra.mxu3 %v6801_v12  ;;  %v6812_v12 = vld [vmem:[#allocation78_spill] sm:$0xff] }
  0xdc   : > { %1323 = vmatpush.bf16.msra.mxu0 %v6802_v3 }
  0xdd   : > { %1335 = vmatpush.bf16.msra.mxu1 %v6800_v11  ;;  %1349 = vmatpush.bf16.msra.mxu2 %v6803_v48  ;;  %v6811_v11 = vld [vmem:[#allocation76_spill] sm:$0xff]  ;;  %v6813_v48 = vld [vmem:[#allocation77_spill] sm:$0xff] }
  0xdf   : > { %1362 = vmatpush.bf16.msra.mxu3 %v6805_v37  ;;  %v6815_v37 = vld [vmem:[#allocation80_spill] sm:$0xff] }
  0xe0   : > { %1324 = vmatpush.bf16.msra.mxu0 %v6806_v61  ;;  %v3689_v61 = vld [vmem:[%s4893_s28 + $0x30] ss:$8 sm:$0x30] }
  0xe1   : > { %1336 = vmatpush.bf16.msra.mxu1 %v6804_v14  ;;  %1350 = vmatpush.bf16.msra.mxu2 %v6807_v31  ;;  %v6814_v14 = vld [vmem:[#allocation79_spill] sm:$0xff]  ;;  %v6816_v31 = vld [vmem:[#allocation81_spill] sm:$0xff] }
  0xe3   : > { %1363 = vmatpush.bf16.msra.mxu3 %v6809_v41  ;;  %v423_v41 = vld [vmem:[%s4893_s28] ss:$8 sm:$0xf] }
  0xe4   : > { %1325 = vmatpush.bf16.msra.mxu0 %v6810_v40 }
  0xe5   : > { %1337 = vmatpush.bf16.msra.mxu1 %v6808_v2  ;;  %1351 = vmatpush.bf16.msra.mxu2 %v6811_v11 }
  0xe7   : > { %1364 = vmatpush.bf16.msra.mxu3 %v6813_v48 }
  0xe8   : > { %1326 = vmatpush.bf16.msra.mxu0 %v6814_v14 }
  0xe9   : > { %1338 = vmatpush.bf16.msra.mxu1 %v6812_v12  ;;  %1352 = vmatpush.bf16.msra.mxu2 %v6815_v37  ;;  %v424_v37 = vld [vmem:[%s4893_s28] ss:$8 sm:$0x30] }
  0xeb   : > { %1365 = vmatpush.bf16.msra.mxu3 %v6816_v31 }
  0xec   : > { %1327 = vmatpush.bf16.msra.mxu0 %v5101_v54 }
  0xed   : > { %1339 = vmatpush.bf16.msra.mxu1 %v5097_v1  ;;  %1353 = vmatpush.bf16.msra.mxu2 %v5103_v43  ;;  %v3688_v1 = vld [vmem:[%s4893_s28 + $0x30] ss:$8 sm:$0xf]  ;;  %v5287_v43 = vor.u32 %v424_v37, %v423_v41 }
  0xee   : > { %v5291_v19 = vor.u32 %v3689_v61, %v3688_v1 }
  0xef   : > { %1366 = vmatpush.bf16.msra.mxu3 %v5106_v42 }
  0xf1   : > { %1340 = vmatpush.bf16.msra.mxu1 %v5115_v32 }
  0xfe   : > { %v767_v11 = vpop.f32.mrf.mxu0 }
  0xff   : > { %v780_v48 = vpop.f32.mrf.mxu1 }
 0x100   : > { %v781_v2 = vadd.f32 %v780_v48, %v767_v11 }
 0x104   : > { %v793_v12 = vpop.f32.mrf.mxu2 }
 0x105   : > { %v806_v14 = vpop.f32.mrf.mxu3 }
 0x106   : > { %v807_v40 = vadd.f32 %v806_v14, %v793_v12  ;;  %v769_v31 = vpop.f32.mrf.mxu0 }
 0x107   : > { %v782_v3 = vpop.f32.mrf.mxu1 }
 0x108   : > { %v864_v54 = vrot.slane %v807_v40, 7 }
 0x10a   : > { %v866_v32 = vsel %vm865_vm0, %v781_v2, %v864_v54  ;;  %v868_v42 = vsel %vm867_vm1, %v781_v2, %v864_v54 }
 0x10b   : > { %v869_v27 = vrot.slane %v868_v42, 1  ;;  %v872_v14 = vadd.f32 %v866_v32, %v5287_v43 }
 0x10c   : > { %v795_v12 = vpop.f32.mrf.mxu2 }
 0x10d   : > { %v808_v11 = vpop.f32.mrf.mxu3  ;;  %v873_v48 = vadd.f32 %v869_v27, %v5291_v19  ;;  %v3946_v62 = vmul.f32 -1.442695, %v872_v14 }
 0x10f   : > { %v3947_v31 = vmul.f32 -1.442695, %v873_v48  ;;  %4336 = vpow2.f32 %v3946_v62  ;;  %v819_v41 = vpop.f32.mrf.mxu0  ;;  %v914_v62 = vrot.slane %v5287_v43, 2  ;;  %v915_v48 = vrot.slane %v5291_v19, 2 }
 0x111   : > { %4338 = vpow2.f32 %v3947_v31 }
 0x113   : > { %v832_v40 = vpop.f32.mrf.mxu1 }
 0x114   : > { %v845_v3 = vpop.f32.mrf.mxu2  ;;  %v833_v42 = vadd.f32 %v832_v40, %v819_v41 }
 0x115   : > { %v858_v37 = vpop.f32.mrf.mxu3  ;;  %v4337_v60 = vpop.eup %4336 }
 0x116   : > { %v859_v53 = vadd.f32 %v858_v37, %v845_v3  ;;  %v880_v1 = vadd.f32 1.0, %v4337_v60 }
 0x117   : > { %v4339_v54 = vpop.eup %4338  ;;  %v821_v61 = vpop.f32.mrf.mxu0 }
 0x118   : > { %v920_v2 = vrot.slane %v859_v53, 7  ;;  %v881_v32 = vadd.f32 1.0, %v4339_v54  ;;  %4340 = vrcp.f32 %v880_v1  ;;  %vm887_vm2 = vweird.f32 %v880_v1 }
 0x11a   : > { %v922_v27 = vsel %vm867_vm1, %v833_v42, %v920_v2  ;;  %4342 = vrcp.f32 %v881_v32  ;;  %v921_v31 = vsel %vm865_vm0, %v833_v42, %v920_v2  ;;  %vm902_vm4 = vweird.f32 %v881_v32 }
 0x11b   : > { %v834_v12 = vpop.f32.mrf.mxu1  ;;  %v923_v3 = vrot.slane %v922_v27, 1  ;;  %v926_v60 = vadd.f32 %v921_v31, %v914_v62  ;;  %v906_v29 = vand.u32 2147483647, %v881_v32 }
 0x11c   : > { %v847_v11 = vpop.f32.mrf.mxu2 }
 0x11d   : > { %v860_v14 = vpop.f32.mrf.mxu3  ;;  %v927_v53 = vadd.f32 %v923_v3, %v915_v48  ;;  %v3948_v61 = vmul.f32 -1.442695, %v926_v60  ;;  %v893_v3 = vand.u32 2147483648, %v880_v1  ;;  %vm907_vm9 = vcmp.eq.f32.partialorder %v906_v29, 8.507059e+37 }
 0x11e   : > { %v4341_v37 = vpop.eup %4340  ;;  %v421_v14 = vld [vmem:[%s6499_s4] sm:$0x3] }
 0x11f   : > { %v883_v40 = vmul.f32 %v4341_v37, %v880_v1  ;;  %v3949_v54 = vmul.f32 -1.442695, %v927_v53  ;;  %4344 = vpow2.f32 %v3948_v61  ;;  %v5302_v56 = vperm.slane %v421_v14, 0 }
 0x120   : > { %v4343_v41 = vpop.eup %4342  ;;  %v5304_v27 = vperm.slane %v421_v14, 1  ;;  %vm888_vm3 = vweird.f32 %v4341_v37  ;;  %v891_v61 = vand.u32 2147483647, %v880_v1  ;;  %v908_v14 = vand.u32 2147483648, %v881_v32 }
 0x121   : > { %v898_v12 = vmul.f32 %v4343_v41, %v881_v32  ;;  %v884_v11 = vsub.f32 1.0, %v883_v40  ;;  %4346 = vpow2.f32 %v3949_v54  ;;  %6817 = vst [vmem:[#allocation110_spill] sm:$0xff] %v5302_v56  ;;  %vm903_vm5 = vweird.f32 %v4343_v41  ;;  %vm5308_vm6 = vmor %vm887_vm2, %vm888_vm3 }
 0x122   : > { %6818 = vst [vmem:[#allocation111_spill] sm:$0xff] %v5304_v27  ;;  %v894_v28 = vor.u32 1.1754944e-38, %v893_v3  ;;  %vm5314_vm7 = vmor %vm902_vm4, %vm903_vm5  ;;  %vm892_vm8 = vcmp.eq.f32.partialorder %v891_v61, 8.507059e+37  ;;  %v909_v36 = vor.u32 1.1754944e-38, %v908_v14  ;;  %v1193_v32 = vrot.slane %v5287_v43, 4 }
 0x123   : > { %v899_v5 = vsub.f32 1.0, %v898_v12  ;;  %v885_v42 = vmul.f32 %v4341_v37, %v884_v11  ;;  %vm1214_vm3 = vcmask 1042434   ;;  %vm1216_vm4 = vcmask 1041408  }
 0x124   : > { %vm1219_vm5 = vcmask 1043459  }
 0x125   : > { %v900_v62 = vmul.f32 %v4343_v41, %v899_v5  ;;  %v4345_v48 = vpop.eup %4344  ;;  %v886_v40 = vadd.f32 %v4341_v37, %v885_v42 }
 0x126   : > { %v934_v5 = vadd.f32 1.0, %v4345_v48 }
 0x127   : > { %v4347_v60 = vpop.eup %4346  ;;  %v901_v44 = vadd.f32 %v4343_v41, %v900_v62 }
 0x128   : > { %4348 = vrcp.f32 %v934_v5  ;;  %vm941_vm10 = vweird.f32 %v934_v5  ;;  %v947_v1 = vand.u32 2147483648, %v934_v5 }
 0x12c   : > { %v1140_v52 = vpop.f32.mrf.mxu0 }
 0x12d   : > { %v1141_v31 = vadd.f32 %v1140_v52, %v5302_v56  ;;  %v5312_v52 = vadd.f32 1.0, %v4347_v60 }
 0x12f   : > { %4350 = vrcp.f32 %v5312_v52  ;;  %vm956_vm12 = vweird.f32 %v5312_v52 }
 0x131   : > { %v1153_v2 = vpop.f32.mrf.mxu1 }
 0x132   : > { %v1154_v56 = vadd.f32 %v1153_v2, %v1141_v31 }
 0x134   : > { %v1166_v53 = vpop.f32.mrf.mxu2  ;;  %v1142_v0 = vpop.f32.mrf.mxu0 }
 0x135   : > { %v1179_v54 = vpop.f32.mrf.mxu3  ;;  %v1167_v12 = vadd.f32 %v1166_v53, %v5304_v27  ;;  %v890_v53 = vsel %vm5308_vm6, %v4341_v37, %v886_v40  ;;  %v905_v0 = vsel %vm5314_vm7, %v4343_v41, %v901_v44  ;;  %v4349_v44 = vpop.eup %4348  ;;  %vm1221_vm6 = vcmask 1042433  }
 0x136   : > { %v895_v2 = vsel %vm892_vm8, %v894_v28, %v890_v53  ;;  %v910_v40 = vsel %vm907_vm9, %v909_v36, %v905_v0  ;;  %v4351_v43 = vpop.eup %4350  ;;  %v937_v41 = vmul.f32 %v4349_v44, %v934_v5  ;;  %vm942_vm11 = vweird.f32 %v4349_v44 }
 0x137   : > { %v1180_v42 = vadd.f32 %v1179_v54, %v1167_v12  ;;  %v952_v28 = vmul.f32 %v4351_v43, %v5312_v52  ;;  %v945_v36 = vand.u32 2147483647, %v934_v5  ;;  %vm957_vm13 = vweird.f32 %v4351_v43  ;;  %vm5329_vm14 = vmor %vm941_vm10, %vm942_vm11 }
 0x138   : > { %v938_v11 = vsub.f32 1.0, %v937_v41  ;;  %v960_v0 = vand.u32 2147483647, %v5312_v52  ;;  %vm5335_vm15 = vmor %vm956_vm12, %vm957_vm13 }
 0x139   : > { %v1155_v27 = vpop.f32.mrf.mxu1  ;;  %v1185_v24 = vrot.slane %v1180_v42, 7  ;;  %vm5339_vm2 = vcmp.eq.f32.partialorder %v945_v36, 8.507059e+37 }
 0x13a   : > { %v1194_v27 = vrot.slane %v5291_v19, 4  ;;  %v939_v19 = vmul.f32 %v4349_v44, %v938_v11  ;;  %vm961_vm7 = vcmp.eq.f32.partialorder %v960_v0, 8.507059e+37 }
 0x13b   : > { %v1186_v62 = vsel %vm865_vm0, %v1154_v56, %v1185_v24  ;;  %v1187_v48 = vsel %vm867_vm1, %v1154_v56, %v1185_v24  ;;  %v953_v56 = vsub.f32 1.0, %v952_v28 }
 0x13c   : > { %v1188_v31 = vrot.slane %v1187_v48, 1  ;;  %v1191_v37 = vmul.f32 %v1186_v62, %v895_v2  ;;  %v1168_v3 = vpop.f32.mrf.mxu2  ;;  %v940_v42 = vadd.f32 %v4349_v44, %v939_v19  ;;  %v948_v48 = vor.u32 1.1754944e-38, %v947_v1 }
 0x13d   : > { %v1181_v60 = vpop.f32.mrf.mxu3  ;;  %v954_v14 = vmul.f32 %v4351_v43, %v953_v56 }
 0x13e   : > { %v1192_v61 = vmul.f32 %v1188_v31, %v910_v40  ;;  %v1197_v54 = vadd.f32 %v1193_v32, %v1191_v37  ;;  %v962_v32 = vand.u32 2147483648, %v5312_v52  ;;  %v6829_v37 = vld [vmem:[#allocation58_spill] sm:$0xff]  ;;  %v944_v52 = vsel %vm5329_vm14, %v4349_v44, %v940_v42 }
 0x13f   : > { %v955_v2 = vadd.f32 %v4351_v43, %v954_v14  ;;  %v949_v56 = vsel %vm5339_vm2, %v948_v48, %v944_v52 }
 0x140   : > { %v1198_v29 = vadd.f32 %v1194_v27, %v1192_v61  ;;  %4352 = vtanh.f32 %v1197_v54  ;;  %v963_v61 = vor.u32 1.1754944e-38, %v962_v32 }
 0x141   : > { %v959_v54 = vsel %vm5335_vm15, %v4351_v43, %v955_v2 }
 0x142   : > { %4354 = vtanh.f32 %v1198_v29  ;;  %v964_v1 = vsel %vm961_vm7, %v963_v61, %v959_v54 }
 0x146   : > { %v4353_v12 = vpop.eup %4352 }
 0x147   : > { %1203 = vst [vmem:[#allocation1] ss:$2 sm:$0xff] %v4353_v12 }
 0x148   : > { %v4355_v24 = vpop.eup %4354 }
 0x149   : > { %1205 = vst [vmem:[#allocation1 + $0x1] ss:$2 sm:$0xff] %v4355_v24 }
 0x150   : > { %v1206_v62 = vld [vmem:[#allocation1] sm:$0xff] }
 0x151   : > { %v1208_v27 = vsub.f32 %v6829_v37, %v1206_v62 }
 0x153   : > { %v1210_v3 = vrot.slane %v1208_v27, 1  ;;  %v1211_v60 = vrot.slane %v1208_v27, 2  ;;  %v1212_v40 = vrot.slane %v1208_v27, 3 }
 0x155   : > { %v1213_v29 = vsel %vm865_vm0, %v1208_v27, %v1210_v3  ;;  %v1215_v41 = vsel %vm1214_vm3, %v1211_v60, %v1212_v40  ;;  %v1218_v28 = vsel %vm867_vm1, %v1208_v27, %v1210_v3  ;;  %v1220_v11 = vsel %vm1219_vm5, %v1211_v60, %v1212_v40 }
 0x156   : > { %v1217_v19 = vsel %vm1216_vm4, %v1213_v29, %v1215_v41  ;;  %v1222_v44 = vsel %vm1221_vm6, %v1218_v28, %v1220_v11  ;;  %v6834_v41 = vld [vmem:[#allocation86_spill] sm:$0xff]  ;;  %v6836_v11 = vld [vmem:[#allocation87_spill] sm:$0xff] }
 0x157   : > { %v1223_v14 = vrot.slane %v1222_v44, 1  ;;  %v1226_v36 = vmul.f32 %v1217_v19, %v949_v56  ;;  %v6835_v28 = vld [vmem:[#allocation90_spill] sm:$0xff]  ;;  %v6837_v56 = vld [vmem:[#allocation88_spill] sm:$0xff]  ;;  %v6838_v19 = vld [vmem:[#allocation91_spill] sm:$0xff] }
 0x158   : > { %v6839_v44 = vld [vmem:[#allocation94_spill] sm:$0xff] }
 0x159   : > { %v1227_v42 = vmul.f32 %v1223_v14, %v964_v1  ;;  %v5353_v53 = vadd.f32 %v4353_v12, %v1226_v36  ;;  %v6840_v14 = vld [vmem:[#allocation92_spill] sm:$0xff]  ;;  %v6841_v36 = vld [vmem:[#allocation93_spill] sm:$0xff]  ;;  %v6842_v1 = vld [vmem:[#allocation95_spill] sm:$0xff] }
 0x15b   : > { %v5355_v43 = vadd.f32 %v4355_v24, %v1227_v42  ;;  %v5358_v0 = vperm.slane %v5353_v53, 0  ;;  %v5361_v32 = vperm.slane %v5353_v53, 1  ;;  %v6843_v42 = vld [vmem:[#allocation98_spill] sm:$0xff] }
 0x15d   : > { %6830 = vst [vmem:[#allocation58_spill] sm:$0xff] %v5358_v0  ;;  %v5364_v2 = vperm.slane %v5355_v43, 0  ;;  %v5367_v62 = vperm.slane %v5355_v43, 1  ;;  %v1248_v48 = vpack.c.bf16 %v5358_v0, %v5358_v0  ;;  %v1249_v12 = vpack.c.bf16 %v5361_v32, %v5361_v32  ;;  %v6861_v0 = vld [vmem:[#allocation56_spill] sm:$0xff] }
 0x15e   : > { %6831 = vst [vmem:[#allocation112_spill] sm:$0xff] %v5361_v32  ;;  %v6860_v32 = vld [vmem:[#allocation50_spill] sm:$0xff] }
 0x15f   : > { %6832 = vst [vmem:[#allocation113_spill] sm:$0xff] %v5364_v2  ;;  %v1250_v24 = vpack.c.bf16 %v5364_v2, %v5364_v2  ;;  %v1251_v31 = vpack.c.bf16 %v5367_v62, %v5367_v62  ;;  %v1256_v27 = vunpack.c.l.b16 %v1248_v48  ;;  %v1257_v3 = vunpack.c.l.b16 %v1249_v12  ;;  %v6844_v48 = vld [vmem:[#allocation96_spill] sm:$0xff]  ;;  %v6845_v12 = vld [vmem:[#allocation97_spill] sm:$0xff] }
 0x160   : > { %6833 = vst [vmem:[#allocation114_spill] sm:$0xff] %v5367_v62  ;;  %v6858_v62 = vld [vmem:[#allocation47_spill] sm:$0xff]  ;;  %v6859_v2 = vld [vmem:[#allocation48_spill] sm:$0xff] }
 0x161   : > { %v1258_v5 = vunpack.c.l.b16 %v1250_v24  ;;  %v1259_v37 = vunpack.c.l.b16 %v1251_v31  ;;  %v6846_v24 = vld [vmem:[#allocation99_spill] sm:$0xff]  ;;  %v6847_v31 = vld [vmem:[#allocation102_spill] sm:$0xff] }
 0x163   : > { %v1260_v52 = vrot.slane %v1258_v5, 7  ;;  %v1262_v60 = vrot.slane %v1259_v37, 7  ;;  %v6848_v5 = vld [vmem:[#allocation100_spill] sm:$0xff]  ;;  %v6849_v37 = vld [vmem:[#allocation101_spill] sm:$0xff] }
 0x165   : > { %v1261_v40 = vsel %vm867_vm1, %v1260_v52, %v1256_v27  ;;  %v1263_v61 = vsel %vm867_vm1, %v1262_v60, %v1257_v3  ;;  %v6850_v27 = vld [vmem:[#allocation103_spill] sm:$0xff]  ;;  %v6851_v52 = vld [vmem:[#allocation106_spill] sm:$0xff]  ;;  %v6852_v3 = vld [vmem:[#allocation104_spill] sm:$0xff] }
 0x166   : > { %v1264_v54 = vpack.c.b16 %v1261_v40, %v1261_v40  ;;  %v1265_v29 = vpack.c.b16 %v1263_v61, %v1263_v61  ;;  %v6853_v60 = vld [vmem:[#allocation105_spill] sm:$0xff]  ;;  %v6854_v40 = vld [vmem:[#allocation107_spill] sm:$0xff]  ;;  %v6855_v61 = vld [vmem:[#allocation108_spill] sm:$0xff] }
 0x168   : > { %1276 = vmatmul.bf16.vlgmr.msrb.gmra.mxu0 %v1264_v54  ;;  %1289 = vmatmul.bf16.vlgmr.msrb.gmra.mxu1 %v1265_v29 }
 0x169   : > { %1302 = vmatmul.bf16.vlgmr.msrb.gmra.mxu2 %v1264_v54  ;;  %1315 = vmatmul.bf16.vlgmr.msrb.gmra.mxu3 %v1265_v29 }
 0x16a   : > { %1474 = vmatpush.bf16.msrb.mxu0 %v6834_v41  ;;  %1487 = vmatpush.bf16.msrb.mxu1 %v6835_v28 }
 0x16b   : > { %1500 = vmatpush.bf16.msrb.mxu2 %v6836_v11  ;;  %1513 = vmatpush.bf16.msrb.mxu3 %v6837_v56 }
 0x16e   : > { %1475 = vmatpush.bf16.msrb.mxu0 %v6838_v19  ;;  %1488 = vmatpush.bf16.msrb.mxu1 %v6839_v44 }
 0x16f   : > { %1501 = vmatpush.bf16.msrb.mxu2 %v6840_v14  ;;  %1514 = vmatpush.bf16.msrb.mxu3 %v6841_v36 }
 0x172   : > { %1476 = vmatpush.bf16.msrb.mxu0 %v6842_v1  ;;  %1489 = vmatpush.bf16.msrb.mxu1 %v6843_v42 }
 0x173   : > { %1502 = vmatpush.bf16.msrb.mxu2 %v6844_v48  ;;  %1515 = vmatpush.bf16.msrb.mxu3 %v6845_v12 }
 0x176   : > { %1477 = vmatpush.bf16.msrb.mxu0 %v6846_v24  ;;  %1490 = vmatpush.bf16.msrb.mxu1 %v6847_v31 }
 0x177   : > { %1503 = vmatpush.bf16.msrb.mxu2 %v6848_v5  ;;  %1516 = vmatpush.bf16.msrb.mxu3 %v6849_v37 }
 0x178   : > { %1328 = vmatmul.bf16.vlgmr.msra.gmra.mxu0 %v1264_v54  ;;  %1341 = vmatmul.bf16.vlgmr.msra.gmra.mxu1 %v1265_v29 }
 0x179   : > { %1354 = vmatmul.bf16.vlgmr.msra.gmra.mxu2 %v1264_v54  ;;  %1367 = vmatmul.bf16.vlgmr.msra.gmra.mxu3 %v1265_v29 }
 0x17a   : > { %1478 = vmatpush.bf16.msrb.mxu0 %v6850_v27  ;;  %1491 = vmatpush.bf16.msrb.mxu1 %v6851_v52 }
 0x17b   : > { %1504 = vmatpush.bf16.msrb.mxu2 %v6852_v3  ;;  %1517 = vmatpush.bf16.msrb.mxu3 %v6853_v60 }
 0x17e   : > { %1479 = vmatpush.bf16.msrb.mxu0 %v5176_v25  ;;  %1492 = vmatpush.bf16.msrb.mxu1 %v5185_v38 }
 0x17f   : > { %1505 = vmatpush.bf16.msrb.mxu2 %v6854_v40  ;;  %1518 = vmatpush.bf16.msrb.mxu3 %v6855_v61 }
 0x182   : > { %1480 = vmatpush.bf16.msrb.mxu0 %v5188_v49  ;;  %1493 = vmatpush.bf16.msrb.mxu1 %v5197_v50 }
 0x183   : > { %1506 = vmatpush.bf16.msrb.mxu2 %v5192_v20  ;;  %1519 = vmatpush.bf16.msrb.mxu3 %v5194_v55 }
 0x186   : > { %1481 = vmatpush.bf16.msrb.mxu0 %v5200_v16  ;;  %1494 = vmatpush.bf16.msrb.mxu1 %v5209_v23 }
 0x187   : > { %1507 = vmatpush.bf16.msrb.mxu2 %v5204_v33  ;;  %1520 = vmatpush.bf16.msrb.mxu3 %v5206_v21 }
 0x189   : > { %1482 = vmatmul.bf16.vlgmr.msrb.gmra.mxu0 %v1264_v54  ;;  %1495 = vmatmul.bf16.vlgmr.msrb.gmra.mxu1 %v1265_v29 }
 0x18a   : > { %1588 = vmatpush.bf16.msra.mxu0 %v4912_v4  ;;  %1601 = vmatpush.bf16.msra.mxu1 %v4919_v13 }
 0x18b   : > { %1508 = vmatmul.bf16.vlgmr.msrb.gmra.mxu2 %v1264_v54  ;;  %1521 = vmatmul.bf16.vlgmr.msrb.gmra.mxu3 %v1265_v29  ;;  %v6856_v54 = vld [vmem:[#allocation46_spill] sm:$0xff]  ;;  %v6857_v29 = vld [vmem:[#allocation49_spill] sm:$0xff] }
 0x18c   : > { %1614 = vmatpush.bf16.msra.mxu2 %v4914_v8  ;;  %1627 = vmatpush.bf16.msra.mxu3 %v4916_v9 }
 0x18e   : > { %1589 = vmatpush.bf16.msra.mxu0 %v4923_v17  ;;  %1602 = vmatpush.bf16.msra.mxu1 %v4930_v26 }
 0x190   : > { %1615 = vmatpush.bf16.msra.mxu2 %v4925_v18  ;;  %1628 = vmatpush.bf16.msra.mxu3 %v4928_v22 }
 0x192   : > { %1590 = vmatpush.bf16.msra.mxu0 %v4933_v30  ;;  %1603 = vmatpush.bf16.msra.mxu1 %v4942_v39 }
 0x194   : > { %1616 = vmatpush.bf16.msra.mxu2 %v4937_v34  ;;  %1629 = vmatpush.bf16.msra.mxu3 %v4939_v35 }
 0x196   : > { %1591 = vmatpush.bf16.msra.mxu0 %v4945_v45  ;;  %1604 = vmatpush.bf16.msra.mxu1 %v4954_v51 }
 0x198   : > { %1617 = vmatpush.bf16.msra.mxu2 %v4949_v46  ;;  %1630 = vmatpush.bf16.msra.mxu3 %v4951_v47 }
 0x19a   : > { %1592 = vmatpush.bf16.msra.mxu0 %v4957_v57  ;;  %1605 = vmatpush.bf16.msra.mxu1 %v4966_v63  ;;  %v4080_v57 = vld [vmem:[%s4893_s28 + $0x31] ss:$8 sm:$0xf] }
 0x19c   : > { %1618 = vmatpush.bf16.msra.mxu2 %v4961_v58  ;;  %1631 = vmatpush.bf16.msra.mxu3 %v4963_v59  ;;  %v6862_v59 = vld [vmem:[#allocation53_spill] sm:$0xff] }
 0x19d   : > { %v4079_v58 = vld [vmem:[%s4893_s28 + $0x1] ss:$8 sm:$0x30] }
 0x19e   : > { %1593 = vmatpush.bf16.msra.mxu0 %v4969_v6  ;;  %1606 = vmatpush.bf16.msra.mxu1 %v4978_v15  ;;  %v6863_v6 = vld [vmem:[#allocation57_spill] sm:$0xff]  ;;  %v6864_v15 = vld [vmem:[#allocation51_spill] sm:$0xff] }
 0x1a0   : > { %1619 = vmatpush.bf16.msra.mxu2 %v4973_v7  ;;  %1632 = vmatpush.bf16.msra.mxu3 %v4975_v10  ;;  %v6865_v7 = vld [vmem:[#allocation52_spill] sm:$0xff]  ;;  %v6866_v10 = vld [vmem:[#allocation54_spill] sm:$0xff] }
 0x1a2   : > { %1594 = vmatpush.bf16.msra.mxu0 %v6856_v54  ;;  %1607 = vmatpush.bf16.msra.mxu1 %v6857_v29  ;;  %v6867_v54 = vld [vmem:[#allocation55_spill] sm:$0xff] }
 0x1a3   : > { %v6868_v29 = vld [vmem:[#allocation59_spill] sm:$0xff] }
 0x1a4   : > { %1620 = vmatpush.bf16.msra.mxu2 %v6858_v62  ;;  %1633 = vmatpush.bf16.msra.mxu3 %v6859_v2  ;;  %v6869_v62 = vld [vmem:[#allocation62_spill] sm:$0xff]  ;;  %v6870_v2 = vld [vmem:[#allocation60_spill] sm:$0xff] }
 0x1a6   : > { %1595 = vmatpush.bf16.msra.mxu0 %v6860_v32  ;;  %1608 = vmatpush.bf16.msra.mxu1 %v6861_v0  ;;  %v6871_v32 = vld [vmem:[#allocation61_spill] sm:$0xff]  ;;  %v6872_v0 = vld [vmem:[#allocation63_spill] sm:$0xff] }
 0x1a8   : > { %1621 = vmatpush.bf16.msra.mxu2 %v6864_v15  ;;  %1634 = vmatpush.bf16.msra.mxu3 %v6865_v7  ;;  %v6875_v15 = vld [vmem:[#allocation65_spill] sm:$0xff]  ;;  %v6876_v7 = vld [vmem:[#allocation67_spill] sm:$0xff] }
 0x1aa   : > { %1640 = vmatpush.bf16.msrb.mxu0 %v6862_v59  ;;  %1653 = vmatpush.bf16.msrb.mxu1 %v6863_v6  ;;  %v6873_v59 = vld [vmem:[#allocation66_spill] sm:$0xff]  ;;  %v6874_v6 = vld [vmem:[#allocation64_spill] sm:$0xff] }
 0x1ac   : > { %1666 = vmatpush.bf16.msrb.mxu2 %v6866_v10  ;;  %1679 = vmatpush.bf16.msrb.mxu3 %v6867_v54  ;;  %v6877_v10 = vld [vmem:[#allocation70_spill] sm:$0xff]  ;;  %v6878_v54 = vld [vmem:[#allocation68_spill] sm:$0xff] }
 0x1ae   : > { %1641 = vmatpush.bf16.msrb.mxu0 %v6868_v29  ;;  %1654 = vmatpush.bf16.msrb.mxu1 %v6869_v62  ;;  %v6879_v29 = vld [vmem:[#allocation69_spill] sm:$0xff]  ;;  %v6880_v62 = vld [vmem:[#allocation71_spill] sm:$0xff] }
 0x1b0   : > { %1667 = vmatpush.bf16.msrb.mxu2 %v6870_v2  ;;  %1680 = vmatpush.bf16.msrb.mxu3 %v6871_v32  ;;  %v6881_v2 = vld [vmem:[#allocation74_spill] sm:$0xff]  ;;  %v6882_v32 = vld [vmem:[#allocation72_spill] sm:$0xff] }
 0x1b2   : > { %1642 = vmatpush.bf16.msrb.mxu0 %v6872_v0  ;;  %1655 = vmatpush.bf16.msrb.mxu1 %v6873_v59  ;;  %v6883_v0 = vld [vmem:[#allocation73_spill] sm:$0xff] }
 0x1b4   : > { %1668 = vmatpush.bf16.msrb.mxu2 %v6874_v6  ;;  %1681 = vmatpush.bf16.msrb.mxu3 %v6875_v15  ;;  %v6884_v6 = vld [vmem:[#allocation75_spill] sm:$0xff]  ;;  %v6885_v15 = vld [vmem:[#allocation78_spill] sm:$0xff] }
 0x1b6   : > { %1643 = vmatpush.bf16.msrb.mxu0 %v6876_v7  ;;  %1656 = vmatpush.bf16.msrb.mxu1 %v6877_v10  ;;  %v6886_v7 = vld [vmem:[#allocation76_spill] sm:$0xff]  ;;  %v6887_v10 = vld [vmem:[#allocation77_spill] sm:$0xff] }
 0x1b8   : > { %1669 = vmatpush.bf16.msrb.mxu2 %v6878_v54  ;;  %1682 = vmatpush.bf16.msrb.mxu3 %v6879_v29  ;;  %v6888_v29 = vld [vmem:[#allocation79_spill] sm:$0xff]  ;;  %v6893_v54 = vld [vmem:[#allocation89_spill] sm:$0xff] }
 0x1ba   : > { %1644 = vmatpush.bf16.msrb.mxu0 %v6880_v62  ;;  %1657 = vmatpush.bf16.msrb.mxu1 %v6881_v2  ;;  %v6889_v62 = vld [vmem:[#allocation82_spill] sm:$0xff]  ;;  %v6890_v2 = vld [vmem:[#allocation80_spill] sm:$0xff] }
 0x1bc   : > { %1670 = vmatpush.bf16.msrb.mxu2 %v6882_v32  ;;  %1683 = vmatpush.bf16.msrb.mxu3 %v6883_v0  ;;  %v6891_v32 = vld [vmem:[#allocation81_spill] sm:$0xff]  ;;  %v6892_v0 = vld [vmem:[#allocation83_spill] sm:$0xff] }
 0x1be   : > { %1645 = vmatpush.bf16.msrb.mxu0 %v6884_v6  ;;  %1658 = vmatpush.bf16.msrb.mxu1 %v6885_v15  ;;  %v6894_v6 = vld [vmem:[#allocation84_spill] sm:$0xff]  ;;  %v6895_v15 = vld [vmem:[#allocation85_spill] sm:$0xff] }
 0x1c0   : > { %1671 = vmatpush.bf16.msrb.mxu2 %v6886_v7  ;;  %1684 = vmatpush.bf16.msrb.mxu3 %v6887_v10  ;;  %v4078_v10 = vld [vmem:[%s4893_s28 + $0x1] ss:$8 sm:$0xf] }
 0x1c2   : > { %1646 = vmatpush.bf16.msrb.mxu0 %v6888_v29  ;;  %1659 = vmatpush.bf16.msrb.mxu1 %v6889_v62  ;;  %v4081_v62 = vld [vmem:[%s4893_s28 + $0x31] ss:$8 sm:$0x30] }
 0x1c4   : > { %1672 = vmatpush.bf16.msrb.mxu2 %v6890_v2  ;;  %1685 = vmatpush.bf16.msrb.mxu3 %v6891_v32  ;;  %v5479_v32 = vor.u32 %v4079_v58, %v4078_v10 }
 0x1c6   : > { %1647 = vmatpush.bf16.msrb.mxu0 %v6892_v0  ;;  %1660 = vmatpush.bf16.msrb.mxu1 %v6893_v54  ;;  %v5481_v54 = vor.u32 %v4081_v62, %v4080_v57 }
 0x1c8   : > { %1673 = vmatpush.bf16.msrb.mxu2 %v6894_v6  ;;  %1686 = vmatpush.bf16.msrb.mxu3 %v6895_v15 }
 0x1e5   : > { %v1277_v7 = vpop.f32.mrf.mxu0  ;;  %v1290_v59 = vpop.f32.mrf.mxu1 }
 0x1e6   : > { %v1291_v0 = vadd.f32 %v1290_v59, %v1277_v7 }
 0x1ec   : > { %v1303_v63 = vpop.f32.mrf.mxu2  ;;  %v1316_v29 = vpop.f32.mrf.mxu3 }
 0x1ed   : > { %v1317_v47 = vadd.f32 %v1316_v29, %v1303_v63  ;;  %v1279_v2 = vpop.f32.mrf.mxu0  ;;  %v1292_v46 = vpop.f32.mrf.mxu1 }
 0x1ef   : > { %v1374_v51 = vrot.slane %v1317_v47, 7 }
 0x1f1   : > { %v1375_v6 = vsel %vm865_vm0, %v1291_v0, %v1374_v51  ;;  %v1376_v15 = vsel %vm867_vm1, %v1291_v0, %v1374_v51 }
 0x1f2   : > { %v1377_v45 = vrot.slane %v1376_v15, 1  ;;  %v1380_v35 = vadd.f32 %v1375_v6, %v5479_v32  ;;  %v1422_v6 = vrot.slane %v5479_v32, 2 }
 0x1f4   : > { %v1381_v34 = vadd.f32 %v1377_v45, %v5481_v54  ;;  %v4082_v39 = vmul.f32 -1.442695, %v1380_v35  ;;  %v1305_v30 = vpop.f32.mrf.mxu2  ;;  %v1318_v63 = vpop.f32.mrf.mxu3  ;;  %v1423_v45 = vrot.slane %v5481_v54, 2 }
 0x1f5   : > { %v1329_v2 = vpop.f32.mrf.mxu0  ;;  %v1342_v46 = vpop.f32.mrf.mxu1 }
 0x1f6   : > { %4356 = vpow2.f32 %v4082_v39  ;;  %v4083_v58 = vmul.f32 -1.442695, %v1381_v34  ;;  %v1343_v30 = vadd.f32 %v1342_v46, %v1329_v2 }
 0x1f8   : > { %4358 = vpow2.f32 %v4083_v58 }
 0x1fc   : > { %v4357_v47 = vpop.eup %4356  ;;  %v1355_v57 = vpop.f32.mrf.mxu2 }
 0x1fd   : > { %v1368_v59 = vpop.f32.mrf.mxu3  ;;  %v1388_v7 = vadd.f32 1.0, %v4357_v47  ;;  %v1331_v62 = vpop.f32.mrf.mxu0 }
 0x1fe   : > { %v1369_v10 = vadd.f32 %v1368_v59, %v1355_v57  ;;  %v1344_v51 = vpop.f32.mrf.mxu1  ;;  %v4359_v15 = vpop.eup %4358 }
 0x1ff   : > { %v5488_v0 = vadd.f32 1.0, %v4359_v15  ;;  %4360 = vrcp.f32 %v1388_v7  ;;  %vm1395_vm8 = vweird.f32 %v1388_v7 }
 0x200   : > { %v1428_v35 = vrot.slane %v1369_v10, 7 }
 0x201   : > { %4362 = vrcp.f32 %v5488_v0  ;;  %vm1410_vm12 = vweird.f32 %v5488_v0 }
 0x202   : > { %v1429_v34 = vsel %vm865_vm0, %v1343_v30, %v1428_v35  ;;  %v1430_v39 = vsel %vm867_vm1, %v1343_v30, %v1428_v35 }
 0x203   : > { %v1431_v29 = vrot.slane %v1430_v39, 1  ;;  %v1434_v63 = vadd.f32 %v1429_v34, %v1422_v6 }
 0x204   : > { %v1357_v57 = vpop.f32.mrf.mxu2 }
 0x205   : > { %v1435_v58 = vadd.f32 %v1431_v29, %v1423_v45  ;;  %v4084_v47 = vmul.f32 -1.442695, %v1434_v63  ;;  %v1370_v59 = vpop.f32.mrf.mxu3  ;;  %v4361_v62 = vpop.eup %4360  ;;  %v6896_v63 = vld [vmem:[#allocation110_spill] sm:$0xff] }
 0x206   : > { %v1483_v15 = vpop.f32.mrf.mxu0  ;;  %v1496_v2 = vpop.f32.mrf.mxu1  ;;  %v1391_v46 = vmul.f32 %v4361_v62, %v1388_v7  ;;  %vm1396_vm9 = vweird.f32 %v4361_v62  ;;  %v1399_v59 = vand.u32 2147483647, %v1388_v7 }
 0x207   : > { %4364 = vpow2.f32 %v4084_v47  ;;  %v4085_v51 = vmul.f32 -1.442695, %v1435_v58  ;;  %v4363_v10 = vpop.eup %4362  ;;  %v1484_v58 = vadd.f32 %v1483_v15, %v6896_v63  ;;  %v6897_v47 = vld [vmem:[#allocation111_spill] sm:$0xff]  ;;  %vm1397_vm11 = vmor %vm1395_vm8, %vm1396_vm9  ;;  %v1414_v15 = vand.u32 2147483647, %v5488_v0 }
 0x208   : > { %v1392_v22 = vsub.f32 1.0, %v1391_v46  ;;  %v1406_v18 = vmul.f32 %v4363_v10, %v5488_v0  ;;  %vm1411_vm10 = vweird.f32 %v4363_v10  ;;  %vm1400_vm14 = vcmp.eq.f32.partialorder %v1399_v59, 8.507059e+37 }
 0x209   : > { %4366 = vpow2.f32 %v4085_v51  ;;  %v1401_v51 = vand.u32 2147483648, %v1388_v7  ;;  %vm5503_vm13 = vmor %vm1410_vm12, %vm1411_vm10  ;;  %vm1415_vm15 = vcmp.eq.f32.partialorder %v1414_v15, 8.507059e+37 }
 0x20a   : > { %v1393_v26 = vmul.f32 %v4361_v62, %v1392_v22  ;;  %v1407_v17 = vsub.f32 1.0, %v1406_v18  ;;  %v1416_v18 = vand.u32 2147483648, %v5488_v0 }
 0x20c   : > { %v1408_v35 = vmul.f32 %v4363_v10, %v1407_v17  ;;  %v1394_v34 = vadd.f32 %v4361_v62, %v1393_v26 }
 0x20d   : > { %v4365_v30 = vpop.eup %4364 }
 0x20e   : > { %v5495_v6 = vadd.f32 1.0, %v4365_v30  ;;  %v1509_v45 = vpop.f32.mrf.mxu2  ;;  %v1522_v39 = vpop.f32.mrf.mxu3  ;;  %v1409_v17 = vadd.f32 %v4363_v10, %v1408_v35  ;;  %v1398_v30 = vsel %vm1397_vm11, %v4361_v62, %v1394_v34 }
 0x20f   : > { %v4367_v29 = vpop.eup %4366  ;;  %v1510_v57 = vadd.f32 %v1509_v45, %v6897_v47  ;;  %v1485_v46 = vpop.f32.mrf.mxu0  ;;  %v1497_v45 = vadd.f32 %v1496_v2, %v1484_v58  ;;  %v1402_v47 = vor.u32 1.1754944e-38, %v1401_v51  ;;  %v1537_v51 = vrot.slane %v5481_v54, 4 }
 0x210   : > { %v1498_v9 = vpop.f32.mrf.mxu1  ;;  %v1443_v22 = vadd.f32 1.0, %v4367_v29  ;;  %4368 = vrcp.f32 %v5495_v6  ;;  %v1413_v35 = vsel %vm5503_vm13, %v4363_v10, %v1409_v17  ;;  %v1536_v29 = vrot.slane %v5479_v32, 4 }
 0x211   : > { %v1523_v26 = vadd.f32 %v1522_v39, %v1510_v57  ;;  %v1403_v39 = vsel %vm1400_vm14, %v1402_v47, %v1398_v30  ;;  %v1417_v57 = vor.u32 1.1754944e-38, %v1416_v18  ;;  %v1455_v30 = vand.u32 2147483648, %v5495_v6 }
 0x212   : > { %4370 = vrcp.f32 %v1443_v22  ;;  %vm1449_vm3 = vweird.f32 %v5495_v6  ;;  %v1470_v54 = vand.u32 2147483648, %v1443_v22  ;;  %vm1464_vm7 = vweird.f32 %v1443_v22 }
 0x213   : > { %v1528_v9 = vrot.slane %v1523_v26, 7  ;;  %v1418_v7 = vsel %vm1415_vm15, %v1417_v57, %v1413_v35  ;;  %v1468_v57 = vand.u32 2147483647, %v1443_v22 }
 0x215   : > { %v1529_v62 = vsel %vm865_vm0, %v1497_v45, %v1528_v9  ;;  %v1530_v34 = vsel %vm867_vm1, %v1497_v45, %v1528_v9  ;;  %v1453_v9 = vand.u32 2147483647, %v5495_v6  ;;  %vm1469_vm10 = vcmp.eq.f32.partialorder %v1468_v57, 8.507059e+37 }
 0x216   : > { %v4369_v0 = vpop.eup %4368  ;;  %v1531_v2 = vrot.slane %v1530_v34, 1  ;;  %v1534_v58 = vmul.f32 %v1529_v62, %v1403_v39  ;;  %v1511_v46 = vpop.f32.mrf.mxu2 }
 0x217   : > { %v1524_v26 = vpop.f32.mrf.mxu3  ;;  %v1445_v59 = vmul.f32 %v4369_v0, %v5495_v6  ;;  %vm1450_vm2 = vweird.f32 %v4369_v0  ;;  %vm1454_vm8 = vcmp.eq.f32.partialorder %v1453_v9, 8.507059e+37 }
 0x218   : > { %v4371_v10 = vpop.eup %4370  ;;  %v1535_v17 = vmul.f32 %v1531_v2, %v1418_v7  ;;  %v1540_v32 = vadd.f32 %v1536_v29, %v1534_v58  ;;  %vm1451_vm6 = vmor %vm1449_vm3, %vm1450_vm2  ;;  %v1456_v29 = vor.u32 1.1754944e-38, %v1455_v30  ;;  %v1471_v58 = vor.u32 1.1754944e-38, %v1470_v54 }
 0x219   : > { %v1446_v47 = vsub.f32 1.0, %v1445_v59  ;;  %v1460_v18 = vmul.f32 %v4371_v10, %v1443_v22  ;;  %vm1465_vm5 = vweird.f32 %v4371_v10 }
 0x21a   : > { %v1541_v63 = vadd.f32 %v1537_v51, %v1535_v17  ;;  %4372 = vtanh.f32 %v1540_v32  ;;  %vm1466_vm9 = vmor %vm1464_vm7, %vm1465_vm5 }
 0x21b   : > { %v1447_v45 = vmul.f32 %v4369_v0, %v1446_v47  ;;  %v1461_v15 = vsub.f32 1.0, %v1460_v18 }
 0x21c   : > { %4374 = vtanh.f32 %v1541_v63 }
 0x21d   : > { %v1462_v39 = vmul.f32 %v4371_v10, %v1461_v15  ;;  %v1448_v35 = vadd.f32 %v4369_v0, %v1447_v45 }
 0x21f   : > { %v1452_v62 = vsel %vm1451_vm6, %v4369_v0, %v1448_v35  ;;  %v1463_v34 = vadd.f32 %v4371_v10, %v1462_v39 }
 0x220   : > { %v4373_v2 = vpop.eup %4372  ;;  %v1457_v51 = vsel %vm1454_vm8, %v1456_v29, %v1452_v62 }
 0x221   : > { %v1467_v46 = vsel %vm1466_vm9, %v4371_v10, %v1463_v34  ;;  %v1544_v6 = vsub.f32 %v5353_v53, %v4373_v2 }
 0x222   : > { %v4375_v26 = vpop.eup %4374  ;;  %v1472_v63 = vsel %vm1469_vm10, %v1471_v58, %v1467_v46  ;;  %v6900_v58 = vld [vmem:[#allocation24_spill] sm:$0xff]  ;;  %v6902_v46 = vld [vmem:[#allocation29_spill] sm:$0xff] }
 0x223   : > { %v1545_v59 = vsub.f32 %v5355_v43, %v4375_v26  ;;  %v1546_v7 = vmul.f32 %v1544_v6, %v1457_v51  ;;  %v6901_v51 = vld [vmem:[#allocation26_spill] sm:$0xff]  ;;  %v6903_v6 = vld [vmem:[#allocation27_spill] sm:$0xff] }
 0x225   : > { %v1547_v17 = vmul.f32 %v1545_v59, %v1472_v63  ;;  %v5519_v32 = vadd.f32 %v4373_v2, %v1546_v7  ;;  %v6905_v63 = vld [vmem:[#allocation30_spill] sm:$0xff]  ;;  %v6906_v59 = vld [vmem:[#allocation33_spill] sm:$0xff]  ;;  %v6907_v7 = vld [vmem:[#allocation31_spill] sm:$0xff] }
 0x227   : > { %v5521_v22 = vadd.f32 %v4375_v26, %v1547_v17  ;;  %v5524_v0 = vperm.slane %v5519_v32, 0  ;;  %v5527_v47 = vperm.slane %v5519_v32, 1  ;;  %v6904_v26 = vld [vmem:[#allocation28_spill] sm:$0xff] }
 0x228   : > { %v6908_v17 = vld [vmem:[#allocation32_spill] sm:$0xff] }
 0x229   : > { %v5530_v10 = vperm.slane %v5521_v22, 0  ;;  %v5533_v53 = vperm.slane %v5521_v22, 1  ;;  %v1568_v43 = vpack.c.bf16 %v5524_v0, %v5524_v0  ;;  %v1569_v30 = vpack.c.bf16 %v5527_v47, %v5527_v47 }
 0x22b   : > { %v1570_v18 = vpack.c.bf16 %v5530_v10, %v5530_v10  ;;  %v1571_v45 = vpack.c.bf16 %v5533_v53, %v5533_v53  ;;  %v1576_v54 = vunpack.c.l.b16 %v1568_v43  ;;  %v1577_v35 = vunpack.c.l.b16 %v1569_v30  ;;  %v6909_v43 = vld [vmem:[#allocation34_spill] sm:$0xff]  ;;  %v6911_v30 = vld [vmem:[#allocation35_spill] sm:$0xff] }
 0x22d   : > { %v1578_v15 = vunpack.c.l.b16 %v1570_v18  ;;  %v1579_v9 = vunpack.c.l.b16 %v1571_v45  ;;  %v6910_v18 = vld [vmem:[#allocation37_spill] sm:$0xff]  ;;  %v6912_v45 = vld [vmem:[#allocation36_spill] sm:$0xff] }
 0x22f   : > { %v1580_v39 = vrot.slane %v1578_v15, 7  ;;  %v1582_v57 = vrot.slane %v1579_v9, 7  ;;  %v6913_v15 = vld [vmem:[#allocation38_spill] sm:$0xff]  ;;  %v6914_v9 = vld [vmem:[#allocation41_spill] sm:$0xff] }
 0x231   : > { %v1581_v29 = vsel %vm867_vm1, %v1580_v39, %v1576_v54  ;;  %v1583_v34 = vsel %vm867_vm1, %v1582_v57, %v1577_v35  ;;  %v6915_v54 = vld [vmem:[#allocation39_spill] sm:$0xff]  ;;  %v6916_v39 = vld [vmem:[#allocation40_spill] sm:$0xff]  ;;  %v6917_v35 = vld [vmem:[#allocation42_spill] sm:$0xff] }
 0x232   : > { %v1584_v62 = vpack.c.b16 %v1581_v29, %v1581_v29  ;;  %v1585_v2 = vpack.c.b16 %v1583_v34, %v1583_v34  ;;  %v6918_v57 = vld [vmem:[#allocation45_spill] sm:$0xff]  ;;  %v6919_v29 = vld [vmem:[#allocation43_spill] sm:$0xff]  ;;  %v6921_v34 = vld [vmem:[#allocation46_spill] sm:$0xff] }
 0x234   : > { %1596 = vmatmul.bf16.vlgmr.msra.gmra.mxu0 %v1584_v62  ;;  %1622 = vmatmul.bf16.vlgmr.msra.gmra.mxu2 %v1584_v62 }
 0x235   : > { %1609 = vmatmul.bf16.vlgmr.msra.gmra.mxu1 %v1585_v2  ;;  %1635 = vmatmul.bf16.vlgmr.msra.gmra.mxu3 %v1585_v2 }
 0x236   : > { %1794 = vmatpush.bf16.msra.mxu0 %v6834_v41  ;;  %1807 = vmatpush.bf16.msra.mxu1 %v6835_v28 }
 0x237   : > { %1820 = vmatpush.bf16.msra.mxu2 %v6836_v11  ;;  %1833 = vmatpush.bf16.msra.mxu3 %v6837_v56 }
 0x23a   : > { %1795 = vmatpush.bf16.msra.mxu0 %v6838_v19  ;;  %1808 = vmatpush.bf16.msra.mxu1 %v6839_v44 }
 0x23b   : > { %1821 = vmatpush.bf16.msra.mxu2 %v6840_v14  ;;  %1834 = vmatpush.bf16.msra.mxu3 %v6841_v36 }
 0x23e   : > { %1796 = vmatpush.bf16.msra.mxu0 %v6842_v1  ;;  %1809 = vmatpush.bf16.msra.mxu1 %v6843_v42 }
 0x23f   : > { %1822 = vmatpush.bf16.msra.mxu2 %v6844_v48  ;;  %1835 = vmatpush.bf16.msra.mxu3 %v6845_v12 }
 0x242   : > { %1797 = vmatpush.bf16.msra.mxu0 %v6846_v24  ;;  %1810 = vmatpush.bf16.msra.mxu1 %v6847_v31 }
 0x243   : > { %1823 = vmatpush.bf16.msra.mxu2 %v6848_v5  ;;  %1836 = vmatpush.bf16.msra.mxu3 %v6849_v37 }
 0x244   : > { %1648 = vmatmul.bf16.vlgmr.msrb.gmra.mxu0 %v1584_v62  ;;  %1674 = vmatmul.bf16.vlgmr.msrb.gmra.mxu2 %v1584_v62 }
 0x245   : > { %1661 = vmatmul.bf16.vlgmr.msrb.gmra.mxu1 %v1585_v2  ;;  %1687 = vmatmul.bf16.vlgmr.msrb.gmra.mxu3 %v1585_v2 }
 0x246   : > { %1798 = vmatpush.bf16.msra.mxu0 %v6850_v27  ;;  %1811 = vmatpush.bf16.msra.mxu1 %v6851_v52 }
 0x247   : > { %1824 = vmatpush.bf16.msra.mxu2 %v6852_v3  ;;  %1837 = vmatpush.bf16.msra.mxu3 %v6853_v60 }
 0x24a   : > { %1799 = vmatpush.bf16.msra.mxu0 %v5176_v25  ;;  %1812 = vmatpush.bf16.msra.mxu1 %v5185_v38 }
 0x24b   : > { %1825 = vmatpush.bf16.msra.mxu2 %v6854_v40  ;;  %1838 = vmatpush.bf16.msra.mxu3 %v6855_v61 }
 0x24e   : > { %1800 = vmatpush.bf16.msra.mxu0 %v5188_v49  ;;  %1813 = vmatpush.bf16.msra.mxu1 %v5197_v50 }
 0x24f   : > { %1826 = vmatpush.bf16.msra.mxu2 %v5192_v20  ;;  %1839 = vmatpush.bf16.msra.mxu3 %v5194_v55 }
 0x252   : > { %1801 = vmatpush.bf16.msra.mxu0 %v5200_v16  ;;  %1814 = vmatpush.bf16.msra.mxu1 %v5209_v23 }
 0x253   : > { %1827 = vmatpush.bf16.msra.mxu2 %v5204_v33  ;;  %1840 = vmatpush.bf16.msra.mxu3 %v5206_v21 }
 0x255   : > { %1802 = vmatmul.bf16.vlgmr.msra.gmra.mxu0 %v1584_v62  ;;  %1815 = vmatmul.bf16.vlgmr.msra.gmra.mxu1 %v1585_v2 }
 0x256   : > { %1908 = vmatpush.bf16.msrb.mxu0 %v4912_v4  ;;  %1921 = vmatpush.bf16.msrb.mxu1 %v4919_v13 }
 0x257   : > { %1828 = vmatmul.bf16.vlgmr.msra.gmra.mxu2 %v1584_v62  ;;  %1841 = vmatmul.bf16.vlgmr.msra.gmra.mxu3 %v1585_v2  ;;  %v6920_v62 = vld [vmem:[#allocation44_spill] sm:$0xff]  ;;  %v6922_v2 = vld [vmem:[#allocation49_spill] sm:$0xff] }
 0x258   : > { %1934 = vmatpush.bf16.msrb.mxu2 %v4914_v8  ;;  %1947 = vmatpush.bf16.msrb.mxu3 %v6900_v58 }
 0x25a   : > { %1909 = vmatpush.bf16.msrb.mxu0 %v6901_v51  ;;  %1922 = vmatpush.bf16.msrb.mxu1 %v6902_v46 }
 0x25c   : > { %1935 = vmatpush.bf16.msrb.mxu2 %v6903_v6  ;;  %1948 = vmatpush.bf16.msrb.mxu3 %v6904_v26 }
 0x25e   : > { %1910 = vmatpush.bf16.msrb.mxu0 %v6905_v63  ;;  %1923 = vmatpush.bf16.msrb.mxu1 %v6906_v59 }
 0x260   : > { %1936 = vmatpush.bf16.msrb.mxu2 %v6907_v7  ;;  %1949 = vmatpush.bf16.msrb.mxu3 %v6908_v17 }
 0x262   : > { %1911 = vmatpush.bf16.msrb.mxu0 %v6909_v43  ;;  %1924 = vmatpush.bf16.msrb.mxu1 %v6910_v18  ;;  %v4087_v18 = vld [vmem:[%s4893_s28 + $0x2] ss:$8 sm:$0x30] }
 0x263   : > { %v4088_v43 = vld [vmem:[%s4893_s28 + $0x32] ss:$8 sm:$0xf] }
 0x264   : > { %1937 = vmatpush.bf16.msrb.mxu2 %v6911_v30  ;;  %1950 = vmatpush.bf16.msrb.mxu3 %v6912_v45  ;;  %v6923_v45 = vld [vmem:[#allocation47_spill] sm:$0xff] }
 0x265   : > { %v4086_v30 = vld [vmem:[%s4893_s28 + $0x2] ss:$8 sm:$0xf] }
 0x266   : > { %1912 = vmatpush.bf16.msrb.mxu0 %v6913_v15  ;;  %1925 = vmatpush.bf16.msrb.mxu1 %v6914_v9  ;;  %v6924_v15 = vld [vmem:[#allocation48_spill] sm:$0xff]  ;;  %v6925_v9 = vld [vmem:[#allocation50_spill] sm:$0xff]  ;;  %v5645_v7 = vor.u32 %v4087_v18, %v4086_v30 }
 0x268   : > { %1938 = vmatpush.bf16.msrb.mxu2 %v6915_v54  ;;  %1951 = vmatpush.bf16.msrb.mxu3 %v6916_v39  ;;  %v6926_v54 = vld [vmem:[#allocation56_spill] sm:$0xff]  ;;  %v6927_v39 = vld [vmem:[#allocation53_spill] sm:$0xff] }
 0x26a   : > { %1913 = vmatpush.bf16.msrb.mxu0 %v6917_v35  ;;  %1926 = vmatpush.bf16.msrb.mxu1 %v6918_v57  ;;  %v6928_v35 = vld [vmem:[#allocation57_spill] sm:$0xff]  ;;  %v6929_v57 = vld [vmem:[#allocation51_spill] sm:$0xff] }
 0x26c   : > { %1939 = vmatpush.bf16.msrb.mxu2 %v6919_v29  ;;  %1952 = vmatpush.bf16.msrb.mxu3 %v6920_v62  ;;  %v6930_v29 = vld [vmem:[#allocation52_spill] sm:$0xff]  ;;  %v6931_v62 = vld [vmem:[#allocation54_spill] sm:$0xff] }
 0x26e   : > { %1914 = vmatpush.bf16.msrb.mxu0 %v6921_v34  ;;  %1927 = vmatpush.bf16.msrb.mxu1 %v6922_v2  ;;  %v6932_v34 = vld [vmem:[#allocation55_spill] sm:$0xff] }
 0x26f   : > { %v6933_v2 = vld [vmem:[#allocation59_spill] sm:$0xff] }
 0x270   : > { %1940 = vmatpush.bf16.msrb.mxu2 %v6923_v45  ;;  %1953 = vmatpush.bf16.msrb.mxu3 %v6924_v15  ;;  %v6934_v45 = vld [vmem:[#allocation62_spill] sm:$0xff]  ;;  %v6935_v15 = vld [vmem:[#allocation60_spill] sm:$0xff] }
 0x272   : > { %1915 = vmatpush.bf16.msrb.mxu0 %v6925_v9  ;;  %1928 = vmatpush.bf16.msrb.mxu1 %v6926_v54  ;;  %v6936_v9 = vld [vmem:[#allocation61_spill] sm:$0xff]  ;;  %v6937_v54 = vld [vmem:[#allocation63_spill] sm:$0xff] }
 0x274   : > { %1941 = vmatpush.bf16.msrb.mxu2 %v6929_v57  ;;  %1954 = vmatpush.bf16.msrb.mxu3 %v6930_v29  ;;  %v6940_v57 = vld [vmem:[#allocation65_spill] sm:$0xff]  ;;  %v6941_v29 = vld [vmem:[#allocation67_spill] sm:$0xff] }
 0x276   : > { %1960 = vmatpush.bf16.msra.mxu0 %v6927_v39  ;;  %1973 = vmatpush.bf16.msra.mxu1 %v6928_v35  ;;  %v6938_v39 = vld [vmem:[#allocation66_spill] sm:$0xff]  ;;  %v6939_v35 = vld [vmem:[#allocation64_spill] sm:$0xff] }
 0x278   : > { %1986 = vmatpush.bf16.msra.mxu2 %v6931_v62  ;;  %1999 = vmatpush.bf16.msra.mxu3 %v6932_v34  ;;  %v6942_v62 = vld [vmem:[#allocation70_spill] sm:$0xff]  ;;  %v6943_v34 = vld [vmem:[#allocation68_spill] sm:$0xff] }
 0x27a   : > { %1961 = vmatpush.bf16.msra.mxu0 %v6933_v2  ;;  %1974 = vmatpush.bf16.msra.mxu1 %v6934_v45  ;;  %v6944_v2 = vld [vmem:[#allocation69_spill] sm:$0xff]  ;;  %v6945_v45 = vld [vmem:[#allocation71_spill] sm:$0xff] }
 0x27c   : > { %1987 = vmatpush.bf16.msra.mxu2 %v6935_v15  ;;  %2000 = vmatpush.bf16.msra.mxu3 %v6936_v9  ;;  %v6946_v15 = vld [vmem:[#allocation74_spill] sm:$0xff]  ;;  %v6947_v9 = vld [vmem:[#allocation72_spill] sm:$0xff] }
 0x27e   : > { %1962 = vmatpush.bf16.msra.mxu0 %v6937_v54  ;;  %1975 = vmatpush.bf16.msra.mxu1 %v6938_v39  ;;  %v6948_v54 = vld [vmem:[#allocation73_spill] sm:$0xff]  ;;  %v6949_v39 = vld [vmem:[#allocation75_spill] sm:$0xff] }
 0x280   : > { %1988 = vmatpush.bf16.msra.mxu2 %v6939_v35  ;;  %2001 = vmatpush.bf16.msra.mxu3 %v6940_v57  ;;  %v6950_v57 = vld [vmem:[#allocation78_spill] sm:$0xff] }
 0x282   : > { %1963 = vmatpush.bf16.msra.mxu0 %v6941_v29  ;;  %1976 = vmatpush.bf16.msra.mxu1 %v6942_v62  ;;  %v6951_v29 = vld [vmem:[#allocation76_spill] sm:$0xff]  ;;  %v6952_v62 = vld [vmem:[#allocation77_spill] sm:$0xff] }
 0x284   : > { %1989 = vmatpush.bf16.msra.mxu2 %v6943_v34  ;;  %2002 = vmatpush.bf16.msra.mxu3 %v6944_v2  ;;  %v6953_v2 = vld [vmem:[#allocation79_spill] sm:$0xff]  ;;  %v6959_v34 = vld [vmem:[#allocation84_spill] sm:$0xff] }
 0x286   : > { %1964 = vmatpush.bf16.msra.mxu0 %v6945_v45  ;;  %1977 = vmatpush.bf16.msra.mxu1 %v6946_v15  ;;  %v6954_v45 = vld [vmem:[#allocation82_spill] sm:$0xff]  ;;  %v6955_v15 = vld [vmem:[#allocation80_spill] sm:$0xff] }
 0x288   : > { %1990 = vmatpush.bf16.msra.mxu2 %v6947_v9  ;;  %2003 = vmatpush.bf16.msra.mxu3 %v6948_v54  ;;  %v6956_v9 = vld [vmem:[#allocation81_spill] sm:$0xff]  ;;  %v6957_v54 = vld [vmem:[#allocation83_spill] sm:$0xff] }
 0x28a   : > { %1965 = vmatpush.bf16.msra.mxu0 %v6949_v39  ;;  %1978 = vmatpush.bf16.msra.mxu1 %v6950_v57  ;;  %v6958_v39 = vld [vmem:[#allocation89_spill] sm:$0xff] }
 0x28b   : > { %v6960_v57 = vld [vmem:[#allocation85_spill] sm:$0xff] }
 0x28c   : > { %1991 = vmatpush.bf16.msra.mxu2 %v6951_v29  ;;  %2004 = vmatpush.bf16.msra.mxu3 %v6952_v62 }
 0x28e   : > { %1966 = vmatpush.bf16.msra.mxu0 %v6953_v2  ;;  %1979 = vmatpush.bf16.msra.mxu1 %v6954_v45  ;;  %v4089_v45 = vld [vmem:[%s4893_s28 + $0x32] ss:$8 sm:$0x30] }
 0x290   : > { %1992 = vmatpush.bf16.msra.mxu2 %v6955_v15  ;;  %2005 = vmatpush.bf16.msra.mxu3 %v6956_v9 }
 0x292   : > { %1967 = vmatpush.bf16.msra.mxu0 %v6957_v54  ;;  %1980 = vmatpush.bf16.msra.mxu1 %v6958_v39  ;;  %v5647_v39 = vor.u32 %v4089_v45, %v4088_v43 }
 0x294   : > { %1993 = vmatpush.bf16.msra.mxu2 %v6959_v34  ;;  %2006 = vmatpush.bf16.msra.mxu3 %v6960_v57 }
 0x2b1   : > { %v1597_v29 = vpop.f32.mrf.mxu0 }
 0x2b2   : > { %v1610_v35 = vpop.f32.mrf.mxu1 }
 0x2b3   : > { %v1611_v54 = vadd.f32 %v1610_v35, %v1597_v29 }
 0x2b7   : > { %v1623_v62 = vpop.f32.mrf.mxu2 }
 0x2b8   : > { %v1636_v2 = vpop.f32.mrf.mxu3 }
 0x2b9   : > { %v1637_v17 = vadd.f32 %v1636_v2, %v1623_v62  ;;  %v1599_v15 = vpop.f32.mrf.mxu0 }
 0x2ba   : > { %v1612_v9 = vpop.f32.mrf.mxu1 }
 0x2bb   : > { %v1694_v59 = vrot.slane %v1637_v17, 7 }
 0x2bd   : > { %v1695_v34 = vsel %vm865_vm0, %v1611_v54, %v1694_v59  ;;  %v1696_v57 = vsel %vm867_vm1, %v1611_v54, %v1694_v59  ;;  %v1742_v54 = vrot.slane %v5645_v7, 2 }
 0x2be   : > { %v1697_v63 = vrot.slane %v1696_v57, 1  ;;  %v1700_v26 = vadd.f32 %v1695_v34, %v5645_v7 }
 0x2bf   : > { %v1625_v6 = vpop.f32.mrf.mxu2 }
 0x2c0   : > { %v1701_v46 = vadd.f32 %v1697_v63, %v5647_v39  ;;  %v4090_v51 = vmul.f32 -1.442695, %v1700_v26  ;;  %v1638_v62 = vpop.f32.mrf.mxu3 }
 0x2c1   : > { %v1649_v15 = vpop.f32.mrf.mxu0 }
 0x2c2   : > { %4376 = vpow2.f32 %v4090_v51  ;;  %v4091_v18 = vmul.f32 -1.442695, %v1701_v46  ;;  %v1662_v30 = vpop.f32.mrf.mxu1  ;;  %v1743_v51 = vrot.slane %v5647_v39, 2 }
 0x2c3   : > { %v1663_v26 = vadd.f32 %v1662_v30, %v1649_v15 }
 0x2c4   : > { %4378 = vpow2.f32 %v4091_v18 }
 0x2c7   : > { %v1675_v17 = vpop.f32.mrf.mxu2 }
 0x2c8   : > { %v4377_v43 = vpop.eup %4376  ;;  %v1688_v45 = vpop.f32.mrf.mxu3 }
 0x2c9   : > { %v1708_v9 = vadd.f32 1.0, %v4377_v43  ;;  %v1689_v35 = vadd.f32 %v1688_v45, %v1675_v17  ;;  %v1651_v29 = vpop.f32.mrf.mxu0 }
 0x2ca   : > { %v4379_v59 = vpop.eup %4378  ;;  %v1664_v57 = vpop.f32.mrf.mxu1 }
 0x2cb   : > { %v5654_v6 = vadd.f32 1.0, %v4379_v59  ;;  %4380 = vrcp.f32 %v1708_v9  ;;  %v1748_v63 = vrot.slane %v1689_v35, 7  ;;  %vm1715_vm11 = vweird.f32 %v1708_v9 }
 0x2cd   : > { %4382 = vrcp.f32 %v5654_v6  ;;  %v1749_v46 = vsel %vm865_vm0, %v1663_v26, %v1748_v63  ;;  %v1750_v34 = vsel %vm867_vm1, %v1663_v26, %v1748_v63  ;;  %vm1730_vm15 = vweird.f32 %v5654_v6 }
 0x2ce   : > { %v1751_v2 = vrot.slane %v1750_v34, 1  ;;  %v1754_v62 = vadd.f32 %v1749_v46, %v1742_v54 }
 0x2cf   : > { %v1677_v18 = vpop.f32.mrf.mxu2 }
 0x2d0   : > { %v1755_v17 = vadd.f32 %v1751_v2, %v1743_v51  ;;  %v4092_v43 = vmul.f32 -1.442695, %v1754_v62  ;;  %v1690_v45 = vpop.f32.mrf.mxu3  ;;  %v6961_v62 = vld [vmem:[#allocation110_spill] sm:$0xff] }
 0x2d1   : > { %v4381_v29 = vpop.eup %4380  ;;  %v1719_v45 = vand.u32 2147483647, %v1708_v9 }
 0x2d2   : > { %4384 = vpow2.f32 %v4092_v43  ;;  %v4093_v59 = vmul.f32 -1.442695, %v1755_v17  ;;  %v1803_v57 = vpop.f32.mrf.mxu0  ;;  %v1816_v15 = vpop.f32.mrf.mxu1  ;;  %v1711_v30 = vmul.f32 %v4381_v29, %v1708_v9  ;;  %vm1716_vm12 = vweird.f32 %v4381_v29  ;;  %v6962_v17 = vld [vmem:[#allocation111_spill] sm:$0xff] }
 0x2d3   : > { %v4383_v35 = vpop.eup %4382  ;;  %v1804_v18 = vadd.f32 %v1803_v57, %v6961_v62  ;;  %vm1717_vm14 = vmor %vm1715_vm11, %vm1716_vm12  ;;  %v1734_v57 = vand.u32 2147483647, %v5654_v6  ;;  %vm1720_vm3 = vcmp.eq.f32.partialorder %v1719_v45, 8.507059e+37 }
 0x2d4   : > { %4386 = vpow2.f32 %v4093_v59  ;;  %v1712_v58 = vsub.f32 1.0, %v1711_v30  ;;  %v1726_v8 = vmul.f32 %v4383_v35, %v5654_v6  ;;  %v1721_v59 = vand.u32 2147483648, %v1708_v9 }
 0x2d5   : > { %vm1731_vm13 = vweird.f32 %v4383_v35  ;;  %vm1735_vm5 = vcmp.eq.f32.partialorder %v1734_v57, 8.507059e+37 }
 0x2d6   : > { %v1713_v13 = vmul.f32 %v4381_v29, %v1712_v58  ;;  %v1727_v4 = vsub.f32 1.0, %v1726_v8  ;;  %v1736_v8 = vand.u32 2147483648, %v5654_v6  ;;  %vm5669_vm2 = vmor %vm1730_vm15, %vm1731_vm13 }
 0x2d8   : > { %v4385_v26 = vpop.eup %4384  ;;  %v1728_v63 = vmul.f32 %v4383_v35, %v1727_v4  ;;  %v1714_v46 = vadd.f32 %v4381_v29, %v1713_v13 }
 0x2d9   : > { %v5661_v54 = vadd.f32 1.0, %v4385_v26 }
 0x2da   : > { %v1829_v51 = vpop.f32.mrf.mxu2  ;;  %v1842_v34 = vpop.f32.mrf.mxu3  ;;  %v1729_v4 = vadd.f32 %v4383_v35, %v1728_v63  ;;  %v1718_v26 = vsel %vm1717_vm14, %v4381_v29, %v1714_v46 }
 0x2db   : > { %v4387_v2 = vpop.eup %4386  ;;  %v1830_v43 = vadd.f32 %v1829_v51, %v6962_v17  ;;  %v1805_v30 = vpop.f32.mrf.mxu0  ;;  %4388 = vrcp.f32 %v5661_v54  ;;  %v1817_v51 = vadd.f32 %v1816_v15, %v1804_v18  ;;  %v1722_v17 = vor.u32 1.1754944e-38, %v1721_v59 }
 0x2dc   : > { %v1818_v21 = vpop.f32.mrf.mxu1  ;;  %v1763_v58 = vadd.f32 1.0, %v4387_v2  ;;  %v1733_v63 = vsel %vm5669_vm2, %v4383_v35, %v1729_v4  ;;  %v1856_v2 = vrot.slane %v5645_v7, 4  ;;  %v1857_v59 = vrot.slane %v5647_v39, 4 }
 0x2dd   : > { %v1843_v13 = vadd.f32 %v1842_v34, %v1830_v43  ;;  %v1723_v34 = vsel %vm1720_vm3, %v1722_v17, %v1718_v26  ;;  %v1737_v43 = vor.u32 1.1754944e-38, %v1736_v8  ;;  %v1775_v26 = vand.u32 2147483648, %v5661_v54 }
 0x2de   : > { %4390 = vrcp.f32 %v1763_v58  ;;  %vm1769_vm7 = vweird.f32 %v5661_v54  ;;  %v1790_v39 = vand.u32 2147483648, %v1763_v58  ;;  %vm1784_vm10 = vweird.f32 %v1763_v58 }
 0x2df   : > { %v1848_v21 = vrot.slane %v1843_v13, 7  ;;  %v1738_v9 = vsel %vm1735_vm5, %v1737_v43, %v1733_v63  ;;  %v1788_v43 = vand.u32 2147483647, %v1763_v58 }
 0x2e1   : > { %v1849_v29 = vsel %vm865_vm0, %v1817_v51, %v1848_v21  ;;  %v1850_v46 = vsel %vm867_vm1, %v1817_v51, %v1848_v21  ;;  %v4389_v6 = vpop.eup %4388  ;;  %v1773_v21 = vand.u32 2147483647, %v5661_v54  ;;  %vm1789_vm13 = vcmp.eq.f32.partialorder %v1788_v43, 8.507059e+37 }
 0x2e2   : > { %v1851_v15 = vrot.slane %v1850_v46, 1  ;;  %v1854_v18 = vmul.f32 %v1849_v29, %v1723_v34  ;;  %v1831_v30 = vpop.f32.mrf.mxu2  ;;  %v1844_v13 = vpop.f32.mrf.mxu3  ;;  %v1765_v45 = vmul.f32 %v4389_v6, %v5661_v54  ;;  %vm1770_vm6 = vweird.f32 %v4389_v6 }
 0x2e3   : > { %vm1771_vm9 = vmor %vm1769_vm7, %vm1770_vm6  ;;  %vm1774_vm11 = vcmp.eq.f32.partialorder %v1773_v21, 8.507059e+37 }
 0x2e4   : > { %v4391_v35 = vpop.eup %4390  ;;  %v1855_v4 = vmul.f32 %v1851_v15, %v1738_v9  ;;  %v1860_v7 = vadd.f32 %v1856_v2, %v1854_v18  ;;  %v1766_v17 = vsub.f32 1.0, %v1765_v45  ;;  %v1776_v2 = vor.u32 1.1754944e-38, %v1775_v26 }
 0x2e5   : > { %v1780_v8 = vmul.f32 %v4391_v35, %v1763_v58  ;;  %vm1785_vm8 = vweird.f32 %v4391_v35  ;;  %v1791_v18 = vor.u32 1.1754944e-38, %v1790_v39  ;;  %v6968_v39 = vld [vmem:[#allocation114_spill] sm:$0xff] }
 0x2e6   : > { %v1861_v62 = vadd.f32 %v1857_v59, %v1855_v4  ;;  %4392 = vtanh.f32 %v1860_v7  ;;  %v1767_v51 = vmul.f32 %v4389_v6, %v1766_v17  ;;  %vm1786_vm12 = vmor %vm1784_vm10, %vm1785_vm8 }
 0x2e7   : > { %v1781_v57 = vsub.f32 1.0, %v1780_v8  ;;  %v6965_v8 = vld [vmem:[#allocation58_spill] sm:$0xff] }
 0x2e8   : > { %4394 = vtanh.f32 %v1861_v62  ;;  %v1768_v63 = vadd.f32 %v4389_v6, %v1767_v51 }
 0x2e9   : > { %v1782_v34 = vmul.f32 %v4391_v35, %v1781_v57  ;;  %v6967_v57 = vld [vmem:[#allocation113_spill] sm:$0xff] }
 0x2ea   : > { %v1772_v29 = vsel %vm1771_vm9, %v4389_v6, %v1768_v63  ;;  %v3482_v21 = vsel %vm865_vm0, %v6967_v57, %v5530_v10  ;;  %v6978_v57 = vld [vmem:[#allocation30_spill] sm:$0xff] }
 0x2eb   : > { %v1783_v46 = vadd.f32 %v4391_v35, %v1782_v34  ;;  %v1777_v59 = vsel %vm1774_vm11, %v1776_v2, %v1772_v29  ;;  %v3483_v34 = vsel %vm865_vm0, %v6968_v39, %v5533_v53  ;;  %v6980_v39 = vld [vmem:[#allocation31_spill] sm:$0xff] }
 0x2ec   : > { %v4393_v15 = vpop.eup %4392 }
 0x2ed   : > { %v1787_v30 = vsel %vm1786_vm12, %v4391_v35, %v1783_v46  ;;  %v1864_v54 = vsub.f32 %v5519_v32, %v4393_v15  ;;  %v3480_v35 = vsel %vm865_vm0, %v6965_v8, %v5524_v0  ;;  %v6966_v32 = vld [vmem:[#allocation112_spill] sm:$0xff]  ;;  %v6972_v8 = vld [vmem:[#allocation23_spill] sm:$0xff] }
 0x2ee   : > { %v4395_v13 = vpop.eup %4394  ;;  %v1792_v62 = vsel %vm1789_vm13, %v1791_v18, %v1787_v30  ;;  %v3481_v26 = vsel %vm865_vm0, %v6966_v32, %v5527_v47  ;;  %v6974_v32 = vld [vmem:[#allocation26_spill] sm:$0xff] }
 0x2ef   : > { %v1865_v45 = vsub.f32 %v5521_v22, %v4395_v13  ;;  %v1866_v9 = vmul.f32 %v1864_v54, %v1777_v59 }
 0x2f1   : > { %v1867_v4 = vmul.f32 %v1865_v45, %v1792_v62  ;;  %v5685_v7 = vadd.f32 %v4393_v15, %v1866_v9 }
 0x2f3   : > { %v5687_v58 = vadd.f32 %v4395_v13, %v1867_v4  ;;  %v1880_v6 = vperm.slane %v5685_v7, 0  ;;  %v1881_v17 = vperm.slane %v5685_v7, 1  ;;  %v6969_v4 = vld [vmem:[#allocation109_spill] sm:$0xff] }
 0x2f5   : > { %v1882_v22 = vperm.slane %v5687_v58, 0  ;;  %v1883_v51 = vperm.slane %v5687_v58, 1  ;;  %v5706_v63 = vsel %vm1216_vm4, %v3480_v35, %v1880_v6  ;;  %v5709_v0 = vsel %vm1216_vm4, %v3481_v26, %v1881_v17  ;;  %v6973_v35 = vld [vmem:[#allocation24_spill] sm:$0xff]  ;;  %v6975_v26 = vld [vmem:[#allocation29_spill] sm:$0xff] }
 0x2f6   : > { %v1888_v43 = vpack.c.bf16 %v1880_v6, %v1880_v6  ;;  %v1889_v46 = vpack.c.bf16 %v1881_v17, %v1881_v17  ;;  %v6970_v6 = vld [vmem:[#allocation22_spill] sm:$0xff]  ;;  %v6971_v17 = vld [vmem:[#allocation25_spill] sm:$0xff] }
 0x2f7   : > { %v5712_v47 = vsel %vm1216_vm4, %v3482_v21, %v1882_v22  ;;  %v5715_v2 = vsel %vm1216_vm4, %v3483_v34, %v1883_v51  ;;  %v1890_v29 = vpack.c.bf16 %v1882_v22, %v1882_v22  ;;  %v1891_v10 = vpack.c.bf16 %v1883_v51, %v1883_v51  ;;  %v6976_v22 = vld [vmem:[#allocation27_spill] sm:$0xff]  ;;  %v6977_v51 = vld [vmem:[#allocation28_spill] sm:$0xff]  ;;  %v6979_v21 = vld [vmem:[#allocation33_spill] sm:$0xff] }
 0x2f8   : > { %v1896_v59 = vunpack.c.l.b16 %v1888_v43  ;;  %v1897_v30 = vunpack.c.l.b16 %v1889_v46  ;;  %v6981_v34 = vld [vmem:[#allocation32_spill] sm:$0xff]  ;;  %v6982_v43 = vld [vmem:[#allocation34_spill] sm:$0xff]  ;;  %v6984_v46 = vld [vmem:[#allocation35_spill] sm:$0xff] }
 0x2f9   : > { %v1898_v15 = vunpack.c.l.b16 %v1890_v29  ;;  %v1899_v18 = vunpack.c.l.b16 %v1891_v10  ;;  %v6983_v29 = vld [vmem:[#allocation37_spill] sm:$0xff]  ;;  %v6985_v10 = vld [vmem:[#allocation36_spill] sm:$0xff] }
 0x2fb   : > { %v1900_v53 = vrot.slane %v1898_v15, 7  ;;  %v1902_v54 = vrot.slane %v1899_v18, 7  ;;  %v6986_v15 = vld [vmem:[#allocation38_spill] sm:$0xff]  ;;  %v6987_v18 = vld [vmem:[#allocation41_spill] sm:$0xff] }
 0x2fd   : > { %v1901_v13 = vsel %vm867_vm1, %v1900_v53, %v1896_v59  ;;  %v1903_v45 = vsel %vm867_vm1, %v1902_v54, %v1897_v30  ;;  %v6988_v59 = vld [vmem:[#allocation39_spill] sm:$0xff]  ;;  %v6989_v53 = vld [vmem:[#allocation40_spill] sm:$0xff]  ;;  %v6990_v30 = vld [vmem:[#allocation42_spill] sm:$0xff] }
 0x2fe   : > { %v1904_v62 = vpack.c.b16 %v1901_v13, %v1901_v13  ;;  %v1905_v9 = vpack.c.b16 %v1903_v45, %v1903_v45  ;;  %v6991_v54 = vld [vmem:[#allocation45_spill] sm:$0xff]  ;;  %v6992_v13 = vld [vmem:[#allocation43_spill] sm:$0xff]  ;;  %v6994_v45 = vld [vmem:[#allocation46_spill] sm:$0xff] }
 0x300   : > { %1916 = vmatmul.bf16.vlgmr.msrb.gmra.mxu0 %v1904_v62  ;;  %1942 = vmatmul.bf16.vlgmr.msrb.gmra.mxu2 %v1904_v62 }
 0x301   : > { %1929 = vmatmul.bf16.vlgmr.msrb.gmra.mxu1 %v1905_v9  ;;  %1955 = vmatmul.bf16.vlgmr.msrb.gmra.mxu3 %v1905_v9 }
 0x302   : > { %2114 = vmatpush.bf16.msrb.mxu0 %v6834_v41  ;;  %2127 = vmatpush.bf16.msrb.mxu1 %v6835_v28 }
 0x303   : > { %2140 = vmatpush.bf16.msrb.mxu2 %v6836_v11  ;;  %2153 = vmatpush.bf16.msrb.mxu3 %v6837_v56 }
 0x306   : > { %2115 = vmatpush.bf16.msrb.mxu0 %v6838_v19  ;;  %2128 = vmatpush.bf16.msrb.mxu1 %v6839_v44 }
 0x307   : > { %2141 = vmatpush.bf16.msrb.mxu2 %v6840_v14  ;;  %2154 = vmatpush.bf16.msrb.mxu3 %v6841_v36 }
 0x30a   : > { %2116 = vmatpush.bf16.msrb.mxu0 %v6842_v1  ;;  %2129 = vmatpush.bf16.msrb.mxu1 %v6843_v42 }
 0x30b   : > { %2142 = vmatpush.bf16.msrb.mxu2 %v6844_v48  ;;  %2155 = vmatpush.bf16.msrb.mxu3 %v6845_v12 }
 0x30e   : > { %2117 = vmatpush.bf16.msrb.mxu0 %v6846_v24  ;;  %2130 = vmatpush.bf16.msrb.mxu1 %v6847_v31 }
 0x30f   : > { %2143 = vmatpush.bf16.msrb.mxu2 %v6848_v5  ;;  %2156 = vmatpush.bf16.msrb.mxu3 %v6849_v37 }
 0x310   : > { %1968 = vmatmul.bf16.vlgmr.msra.gmra.mxu0 %v1904_v62  ;;  %1994 = vmatmul.bf16.vlgmr.msra.gmra.mxu2 %v1904_v62 }
 0x311   : > { %1981 = vmatmul.bf16.vlgmr.msra.gmra.mxu1 %v1905_v9  ;;  %2007 = vmatmul.bf16.vlgmr.msra.gmra.mxu3 %v1905_v9 }
 0x312   : > { %2118 = vmatpush.bf16.msrb.mxu0 %v6850_v27  ;;  %2131 = vmatpush.bf16.msrb.mxu1 %v6851_v52 }
 0x313   : > { %2144 = vmatpush.bf16.msrb.mxu2 %v6852_v3  ;;  %2157 = vmatpush.bf16.msrb.mxu3 %v6853_v60 }
 0x316   : > { %2119 = vmatpush.bf16.msrb.mxu0 %v5176_v25  ;;  %2132 = vmatpush.bf16.msrb.mxu1 %v5185_v38 }
 0x317   : > { %2145 = vmatpush.bf16.msrb.mxu2 %v6854_v40  ;;  %2158 = vmatpush.bf16.msrb.mxu3 %v6855_v61 }
 0x31a   : > { %2120 = vmatpush.bf16.msrb.mxu0 %v5188_v49  ;;  %2133 = vmatpush.bf16.msrb.mxu1 %v5197_v50 }
 0x31b   : > { %2146 = vmatpush.bf16.msrb.mxu2 %v5192_v20  ;;  %2159 = vmatpush.bf16.msrb.mxu3 %v5194_v55 }
 0x31e   : > { %2121 = vmatpush.bf16.msrb.mxu0 %v5200_v16  ;;  %2134 = vmatpush.bf16.msrb.mxu1 %v5209_v23 }
 0x31f   : > { %2147 = vmatpush.bf16.msrb.mxu2 %v5204_v33  ;;  %2160 = vmatpush.bf16.msrb.mxu3 %v6969_v4 }
 0x321   : > { %2122 = vmatmul.bf16.vlgmr.msrb.gmra.mxu0 %v1904_v62  ;;  %2135 = vmatmul.bf16.vlgmr.msrb.gmra.mxu1 %v1905_v9 }
 0x322   : > { %2228 = vmatpush.bf16.msra.mxu0 %v6970_v6  ;;  %2241 = vmatpush.bf16.msra.mxu1 %v6971_v17 }
 0x323   : > { %2148 = vmatmul.bf16.vlgmr.msrb.gmra.mxu2 %v1904_v62  ;;  %2161 = vmatmul.bf16.vlgmr.msrb.gmra.mxu3 %v1905_v9  ;;  %v6993_v62 = vld [vmem:[#allocation44_spill] sm:$0xff]  ;;  %v6995_v9 = vld [vmem:[#allocation49_spill] sm:$0xff] }
 0x324   : > { %2254 = vmatpush.bf16.msra.mxu2 %v6972_v8  ;;  %2267 = vmatpush.bf16.msra.mxu3 %v6973_v35 }
 0x326   : > { %2229 = vmatpush.bf16.msra.mxu0 %v6974_v32  ;;  %2242 = vmatpush.bf16.msra.mxu1 %v6975_v26 }
 0x328   : > { %2255 = vmatpush.bf16.msra.mxu2 %v6976_v22  ;;  %2268 = vmatpush.bf16.msra.mxu3 %v6977_v51 }
 0x32a   : > { %2230 = vmatpush.bf16.msra.mxu0 %v6978_v57  ;;  %2243 = vmatpush.bf16.msra.mxu1 %v6979_v21 }
 0x32c   : > { %2256 = vmatpush.bf16.msra.mxu2 %v6980_v39  ;;  %2269 = vmatpush.bf16.msra.mxu3 %v6981_v34 }
 0x32e   : > { %2231 = vmatpush.bf16.msra.mxu0 %v6982_v43  ;;  %2244 = vmatpush.bf16.msra.mxu1 %v6983_v29  ;;  %v4095_v29 = vld [vmem:[%s4893_s28 + $0x3] ss:$8 sm:$0x30] }
 0x32f   : > { %v4096_v43 = vld [vmem:[%s4893_s28 + $0x33] ss:$8 sm:$0xf] }
 0x330   : > { %2257 = vmatpush.bf16.msra.mxu2 %v6984_v46  ;;  %2270 = vmatpush.bf16.msra.mxu3 %v6985_v10  ;;  %v6996_v10 = vld [vmem:[#allocation47_spill] sm:$0xff] }
 0x331   : > { %v4094_v46 = vld [vmem:[%s4893_s28 + $0x3] ss:$8 sm:$0xf] }
 0x332   : > { %2232 = vmatpush.bf16.msra.mxu0 %v6986_v15  ;;  %2245 = vmatpush.bf16.msra.mxu1 %v6987_v18  ;;  %v6997_v15 = vld [vmem:[#allocation48_spill] sm:$0xff]  ;;  %v6998_v18 = vld [vmem:[#allocation50_spill] sm:$0xff]  ;;  %v5819_v39 = vor.u32 %v4095_v29, %v4094_v46 }
 0x334   : > { %2258 = vmatpush.bf16.msra.mxu2 %v6988_v59  ;;  %2271 = vmatpush.bf16.msra.mxu3 %v6989_v53  ;;  %v6999_v59 = vld [vmem:[#allocation56_spill] sm:$0xff]  ;;  %v7000_v53 = vld [vmem:[#allocation53_spill] sm:$0xff] }
 0x336   : > { %2233 = vmatpush.bf16.msra.mxu0 %v6990_v30  ;;  %2246 = vmatpush.bf16.msra.mxu1 %v6991_v54  ;;  %v7001_v30 = vld [vmem:[#allocation57_spill] sm:$0xff]  ;;  %v7002_v54 = vld [vmem:[#allocation51_spill] sm:$0xff] }
 0x338   : > { %2259 = vmatpush.bf16.msra.mxu2 %v6992_v13  ;;  %2272 = vmatpush.bf16.msra.mxu3 %v6993_v62  ;;  %v7003_v13 = vld [vmem:[#allocation52_spill] sm:$0xff]  ;;  %v7004_v62 = vld [vmem:[#allocation54_spill] sm:$0xff] }
 0x33a   : > { %2234 = vmatpush.bf16.msra.mxu0 %v6994_v45  ;;  %2247 = vmatpush.bf16.msra.mxu1 %v6995_v9  ;;  %v7005_v45 = vld [vmem:[#allocation55_spill] sm:$0xff] }
 0x33b   : > { %v7006_v9 = vld [vmem:[#allocation59_spill] sm:$0xff] }
 0x33c   : > { %2260 = vmatpush.bf16.msra.mxu2 %v6996_v10  ;;  %2273 = vmatpush.bf16.msra.mxu3 %v6997_v15  ;;  %v7007_v10 = vld [vmem:[#allocation62_spill] sm:$0xff]  ;;  %v7008_v15 = vld [vmem:[#allocation60_spill] sm:$0xff] }
 0x33e   : > { %2235 = vmatpush.bf16.msra.mxu0 %v6998_v18  ;;  %2248 = vmatpush.bf16.msra.mxu1 %v6999_v59  ;;  %v7009_v18 = vld [vmem:[#allocation61_spill] sm:$0xff]  ;;  %v7010_v59 = vld [vmem:[#allocation63_spill] sm:$0xff] }
 0x340   : > { %2261 = vmatpush.bf16.msra.mxu2 %v7002_v54  ;;  %2274 = vmatpush.bf16.msra.mxu3 %v7003_v13  ;;  %v7013_v54 = vld [vmem:[#allocation65_spill] sm:$0xff]  ;;  %v7014_v13 = vld [vmem:[#allocation67_spill] sm:$0xff] }
 0x342   : > { %2280 = vmatpush.bf16.msrb.mxu0 %v7000_v53  ;;  %2293 = vmatpush.bf16.msrb.mxu1 %v7001_v30  ;;  %v7011_v53 = vld [vmem:[#allocation66_spill] sm:$0xff]  ;;  %v7012_v30 = vld [vmem:[#allocation64_spill] sm:$0xff] }
 0x344   : > { %2306 = vmatpush.bf16.msrb.mxu2 %v7004_v62  ;;  %2319 = vmatpush.bf16.msrb.mxu3 %v7005_v45  ;;  %v7015_v62 = vld [vmem:[#allocation70_spill] sm:$0xff]  ;;  %v7016_v45 = vld [vmem:[#allocation68_spill] sm:$0xff] }
 0x346   : > { %2281 = vmatpush.bf16.msrb.mxu0 %v7006_v9  ;;  %2294 = vmatpush.bf16.msrb.mxu1 %v7007_v10  ;;  %v7017_v9 = vld [vmem:[#allocation69_spill] sm:$0xff]  ;;  %v7018_v10 = vld [vmem:[#allocation71_spill] sm:$0xff] }
 0x348   : > { %2307 = vmatpush.bf16.msrb.mxu2 %v7008_v15  ;;  %2320 = vmatpush.bf16.msrb.mxu3 %v7009_v18  ;;  %v7019_v15 = vld [vmem:[#allocation74_spill] sm:$0xff]  ;;  %v7020_v18 = vld [vmem:[#allocation72_spill] sm:$0xff] }
 0x34a   : > { %2282 = vmatpush.bf16.msrb.mxu0 %v7010_v59  ;;  %2295 = vmatpush.bf16.msrb.mxu1 %v7011_v53  ;;  %v7021_v59 = vld [vmem:[#allocation73_spill] sm:$0xff]  ;;  %v7022_v53 = vld [vmem:[#allocation75_spill] sm:$0xff] }
 0x34c   : > { %2308 = vmatpush.bf16.msrb.mxu2 %v7012_v30  ;;  %2321 = vmatpush.bf16.msrb.mxu3 %v7013_v54  ;;  %v7023_v54 = vld [vmem:[#allocation78_spill] sm:$0xff] }
 0x34e   : > { %2283 = vmatpush.bf16.msrb.mxu0 %v7014_v13  ;;  %2296 = vmatpush.bf16.msrb.mxu1 %v7015_v62  ;;  %v7024_v13 = vld [vmem:[#allocation76_spill] sm:$0xff]  ;;  %v7025_v62 = vld [vmem:[#allocation77_spill] sm:$0xff] }
 0x350   : > { %2309 = vmatpush.bf16.msrb.mxu2 %v7016_v45  ;;  %2322 = vmatpush.bf16.msrb.mxu3 %v7017_v9  ;;  %v7026_v9 = vld [vmem:[#allocation79_spill] sm:$0xff]  ;;  %v7032_v45 = vld [vmem:[#allocation84_spill] sm:$0xff] }
 0x352   : > { %2284 = vmatpush.bf16.msrb.mxu0 %v7018_v10  ;;  %2297 = vmatpush.bf16.msrb.mxu1 %v7019_v15  ;;  %v7027_v10 = vld [vmem:[#allocation82_spill] sm:$0xff]  ;;  %v7028_v15 = vld [vmem:[#allocation80_spill] sm:$0xff] }
 0x354   : > { %2310 = vmatpush.bf16.msrb.mxu2 %v7020_v18  ;;  %2323 = vmatpush.bf16.msrb.mxu3 %v7021_v59  ;;  %v7029_v18 = vld [vmem:[#allocation81_spill] sm:$0xff]  ;;  %v7030_v59 = vld [vmem:[#allocation83_spill] sm:$0xff] }
 0x356   : > { %2285 = vmatpush.bf16.msrb.mxu0 %v7022_v53  ;;  %2298 = vmatpush.bf16.msrb.mxu1 %v7023_v54  ;;  %v7031_v53 = vld [vmem:[#allocation89_spill] sm:$0xff] }
 0x357   : > { %v7033_v54 = vld [vmem:[#allocation85_spill] sm:$0xff] }
 0x358   : > { %2311 = vmatpush.bf16.msrb.mxu2 %v7024_v13  ;;  %2324 = vmatpush.bf16.msrb.mxu3 %v7025_v62 }
 0x35a   : > { %2286 = vmatpush.bf16.msrb.mxu0 %v7026_v9  ;;  %2299 = vmatpush.bf16.msrb.mxu1 %v7027_v10  ;;  %v4097_v10 = vld [vmem:[%s4893_s28 + $0x33] ss:$8 sm:$0x30] }
 0x35c   : > { %2312 = vmatpush.bf16.msrb.mxu2 %v7028_v15  ;;  %2325 = vmatpush.bf16.msrb.mxu3 %v7029_v18 }
 0x35e   : > { %2287 = vmatpush.bf16.msrb.mxu0 %v7030_v59  ;;  %2300 = vmatpush.bf16.msrb.mxu1 %v7031_v53  ;;  %v5821_v53 = vor.u32 %v4097_v10, %v4096_v43 }
 0x360   : > { %2313 = vmatpush.bf16.msrb.mxu2 %v7032_v45  ;;  %2326 = vmatpush.bf16.msrb.mxu3 %v7033_v54 }
 0x37d   : > { %v1917_v13 = vpop.f32.mrf.mxu0 }
 0x37e   : > { %v1930_v30 = vpop.f32.mrf.mxu1 }
 0x37f   : > { %v1931_v59 = vadd.f32 %v1930_v30, %v1917_v13 }
 0x383   : > { %v1943_v62 = vpop.f32.mrf.mxu2 }
 0x384   : > { %v1956_v9 = vpop.f32.mrf.mxu3 }
 0x385   : > { %v1957_v34 = vadd.f32 %v1956_v9, %v1943_v62  ;;  %v1919_v15 = vpop.f32.mrf.mxu0 }
 0x386   : > { %v1932_v18 = vpop.f32.mrf.mxu1 }
 0x387   : > { %v2014_v21 = vrot.slane %v1957_v34, 7 }
 0x389   : > { %v2015_v45 = vsel %vm865_vm0, %v1931_v59, %v2014_v21  ;;  %v2016_v54 = vsel %vm867_vm1, %v1931_v59, %v2014_v21  ;;  %v2062_v59 = vrot.slane %v5819_v39, 2 }
 0x38a   : > { %v2017_v57 = vrot.slane %v2016_v54, 1  ;;  %v2020_v51 = vadd.f32 %v2015_v45, %v5819_v39 }
 0x38b   : > { %v1945_v22 = vpop.f32.mrf.mxu2 }
 0x38c   : > { %v2021_v26 = vadd.f32 %v2017_v57, %v5821_v53  ;;  %v4098_v32 = vmul.f32 -1.442695, %v2020_v51  ;;  %v1958_v62 = vpop.f32.mrf.mxu3 }
 0x38d   : > { %v1969_v15 = vpop.f32.mrf.mxu0 }
 0x38e   : > { %4396 = vpow2.f32 %v4098_v32  ;;  %v4099_v29 = vmul.f32 -1.442695, %v2021_v26  ;;  %v1982_v46 = vpop.f32.mrf.mxu1  ;;  %v2063_v32 = vrot.slane %v5821_v53, 2 }
 0x38f   : > { %v1983_v51 = vadd.f32 %v1982_v46, %v1969_v15 }
 0x390   : > { %4398 = vpow2.f32 %v4099_v29 }
 0x393   : > { %v1995_v34 = vpop.f32.mrf.mxu2 }
 0x394   : > { %v4397_v43 = vpop.eup %4396  ;;  %v2008_v10 = vpop.f32.mrf.mxu3 }
 0x395   : > { %v2028_v18 = vadd.f32 1.0, %v4397_v43  ;;  %v2009_v30 = vadd.f32 %v2008_v10, %v1995_v34  ;;  %v1971_v13 = vpop.f32.mrf.mxu0 }
 0x396   : > { %v4399_v21 = vpop.eup %4398  ;;  %v1984_v54 = vpop.f32.mrf.mxu1 }
 0x397   : > { %v5828_v22 = vadd.f32 1.0, %v4399_v21  ;;  %4400 = vrcp.f32 %v2028_v18  ;;  %v2068_v57 = vrot.slane %v2009_v30, 7  ;;  %vm2035_vm4 = vweird.f32 %v2028_v18 }
 0x399   : > { %4402 = vrcp.f32 %v5828_v22  ;;  %v2069_v26 = vsel %vm865_vm0, %v1983_v51, %v2068_v57  ;;  %v2070_v45 = vsel %vm867_vm1, %v1983_v51, %v2068_v57  ;;  %vm2050_vm3 = vweird.f32 %v5828_v22 }
 0x39a   : > { %v2071_v9 = vrot.slane %v2070_v45, 1  ;;  %v2074_v62 = vadd.f32 %v2069_v26, %v2062_v59 }
 0x39b   : > { %v1997_v29 = vpop.f32.mrf.mxu2 }
 0x39c   : > { %v2075_v34 = vadd.f32 %v2071_v9, %v2063_v32  ;;  %v4100_v43 = vmul.f32 -1.442695, %v2074_v62  ;;  %v2010_v10 = vpop.f32.mrf.mxu3  ;;  %v7034_v62 = vld [vmem:[#allocation110_spill] sm:$0xff] }
 0x39d   : > { %v4401_v13 = vpop.eup %4400  ;;  %v2039_v10 = vand.u32 2147483647, %v2028_v18 }
 0x39e   : > { %4404 = vpow2.f32 %v4100_v43  ;;  %v4101_v21 = vmul.f32 -1.442695, %v2075_v34  ;;  %v2123_v54 = vpop.f32.mrf.mxu0  ;;  %v2136_v15 = vpop.f32.mrf.mxu1  ;;  %v2031_v46 = vmul.f32 %v4401_v13, %v2028_v18  ;;  %vm2036_vm14 = vweird.f32 %v4401_v13  ;;  %v7035_v34 = vld [vmem:[#allocation111_spill] sm:$0xff] }
 0x39f   : > { %v4403_v30 = vpop.eup %4402  ;;  %v2124_v29 = vadd.f32 %v2123_v54, %v7034_v62  ;;  %vm2037_vm2 = vmor %vm2035_vm4, %vm2036_vm14  ;;  %v2054_v54 = vand.u32 2147483647, %v5828_v22  ;;  %vm2040_vm6 = vcmp.eq.f32.partialorder %v2039_v10, 8.507059e+37 }
 0x3a0   : > { %4406 = vpow2.f32 %v4101_v21  ;;  %v2032_v35 = vsub.f32 1.0, %v2031_v46  ;;  %v2046_v8 = vmul.f32 %v4403_v30, %v5828_v22  ;;  %v2041_v21 = vand.u32 2147483648, %v2028_v18 }
 0x3a1   : > { %vm2051_vm15 = vweird.f32 %v4403_v30  ;;  %vm2055_vm7 = vcmp.eq.f32.partialorder %v2054_v54, 8.507059e+37 }
 0x3a2   : > { %v2033_v17 = vmul.f32 %v4401_v13, %v2032_v35  ;;  %v2047_v6 = vsub.f32 1.0, %v2046_v8  ;;  %vm5843_vm5 = vmor %vm2050_vm3, %vm2051_vm15  ;;  %vm3488_vm15 = vcmask 1042432  }
 0x3a4   : > { %v4405_v51 = vpop.eup %4404  ;;  %v2048_v57 = vmul.f32 %v4403_v30, %v2047_v6  ;;  %v2034_v26 = vadd.f32 %v4401_v13, %v2033_v17  ;;  %v2056_v17 = vand.u32 2147483648, %v5828_v22 }
 0x3a5   : > { %v5835_v59 = vadd.f32 1.0, %v4405_v51 }
 0x3a6   : > { %v2149_v32 = vpop.f32.mrf.mxu2  ;;  %v2162_v45 = vpop.f32.mrf.mxu3  ;;  %v2049_v6 = vadd.f32 %v4403_v30, %v2048_v57  ;;  %v2038_v51 = vsel %vm2037_vm2, %v4401_v13, %v2034_v26 }
 0x3a7   : > { %v4407_v9 = vpop.eup %4406  ;;  %v2150_v43 = vadd.f32 %v2149_v32, %v7035_v34  ;;  %v2125_v46 = vpop.f32.mrf.mxu0  ;;  %4408 = vrcp.f32 %v5835_v59  ;;  %v2137_v32 = vadd.f32 %v2136_v15, %v2124_v29  ;;  %v2042_v34 = vor.u32 1.1754944e-38, %v2041_v21 }
 0x3a8   : > { %v2138_v4 = vpop.f32.mrf.mxu1  ;;  %v2083_v35 = vadd.f32 1.0, %v4407_v9  ;;  %v2053_v57 = vsel %vm5843_vm5, %v4403_v30, %v2049_v6  ;;  %v2176_v9 = vrot.slane %v5819_v39, 4  ;;  %v2177_v21 = vrot.slane %v5821_v53, 4 }
 0x3a9   : > { %v2163_v8 = vadd.f32 %v2162_v45, %v2150_v43  ;;  %v2043_v45 = vsel %vm2040_vm6, %v2042_v34, %v2038_v51  ;;  %v2057_v43 = vor.u32 1.1754944e-38, %v2056_v17  ;;  %v2095_v51 = vand.u32 2147483648, %v5835_v59 }
 0x3aa   : > { %4410 = vrcp.f32 %v2083_v35  ;;  %vm2089_vm9 = vweird.f32 %v5835_v59  ;;  %v2110_v53 = vand.u32 2147483648, %v2083_v35  ;;  %vm2104_vm12 = vweird.f32 %v2083_v35 }
 0x3ab   : > { %v2168_v4 = vrot.slane %v2163_v8, 7  ;;  %v2058_v18 = vsel %vm2055_vm7, %v2057_v43, %v2053_v57  ;;  %v2108_v43 = vand.u32 2147483647, %v2083_v35 }
 0x3ad   : > { %v2169_v13 = vsel %vm865_vm0, %v2137_v32, %v2168_v4  ;;  %v2170_v26 = vsel %vm867_vm1, %v2137_v32, %v2168_v4  ;;  %v4409_v22 = vpop.eup %4408  ;;  %v2093_v4 = vand.u32 2147483647, %v5835_v59  ;;  %vm2109_vm14 = vcmp.eq.f32.partialorder %v2108_v43, 8.507059e+37 }
 0x3ae   : > { %v2171_v15 = vrot.slane %v2170_v26, 1  ;;  %v2174_v29 = vmul.f32 %v2169_v13, %v2043_v45  ;;  %v2151_v46 = vpop.f32.mrf.mxu2  ;;  %v2164_v8 = vpop.f32.mrf.mxu3  ;;  %v2085_v10 = vmul.f32 %v4409_v22, %v5835_v59  ;;  %vm2090_vm8 = vweird.f32 %v4409_v22 }
 0x3af   : > { %vm2091_vm11 = vmor %vm2089_vm9, %vm2090_vm8  ;;  %vm2094_vm13 = vcmp.eq.f32.partialorder %v2093_v4, 8.507059e+37 }
 0x3b0   : > { %v4411_v30 = vpop.eup %4410  ;;  %v2175_v6 = vmul.f32 %v2171_v15, %v2058_v18  ;;  %v2180_v39 = vadd.f32 %v2176_v9, %v2174_v29  ;;  %v2086_v34 = vsub.f32 1.0, %v2085_v10  ;;  %v2096_v9 = vor.u32 1.1754944e-38, %v2095_v51 }
 0x3b1   : > { %v2100_v17 = vmul.f32 %v4411_v30, %v2083_v35  ;;  %vm2105_vm10 = vweird.f32 %v4411_v30  ;;  %v2111_v29 = vor.u32 1.1754944e-38, %v2110_v53 }
 0x3b2   : > { %v2181_v62 = vadd.f32 %v2177_v21, %v2175_v6  ;;  %4412 = vtanh.f32 %v2180_v39  ;;  %v2087_v32 = vmul.f32 %v4409_v22, %v2086_v34  ;;  %vm2106_vm4 = vmor %vm2104_vm12, %vm2105_vm10 }
 0x3b3   : > { %v2101_v54 = vsub.f32 1.0, %v2100_v17 }
 0x3b4   : > { %4414 = vtanh.f32 %v2181_v62  ;;  %v2088_v57 = vadd.f32 %v4409_v22, %v2087_v32 }
 0x3b5   : > { %v2102_v45 = vmul.f32 %v4411_v30, %v2101_v54 }
 0x3b6   : > { %v2092_v13 = vsel %vm2091_vm11, %v4409_v22, %v2088_v57 }
 0x3b7   : > { %v2103_v26 = vadd.f32 %v4411_v30, %v2102_v45  ;;  %v2097_v21 = vsel %vm2094_vm13, %v2096_v9, %v2092_v13 }
 0x3b8   : > { %v4413_v15 = vpop.eup %4412 }
 0x3b9   : > { %v2107_v46 = vsel %vm2106_vm4, %v4411_v30, %v2103_v26  ;;  %v2184_v59 = vsub.f32 %v5685_v7, %v4413_v15 }
 0x3ba   : > { %v4415_v8 = vpop.eup %4414  ;;  %v2112_v62 = vsel %vm2109_vm14, %v2111_v29, %v2107_v46  ;;  %v7040_v46 = vld [vmem:[#allocation25_spill] sm:$0xff] }
 0x3bb   : > { %v2185_v10 = vsub.f32 %v5687_v58, %v4415_v8  ;;  %v2186_v18 = vmul.f32 %v2184_v59, %v2097_v21  ;;  %v7041_v59 = vld [vmem:[#allocation23_spill] sm:$0xff] }
 0x3bd   : > { %v2187_v6 = vmul.f32 %v2185_v10, %v2112_v62  ;;  %v5859_v39 = vadd.f32 %v4413_v15, %v2186_v18  ;;  %v7043_v62 = vld [vmem:[#allocation26_spill] sm:$0xff]  ;;  %v7044_v10 = vld [vmem:[#allocation29_spill] sm:$0xff]  ;;  %v7045_v18 = vld [vmem:[#allocation27_spill] sm:$0xff] }
 0x3bf   : > { %v5861_v35 = vadd.f32 %v4415_v8, %v2187_v6  ;;  %v2200_v22 = vperm.slane %v5859_v39, 0  ;;  %v2201_v34 = vperm.slane %v5859_v39, 1  ;;  %v7042_v8 = vld [vmem:[#allocation24_spill] sm:$0xff] }
 0x3c0   : > { %v7046_v6 = vld [vmem:[#allocation28_spill] sm:$0xff] }
 0x3c1   : > { %v2202_v30 = vperm.slane %v5861_v35, 0  ;;  %v2203_v17 = vperm.slane %v5861_v35, 1  ;;  %v5868_v7 = vsel %vm3488_vm15, %v5706_v63, %v2200_v22  ;;  %v5871_v58 = vsel %vm3488_vm15, %v5709_v0, %v2201_v34 }
 0x3c2   : > { %v2208_v51 = vpack.c.bf16 %v2200_v22, %v2200_v22  ;;  %v2209_v53 = vpack.c.bf16 %v2201_v34, %v2201_v34  ;;  %v7047_v22 = vld [vmem:[#allocation30_spill] sm:$0xff]  ;;  %v7048_v34 = vld [vmem:[#allocation33_spill] sm:$0xff] }
 0x3c3   : > { %v5874_v32 = vsel %vm3488_vm15, %v5712_v47, %v2202_v30  ;;  %v5877_v54 = vsel %vm3488_vm15, %v5715_v2, %v2203_v17  ;;  %v2210_v4 = vpack.c.bf16 %v2202_v30, %v2202_v30  ;;  %v2211_v45 = vpack.c.bf16 %v2203_v17, %v2203_v17  ;;  %v7038_v47 = vld [vmem:[#allocation109_spill] sm:$0xff]  ;;  %v7039_v2 = vld [vmem:[#allocation22_spill] sm:$0xff]  ;;  %v7049_v30 = vld [vmem:[#allocation31_spill] sm:$0xff] }
 0x3c4   : > { %v2216_v9 = vunpack.c.l.b16 %v2208_v51  ;;  %v2217_v26 = vunpack.c.l.b16 %v2209_v53  ;;  %v7050_v17 = vld [vmem:[#allocation32_spill] sm:$0xff]  ;;  %v7051_v51 = vld [vmem:[#allocation34_spill] sm:$0xff]  ;;  %v7053_v53 = vld [vmem:[#allocation35_spill] sm:$0xff] }
 0x3c5   : > { %v2218_v57 = vunpack.c.l.b16 %v2210_v4  ;;  %v2219_v43 = vunpack.c.l.b16 %v2211_v45  ;;  %v7052_v4 = vld [vmem:[#allocation37_spill] sm:$0xff]  ;;  %v7054_v45 = vld [vmem:[#allocation36_spill] sm:$0xff] }
 0x3c7   : > { %v2220_v13 = vrot.slane %v2218_v57, 7  ;;  %v2222_v63 = vrot.slane %v2219_v43, 7  ;;  %v7055_v57 = vld [vmem:[#allocation38_spill] sm:$0xff]  ;;  %v7056_v43 = vld [vmem:[#allocation41_spill] sm:$0xff] }
 0x3c9   : > { %v2221_v15 = vsel %vm867_vm1, %v2220_v13, %v2216_v9  ;;  %v2223_v29 = vsel %vm867_vm1, %v2222_v63, %v2217_v26  ;;  %v7057_v9 = vld [vmem:[#allocation39_spill] sm:$0xff]  ;;  %v7058_v13 = vld [vmem:[#allocation40_spill] sm:$0xff]  ;;  %v7059_v26 = vld [vmem:[#allocation42_spill] sm:$0xff] }
 0x3ca   : > { %v2224_v0 = vpack.c.b16 %v2221_v15, %v2221_v15  ;;  %v2225_v21 = vpack.c.b16 %v2223_v29, %v2223_v29  ;;  %v7060_v63 = vld [vmem:[#allocation45_spill] sm:$0xff]  ;;  %v7061_v15 = vld [vmem:[#allocation43_spill] sm:$0xff]  ;;  %v7063_v29 = vld [vmem:[#allocation46_spill] sm:$0xff] }
 0x3cc   : > { %2236 = vmatmul.bf16.vlgmr.msra.gmra.mxu0 %v2224_v0  ;;  %2262 = vmatmul.bf16.vlgmr.msra.gmra.mxu2 %v2224_v0 }
 0x3cd   : > { %2249 = vmatmul.bf16.vlgmr.msra.gmra.mxu1 %v2225_v21  ;;  %2275 = vmatmul.bf16.vlgmr.msra.gmra.mxu3 %v2225_v21 }
 0x3ce   : > { %2434 = vmatpush.bf16.msra.mxu0 %v6834_v41  ;;  %2447 = vmatpush.bf16.msra.mxu1 %v6835_v28 }
 0x3cf   : > { %2460 = vmatpush.bf16.msra.mxu2 %v6836_v11  ;;  %2473 = vmatpush.bf16.msra.mxu3 %v6837_v56 }
 0x3d2   : > { %2435 = vmatpush.bf16.msra.mxu0 %v6838_v19  ;;  %2448 = vmatpush.bf16.msra.mxu1 %v6839_v44 }
 0x3d3   : > { %2461 = vmatpush.bf16.msra.mxu2 %v6840_v14  ;;  %2474 = vmatpush.bf16.msra.mxu3 %v6841_v36 }
 0x3d6   : > { %2436 = vmatpush.bf16.msra.mxu0 %v6842_v1  ;;  %2449 = vmatpush.bf16.msra.mxu1 %v6843_v42 }
 0x3d7   : > { %2462 = vmatpush.bf16.msra.mxu2 %v6844_v48  ;;  %2475 = vmatpush.bf16.msra.mxu3 %v6845_v12 }
 0x3da   : > { %2437 = vmatpush.bf16.msra.mxu0 %v6846_v24  ;;  %2450 = vmatpush.bf16.msra.mxu1 %v6847_v31 }
 0x3db   : > { %2463 = vmatpush.bf16.msra.mxu2 %v6848_v5  ;;  %2476 = vmatpush.bf16.msra.mxu3 %v6849_v37 }
 0x3dc   : > { %2288 = vmatmul.bf16.vlgmr.msrb.gmra.mxu0 %v2224_v0  ;;  %2314 = vmatmul.bf16.vlgmr.msrb.gmra.mxu2 %v2224_v0 }
 0x3dd   : > { %2301 = vmatmul.bf16.vlgmr.msrb.gmra.mxu1 %v2225_v21  ;;  %2327 = vmatmul.bf16.vlgmr.msrb.gmra.mxu3 %v2225_v21 }
 0x3de   : > { %2438 = vmatpush.bf16.msra.mxu0 %v6850_v27  ;;  %2451 = vmatpush.bf16.msra.mxu1 %v6851_v52 }
 0x3df   : > { %2464 = vmatpush.bf16.msra.mxu2 %v6852_v3  ;;  %2477 = vmatpush.bf16.msra.mxu3 %v6853_v60 }
 0x3e2   : > { %2439 = vmatpush.bf16.msra.mxu0 %v5176_v25  ;;  %2452 = vmatpush.bf16.msra.mxu1 %v5185_v38 }
 0x3e3   : > { %2465 = vmatpush.bf16.msra.mxu2 %v6854_v40  ;;  %2478 = vmatpush.bf16.msra.mxu3 %v6855_v61 }
 0x3e6   : > { %2440 = vmatpush.bf16.msra.mxu0 %v5188_v49  ;;  %2453 = vmatpush.bf16.msra.mxu1 %v5197_v50 }
 0x3e7   : > { %2466 = vmatpush.bf16.msra.mxu2 %v5192_v20  ;;  %2479 = vmatpush.bf16.msra.mxu3 %v5194_v55 }
 0x3ea   : > { %2441 = vmatpush.bf16.msra.mxu0 %v5200_v16  ;;  %2454 = vmatpush.bf16.msra.mxu1 %v5209_v23 }
 0x3eb   : > { %2467 = vmatpush.bf16.msra.mxu2 %v5204_v33  ;;  %2480 = vmatpush.bf16.msra.mxu3 %v7038_v47 }
 0x3ed   : > { %2442 = vmatmul.bf16.vlgmr.msra.gmra.mxu0 %v2224_v0  ;;  %2455 = vmatmul.bf16.vlgmr.msra.gmra.mxu1 %v2225_v21 }
 0x3ee   : > { %2548 = vmatpush.bf16.msrb.mxu0 %v7039_v2  ;;  %2561 = vmatpush.bf16.msrb.mxu1 %v7040_v46 }
 0x3ef   : > { %2468 = vmatmul.bf16.vlgmr.msra.gmra.mxu2 %v2224_v0  ;;  %2481 = vmatmul.bf16.vlgmr.msra.gmra.mxu3 %v2225_v21  ;;  %v7062_v0 = vld [vmem:[#allocation44_spill] sm:$0xff]  ;;  %v7064_v21 = vld [vmem:[#allocation49_spill] sm:$0xff] }
 0x3f0   : > { %2574 = vmatpush.bf16.msrb.mxu2 %v7041_v59  ;;  %2587 = vmatpush.bf16.msrb.mxu3 %v7042_v8 }
 0x3f2   : > { %2549 = vmatpush.bf16.msrb.mxu0 %v7043_v62  ;;  %2562 = vmatpush.bf16.msrb.mxu1 %v7044_v10 }
 0x3f4   : > { %2575 = vmatpush.bf16.msrb.mxu2 %v7045_v18  ;;  %2588 = vmatpush.bf16.msrb.mxu3 %v7046_v6 }
 0x3f6   : > { %2550 = vmatpush.bf16.msrb.mxu0 %v7047_v22  ;;  %2563 = vmatpush.bf16.msrb.mxu1 %v7048_v34 }
 0x3f8   : > { %2576 = vmatpush.bf16.msrb.mxu2 %v7049_v30  ;;  %2589 = vmatpush.bf16.msrb.mxu3 %v7050_v17 }
 0x3fa   : > { %2551 = vmatpush.bf16.msrb.mxu0 %v7051_v51  ;;  %2564 = vmatpush.bf16.msrb.mxu1 %v7052_v4  ;;  %v4103_v4 = vld [vmem:[%s4893_s28 + $0x4] ss:$8 sm:$0x30] }
 0x3fb   : > { %v4104_v51 = vld [vmem:[%s4893_s28 + $0x34] ss:$8 sm:$0xf] }
 0x3fc   : > { %2577 = vmatpush.bf16.msrb.mxu2 %v7053_v53  ;;  %2590 = vmatpush.bf16.msrb.mxu3 %v7054_v45  ;;  %v7065_v45 = vld [vmem:[#allocation47_spill] sm:$0xff] }
 0x3fd   : > { %v4102_v53 = vld [vmem:[%s4893_s28 + $0x4] ss:$8 sm:$0xf] }
 0x3fe   : > { %2552 = vmatpush.bf16.msrb.mxu0 %v7055_v57  ;;  %2565 = vmatpush.bf16.msrb.mxu1 %v7056_v43  ;;  %v7066_v57 = vld [vmem:[#allocation48_spill] sm:$0xff]  ;;  %v7067_v43 = vld [vmem:[#allocation50_spill] sm:$0xff]  ;;  %v5981_v30 = vor.u32 %v4103_v4, %v4102_v53 }
 0x400   : > { %2578 = vmatpush.bf16.msrb.mxu2 %v7057_v9  ;;  %2591 = vmatpush.bf16.msrb.mxu3 %v7058_v13  ;;  %v7068_v9 = vld [vmem:[#allocation56_spill] sm:$0xff]  ;;  %v7069_v13 = vld [vmem:[#allocation53_spill] sm:$0xff] }
 0x402   : > { %2553 = vmatpush.bf16.msrb.mxu0 %v7059_v26  ;;  %2566 = vmatpush.bf16.msrb.mxu1 %v7060_v63  ;;  %v7070_v26 = vld [vmem:[#allocation57_spill] sm:$0xff]  ;;  %v7071_v63 = vld [vmem:[#allocation51_spill] sm:$0xff] }
 0x404   : > { %2579 = vmatpush.bf16.msrb.mxu2 %v7061_v15  ;;  %2592 = vmatpush.bf16.msrb.mxu3 %v7062_v0  ;;  %v7072_v15 = vld [vmem:[#allocation52_spill] sm:$0xff]  ;;  %v7073_v0 = vld [vmem:[#allocation54_spill] sm:$0xff] }
 0x406   : > { %2554 = vmatpush.bf16.msrb.mxu0 %v7063_v29  ;;  %2567 = vmatpush.bf16.msrb.mxu1 %v7064_v21  ;;  %v7074_v29 = vld [vmem:[#allocation55_spill] sm:$0xff] }
 0x407   : > { %v7075_v21 = vld [vmem:[#allocation59_spill] sm:$0xff] }
 0x408   : > { %2580 = vmatpush.bf16.msrb.mxu2 %v7065_v45  ;;  %2593 = vmatpush.bf16.msrb.mxu3 %v7066_v57  ;;  %v7076_v45 = vld [vmem:[#allocation62_spill] sm:$0xff]  ;;  %v7077_v57 = vld [vmem:[#allocation60_spill] sm:$0xff] }
 0x40a   : > { %2555 = vmatpush.bf16.msrb.mxu0 %v7067_v43  ;;  %2568 = vmatpush.bf16.msrb.mxu1 %v7068_v9  ;;  %v7078_v43 = vld [vmem:[#allocation61_spill] sm:$0xff]  ;;  %v7079_v9 = vld [vmem:[#allocation63_spill] sm:$0xff] }
 0x40c   : > { %2581 = vmatpush.bf16.msrb.mxu2 %v7071_v63  ;;  %2594 = vmatpush.bf16.msrb.mxu3 %v7072_v15  ;;  %v7082_v63 = vld [vmem:[#allocation65_spill] sm:$0xff]  ;;  %v7083_v15 = vld [vmem:[#allocation67_spill] sm:$0xff] }
 0x40e   : > { %2600 = vmatpush.bf16.msra.mxu0 %v7069_v13  ;;  %2613 = vmatpush.bf16.msra.mxu1 %v7070_v26  ;;  %v7080_v13 = vld [vmem:[#allocation66_spill] sm:$0xff]  ;;  %v7081_v26 = vld [vmem:[#allocation64_spill] sm:$0xff] }
 0x410   : > { %2626 = vmatpush.bf16.msra.mxu2 %v7073_v0  ;;  %2639 = vmatpush.bf16.msra.mxu3 %v7074_v29  ;;  %v7084_v0 = vld [vmem:[#allocation70_spill] sm:$0xff]  ;;  %v7085_v29 = vld [vmem:[#allocation68_spill] sm:$0xff] }
 0x412   : > { %2601 = vmatpush.bf16.msra.mxu0 %v7075_v21  ;;  %2614 = vmatpush.bf16.msra.mxu1 %v7076_v45  ;;  %v7086_v21 = vld [vmem:[#allocation69_spill] sm:$0xff]  ;;  %v7087_v45 = vld [vmem:[#allocation71_spill] sm:$0xff] }
 0x414   : > { %2627 = vmatpush.bf16.msra.mxu2 %v7077_v57  ;;  %2640 = vmatpush.bf16.msra.mxu3 %v7078_v43  ;;  %v7088_v57 = vld [vmem:[#allocation74_spill] sm:$0xff]  ;;  %v7089_v43 = vld [vmem:[#allocation72_spill] sm:$0xff] }
 0x416   : > { %2602 = vmatpush.bf16.msra.mxu0 %v7079_v9  ;;  %2615 = vmatpush.bf16.msra.mxu1 %v7080_v13  ;;  %v7090_v9 = vld [vmem:[#allocation73_spill] sm:$0xff]  ;;  %v7091_v13 = vld [vmem:[#allocation75_spill] sm:$0xff] }
 0x418   : > { %2628 = vmatpush.bf16.msra.mxu2 %v7081_v26  ;;  %2641 = vmatpush.bf16.msra.mxu3 %v7082_v63  ;;  %v7092_v63 = vld [vmem:[#allocation78_spill] sm:$0xff] }
 0x41a   : > { %2603 = vmatpush.bf16.msra.mxu0 %v7083_v15  ;;  %2616 = vmatpush.bf16.msra.mxu1 %v7084_v0  ;;  %v7093_v15 = vld [vmem:[#allocation76_spill] sm:$0xff]  ;;  %v7094_v0 = vld [vmem:[#allocation77_spill] sm:$0xff] }
 0x41c   : > { %2629 = vmatpush.bf16.msra.mxu2 %v7085_v29  ;;  %2642 = vmatpush.bf16.msra.mxu3 %v7086_v21  ;;  %v7095_v21 = vld [vmem:[#allocation79_spill] sm:$0xff]  ;;  %v7101_v29 = vld [vmem:[#allocation84_spill] sm:$0xff] }
 0x41e   : > { %2604 = vmatpush.bf16.msra.mxu0 %v7087_v45  ;;  %2617 = vmatpush.bf16.msra.mxu1 %v7088_v57  ;;  %v7096_v45 = vld [vmem:[#allocation82_spill] sm:$0xff]  ;;  %v7097_v57 = vld [vmem:[#allocation80_spill] sm:$0xff] }
 0x420   : > { %2630 = vmatpush.bf16.msra.mxu2 %v7089_v43  ;;  %2643 = vmatpush.bf16.msra.mxu3 %v7090_v9  ;;  %v7098_v43 = vld [vmem:[#allocation81_spill] sm:$0xff]  ;;  %v7099_v9 = vld [vmem:[#allocation83_spill] sm:$0xff] }
 0x422   : > { %2605 = vmatpush.bf16.msra.mxu0 %v7091_v13  ;;  %2618 = vmatpush.bf16.msra.mxu1 %v7092_v63  ;;  %v7100_v13 = vld [vmem:[#allocation89_spill] sm:$0xff] }
 0x423   : > { %v7102_v63 = vld [vmem:[#allocation85_spill] sm:$0xff] }
 0x424   : > { %2631 = vmatpush.bf16.msra.mxu2 %v7093_v15  ;;  %2644 = vmatpush.bf16.msra.mxu3 %v7094_v0 }
 0x426   : > { %2606 = vmatpush.bf16.msra.mxu0 %v7095_v21  ;;  %2619 = vmatpush.bf16.msra.mxu1 %v7096_v45  ;;  %v4105_v45 = vld [vmem:[%s4893_s28 + $0x34] ss:$8 sm:$0x30] }
 0x428   : > { %2632 = vmatpush.bf16.msra.mxu2 %v7097_v57  ;;  %2645 = vmatpush.bf16.msra.mxu3 %v7098_v43 }
 0x42a   : > { %2607 = vmatpush.bf16.msra.mxu0 %v7099_v9  ;;  %2620 = vmatpush.bf16.msra.mxu1 %v7100_v13  ;;  %v5983_v13 = vor.u32 %v4105_v45, %v4104_v51 }
 0x42c   : > { %2633 = vmatpush.bf16.msra.mxu2 %v7101_v29  ;;  %2646 = vmatpush.bf16.msra.mxu3 %v7102_v63 }
 0x449   : > { %v2237_v15 = vpop.f32.mrf.mxu0 }
 0x44a   : > { %v2250_v26 = vpop.f32.mrf.mxu1 }
 0x44b   : > { %v2251_v9 = vadd.f32 %v2250_v26, %v2237_v15 }
 0x44f   : > { %v2263_v0 = vpop.f32.mrf.mxu2 }
 0x450   : > { %v2276_v21 = vpop.f32.mrf.mxu3 }
 0x451   : > { %v2277_v17 = vadd.f32 %v2276_v21, %v2263_v0  ;;  %v2239_v57 = vpop.f32.mrf.mxu0 }
 0x452   : > { %v2252_v43 = vpop.f32.mrf.mxu1 }
 0x453   : > { %v2334_v34 = vrot.slane %v2277_v17, 7 }
 0x455   : > { %v2335_v29 = vsel %vm865_vm0, %v2251_v9, %v2334_v34  ;;  %v2336_v63 = vsel %vm867_vm1, %v2251_v9, %v2334_v34  ;;  %v2382_v9 = vrot.slane %v5981_v30, 2 }
 0x456   : > { %v2337_v22 = vrot.slane %v2336_v63, 1  ;;  %v2340_v6 = vadd.f32 %v2335_v29, %v5981_v30 }
 0x457   : > { %v2265_v18 = vpop.f32.mrf.mxu2 }
 0x458   : > { %v2341_v10 = vadd.f32 %v2337_v22, %v5983_v13  ;;  %v4106_v62 = vmul.f32 -1.442695, %v2340_v6  ;;  %v2278_v0 = vpop.f32.mrf.mxu3 }
 0x459   : > { %v2289_v57 = vpop.f32.mrf.mxu0 }
 0x45a   : > { %4416 = vpow2.f32 %v4106_v62  ;;  %v4107_v4 = vmul.f32 -1.442695, %v2341_v10  ;;  %v2302_v53 = vpop.f32.mrf.mxu1  ;;  %v2383_v62 = vrot.slane %v5983_v13, 2 }
 0x45b   : > { %v2303_v6 = vadd.f32 %v2302_v53, %v2289_v57 }
 0x45c   : > { %4418 = vpow2.f32 %v4107_v4 }
 0x45f   : > { %v2315_v17 = vpop.f32.mrf.mxu2 }
 0x460   : > { %v4417_v51 = vpop.eup %4416  ;;  %v2328_v45 = vpop.f32.mrf.mxu3 }
 0x461   : > { %v2348_v43 = vadd.f32 1.0, %v4417_v51  ;;  %v2329_v26 = vadd.f32 %v2328_v45, %v2315_v17  ;;  %v2291_v15 = vpop.f32.mrf.mxu0 }
 0x462   : > { %v4419_v34 = vpop.eup %4418  ;;  %v2304_v63 = vpop.f32.mrf.mxu1 }
 0x463   : > { %v5990_v18 = vadd.f32 1.0, %v4419_v34  ;;  %4420 = vrcp.f32 %v2348_v43  ;;  %v2388_v22 = vrot.slane %v2329_v26, 7  ;;  %vm2355_vm2 = vweird.f32 %v2348_v43 }
 0x465   : > { %4422 = vrcp.f32 %v5990_v18  ;;  %v2389_v10 = vsel %vm865_vm0, %v2303_v6, %v2388_v22  ;;  %v2390_v29 = vsel %vm867_vm1, %v2303_v6, %v2388_v22  ;;  %vm2370_vm7 = vweird.f32 %v5990_v18 }
 0x466   : > { %v2391_v21 = vrot.slane %v2390_v29, 1  ;;  %v2394_v0 = vadd.f32 %v2389_v10, %v2382_v9 }
 0x467   : > { %v2317_v4 = vpop.f32.mrf.mxu2 }
 0x468   : > { %v2395_v17 = vadd.f32 %v2391_v21, %v2383_v62  ;;  %v4108_v51 = vmul.f32 -1.442695, %v2394_v0  ;;  %v2330_v45 = vpop.f32.mrf.mxu3  ;;  %v7103_v0 = vld [vmem:[#allocation110_spill] sm:$0xff] }
 0x469   : > { %v4421_v15 = vpop.eup %4420  ;;  %v2359_v45 = vand.u32 2147483647, %v2348_v43 }
 0x46a   : > { %4424 = vpow2.f32 %v4108_v51  ;;  %v4109_v34 = vmul.f32 -1.442695, %v2395_v17  ;;  %v2443_v63 = vpop.f32.mrf.mxu0  ;;  %v2456_v57 = vpop.f32.mrf.mxu1  ;;  %v2351_v53 = vmul.f32 %v4421_v15, %v2348_v43  ;;  %vm2356_vm3 = vweird.f32 %v4421_v15  ;;  %v7104_v17 = vld [vmem:[#allocation111_spill] sm:$0xff] }
 0x46b   : > { %v4423_v26 = vpop.eup %4422  ;;  %v2444_v4 = vadd.f32 %v2443_v63, %v7103_v0  ;;  %vm2357_vm6 = vmor %vm2355_vm2, %vm2356_vm3  ;;  %v2374_v63 = vand.u32 2147483647, %v5990_v18  ;;  %vm2360_vm9 = vcmp.eq.f32.partialorder %v2359_v45, 8.507059e+37 }
 0x46c   : > { %4426 = vpow2.f32 %v4109_v34  ;;  %v2352_v8 = vsub.f32 1.0, %v2351_v53  ;;  %v2366_v59 = vmul.f32 %v4423_v26, %v5990_v18  ;;  %v2361_v34 = vand.u32 2147483648, %v2348_v43 }
 0x46d   : > { %vm2371_vm5 = vweird.f32 %v4423_v26  ;;  %vm2375_vm10 = vcmp.eq.f32.partialorder %v2374_v63, 8.507059e+37 }
 0x46e   : > { %v2353_v46 = vmul.f32 %v4421_v15, %v2352_v8  ;;  %v2367_v2 = vsub.f32 1.0, %v2366_v59  ;;  %vm6005_vm8 = vmor %vm2370_vm7, %vm2371_vm5  ;;  %vm3493_vm5 = vcmask 1043456  }
 0x470   : > { %v4425_v6 = vpop.eup %4424  ;;  %v2368_v22 = vmul.f32 %v4423_v26, %v2367_v2  ;;  %v2354_v10 = vadd.f32 %v4421_v15, %v2353_v46  ;;  %v2376_v46 = vand.u32 2147483648, %v5990_v18 }
 0x471   : > { %v5997_v9 = vadd.f32 1.0, %v4425_v6 }
 0x472   : > { %v2469_v62 = vpop.f32.mrf.mxu2  ;;  %v2482_v29 = vpop.f32.mrf.mxu3  ;;  %v2369_v2 = vadd.f32 %v4423_v26, %v2368_v22  ;;  %v2358_v6 = vsel %vm2357_vm6, %v4421_v15, %v2354_v10 }
 0x473   : > { %v4427_v21 = vpop.eup %4426  ;;  %v2470_v51 = vadd.f32 %v2469_v62, %v7104_v17  ;;  %v2445_v53 = vpop.f32.mrf.mxu0  ;;  %4428 = vrcp.f32 %v5997_v9  ;;  %v2457_v62 = vadd.f32 %v2456_v57, %v2444_v4  ;;  %v2362_v17 = vor.u32 1.1754944e-38, %v2361_v34 }
 0x474   : > { %v2458_v47 = vpop.f32.mrf.mxu1  ;;  %v2403_v8 = vadd.f32 1.0, %v4427_v21  ;;  %v2373_v22 = vsel %vm6005_vm8, %v4423_v26, %v2369_v2  ;;  %v2496_v21 = vrot.slane %v5981_v30, 4  ;;  %v2497_v34 = vrot.slane %v5983_v13, 4 }
 0x475   : > { %v2483_v59 = vadd.f32 %v2482_v29, %v2470_v51  ;;  %v2363_v29 = vsel %vm2360_vm9, %v2362_v17, %v2358_v6  ;;  %v2377_v51 = vor.u32 1.1754944e-38, %v2376_v46  ;;  %v2415_v6 = vand.u32 2147483648, %v5997_v9 }
 0x476   : > { %4430 = vrcp.f32 %v2403_v8  ;;  %vm2409_vm12 = vweird.f32 %v5997_v9  ;;  %v2430_v13 = vand.u32 2147483648, %v2403_v8  ;;  %vm2424_vm14 = vweird.f32 %v2403_v8 }
 0x477   : > { %v2488_v47 = vrot.slane %v2483_v59, 7  ;;  %v2378_v43 = vsel %vm2375_vm10, %v2377_v51, %v2373_v22  ;;  %v2428_v51 = vand.u32 2147483647, %v2403_v8 }
 0x479   : > { %v2489_v15 = vsel %vm865_vm0, %v2457_v62, %v2488_v47  ;;  %v2490_v10 = vsel %vm867_vm1, %v2457_v62, %v2488_v47  ;;  %v4429_v18 = vpop.eup %4428  ;;  %v2413_v47 = vand.u32 2147483647, %v5997_v9  ;;  %vm2429_vm3 = vcmp.eq.f32.partialorder %v2428_v51, 8.507059e+37 }
 0x47a   : > { %v2491_v57 = vrot.slane %v2490_v10, 1  ;;  %v2494_v4 = vmul.f32 %v2489_v15, %v2363_v29  ;;  %v2471_v53 = vpop.f32.mrf.mxu2  ;;  %v2484_v59 = vpop.f32.mrf.mxu3  ;;  %v2405_v45 = vmul.f32 %v4429_v18, %v5997_v9  ;;  %vm2410_vm11 = vweird.f32 %v4429_v18 }
 0x47b   : > { %vm2411_vm4 = vmor %vm2409_vm12, %vm2410_vm11  ;;  %vm2414_vm15 = vcmp.eq.f32.partialorder %v2413_v47, 8.507059e+37 }
 0x47c   : > { %v4431_v26 = vpop.eup %4430  ;;  %v2495_v2 = vmul.f32 %v2491_v57, %v2378_v43  ;;  %v2500_v30 = vadd.f32 %v2496_v21, %v2494_v4  ;;  %v2406_v17 = vsub.f32 1.0, %v2405_v45  ;;  %v2416_v21 = vor.u32 1.1754944e-38, %v2415_v6 }
 0x47d   : > { %v2420_v46 = vmul.f32 %v4431_v26, %v2403_v8  ;;  %vm2425_vm13 = vweird.f32 %v4431_v26  ;;  %v2431_v4 = vor.u32 1.1754944e-38, %v2430_v13 }
 0x47e   : > { %v2501_v0 = vadd.f32 %v2497_v34, %v2495_v2  ;;  %4432 = vtanh.f32 %v2500_v30  ;;  %v2407_v62 = vmul.f32 %v4429_v18, %v2406_v17  ;;  %vm2426_vm2 = vmor %vm2424_vm14, %vm2425_vm13 }
 0x47f   : > { %v2421_v63 = vsub.f32 1.0, %v2420_v46 }
 0x480   : > { %4434 = vtanh.f32 %v2501_v0  ;;  %v2408_v22 = vadd.f32 %v4429_v18, %v2407_v62 }
 0x481   : > { %v2422_v29 = vmul.f32 %v4431_v26, %v2421_v63 }
 0x482   : > { %v2412_v15 = vsel %vm2411_vm4, %v4429_v18, %v2408_v22 }
 0x483   : > { %v2423_v10 = vadd.f32 %v4431_v26, %v2422_v29  ;;  %v2417_v34 = vsel %vm2414_vm15, %v2416_v21, %v2412_v15 }
 0x484   : > { %v4433_v57 = vpop.eup %4432 }
 0x485   : > { %v2427_v53 = vsel %vm2426_vm2, %v4431_v26, %v2423_v10  ;;  %v2504_v9 = vsub.f32 %v5859_v39, %v4433_v57 }
 0x486   : > { %v4435_v59 = vpop.eup %4434  ;;  %v2432_v0 = vsel %vm2429_vm3, %v2431_v4, %v2427_v53  ;;  %v7109_v53 = vld [vmem:[#allocation25_spill] sm:$0xff] }
 0x487   : > { %v2505_v45 = vsub.f32 %v5861_v35, %v4435_v59  ;;  %v2506_v43 = vmul.f32 %v2504_v9, %v2417_v34  ;;  %v7110_v9 = vld [vmem:[#allocation23_spill] sm:$0xff] }
 0x489   : > { %v2507_v2 = vmul.f32 %v2505_v45, %v2432_v0  ;;  %v6021_v30 = vadd.f32 %v4433_v57, %v2506_v43  ;;  %v7112_v0 = vld [vmem:[#allocation26_spill] sm:$0xff]  ;;  %v7113_v45 = vld [vmem:[#allocation29_spill] sm:$0xff]  ;;  %v7114_v43 = vld [vmem:[#allocation27_spill] sm:$0xff] }
 0x48b   : > { %v6023_v8 = vadd.f32 %v4435_v59, %v2507_v2  ;;  %v2520_v18 = vperm.slane %v6021_v30, 0  ;;  %v2521_v17 = vperm.slane %v6021_v30, 1  ;;  %v7111_v59 = vld [vmem:[#allocation24_spill] sm:$0xff] }
 0x48c   : > { %v7115_v2 = vld [vmem:[#allocation28_spill] sm:$0xff] }
 0x48d   : > { %v2522_v26 = vperm.slane %v6023_v8, 0  ;;  %v2523_v46 = vperm.slane %v6023_v8, 1  ;;  %v6030_v39 = vsel %vm3493_vm5, %v5868_v7, %v2520_v18  ;;  %v6033_v35 = vsel %vm3493_vm5, %v5871_v58, %v2521_v17 }
 0x48e   : > { %v2528_v6 = vpack.c.bf16 %v2520_v18, %v2520_v18  ;;  %v2529_v13 = vpack.c.bf16 %v2521_v17, %v2521_v17  ;;  %v7116_v18 = vld [vmem:[#allocation30_spill] sm:$0xff]  ;;  %v7117_v17 = vld [vmem:[#allocation33_spill] sm:$0xff] }
 0x48f   : > { %v6036_v62 = vsel %vm3493_vm5, %v5874_v32, %v2522_v26  ;;  %v6039_v63 = vsel %vm3493_vm5, %v5877_v54, %v2523_v46  ;;  %v2530_v47 = vpack.c.bf16 %v2522_v26, %v2522_v26  ;;  %v2531_v29 = vpack.c.bf16 %v2523_v46, %v2523_v46  ;;  %v7107_v32 = vld [vmem:[#allocation109_spill] sm:$0xff]  ;;  %v7108_v54 = vld [vmem:[#allocation22_spill] sm:$0xff]  ;;  %v7118_v26 = vld [vmem:[#allocation31_spill] sm:$0xff] }
 0x490   : > { %v2536_v21 = vunpack.c.l.b16 %v2528_v6  ;;  %v2537_v10 = vunpack.c.l.b16 %v2529_v13  ;;  %v7119_v46 = vld [vmem:[#allocation32_spill] sm:$0xff]  ;;  %v7120_v6 = vld [vmem:[#allocation34_spill] sm:$0xff]  ;;  %v7122_v13 = vld [vmem:[#allocation35_spill] sm:$0xff] }
 0x491   : > { %v2538_v22 = vunpack.c.l.b16 %v2530_v47  ;;  %v2539_v51 = vunpack.c.l.b16 %v2531_v29  ;;  %v7121_v47 = vld [vmem:[#allocation37_spill] sm:$0xff]  ;;  %v7123_v29 = vld [vmem:[#allocation36_spill] sm:$0xff] }
 0x493   : > { %v2540_v15 = vrot.slane %v2538_v22, 7  ;;  %v2542_v7 = vrot.slane %v2539_v51, 7  ;;  %v7124_v22 = vld [vmem:[#allocation38_spill] sm:$0xff]  ;;  %v7125_v51 = vld [vmem:[#allocation41_spill] sm:$0xff] }
 0x495   : > { %v2541_v57 = vsel %vm867_vm1, %v2540_v15, %v2536_v21  ;;  %v2543_v4 = vsel %vm867_vm1, %v2542_v7, %v2537_v10  ;;  %v7126_v21 = vld [vmem:[#allocation39_spill] sm:$0xff]  ;;  %v7127_v15 = vld [vmem:[#allocation40_spill] sm:$0xff]  ;;  %v7128_v10 = vld [vmem:[#allocation42_spill] sm:$0xff] }
 0x496   : > { %v2544_v58 = vpack.c.b16 %v2541_v57, %v2541_v57  ;;  %v2545_v34 = vpack.c.b16 %v2543_v4, %v2543_v4  ;;  %v7129_v7 = vld [vmem:[#allocation45_spill] sm:$0xff]  ;;  %v7130_v57 = vld [vmem:[#allocation43_spill] sm:$0xff]  ;;  %v7132_v4 = vld [vmem:[#allocation46_spill] sm:$0xff] }
 0x498   : > { %2556 = vmatmul.bf16.vlgmr.msrb.gmra.mxu0 %v2544_v58  ;;  %2582 = vmatmul.bf16.vlgmr.msrb.gmra.mxu2 %v2544_v58 }
 0x499   : > { %2569 = vmatmul.bf16.vlgmr.msrb.gmra.mxu1 %v2545_v34  ;;  %2595 = vmatmul.bf16.vlgmr.msrb.gmra.mxu3 %v2545_v34 }
 0x49a   : > { %2754 = vmatpush.bf16.msrb.mxu0 %v6834_v41  ;;  %2767 = vmatpush.bf16.msrb.mxu1 %v6835_v28 }
 0x49b   : > { %2780 = vmatpush.bf16.msrb.mxu2 %v6836_v11  ;;  %2793 = vmatpush.bf16.msrb.mxu3 %v6837_v56 }
 0x49e   : > { %2755 = vmatpush.bf16.msrb.mxu0 %v6838_v19  ;;  %2768 = vmatpush.bf16.msrb.mxu1 %v6839_v44 }
 0x49f   : > { %2781 = vmatpush.bf16.msrb.mxu2 %v6840_v14  ;;  %2794 = vmatpush.bf16.msrb.mxu3 %v6841_v36 }
 0x4a2   : > { %2756 = vmatpush.bf16.msrb.mxu0 %v6842_v1  ;;  %2769 = vmatpush.bf16.msrb.mxu1 %v6843_v42 }
 0x4a3   : > { %2782 = vmatpush.bf16.msrb.mxu2 %v6844_v48  ;;  %2795 = vmatpush.bf16.msrb.mxu3 %v6845_v12 }
 0x4a6   : > { %2757 = vmatpush.bf16.msrb.mxu0 %v6846_v24  ;;  %2770 = vmatpush.bf16.msrb.mxu1 %v6847_v31 }
 0x4a7   : > { %2783 = vmatpush.bf16.msrb.mxu2 %v6848_v5  ;;  %2796 = vmatpush.bf16.msrb.mxu3 %v6849_v37 }
 0x4a8   : > { %2608 = vmatmul.bf16.vlgmr.msra.gmra.mxu0 %v2544_v58  ;;  %2634 = vmatmul.bf16.vlgmr.msra.gmra.mxu2 %v2544_v58 }
 0x4a9   : > { %2621 = vmatmul.bf16.vlgmr.msra.gmra.mxu1 %v2545_v34  ;;  %2647 = vmatmul.bf16.vlgmr.msra.gmra.mxu3 %v2545_v34 }
 0x4aa   : > { %2758 = vmatpush.bf16.msrb.mxu0 %v6850_v27  ;;  %2771 = vmatpush.bf16.msrb.mxu1 %v6851_v52 }
 0x4ab   : > { %2784 = vmatpush.bf16.msrb.mxu2 %v6852_v3  ;;  %2797 = vmatpush.bf16.msrb.mxu3 %v6853_v60 }
 0x4ae   : > { %2759 = vmatpush.bf16.msrb.mxu0 %v5176_v25  ;;  %2772 = vmatpush.bf16.msrb.mxu1 %v5185_v38 }
 0x4af   : > { %2785 = vmatpush.bf16.msrb.mxu2 %v6854_v40  ;;  %2798 = vmatpush.bf16.msrb.mxu3 %v6855_v61 }
 0x4b2   : > { %2760 = vmatpush.bf16.msrb.mxu0 %v5188_v49  ;;  %2773 = vmatpush.bf16.msrb.mxu1 %v5197_v50 }
 0x4b3   : > { %2786 = vmatpush.bf16.msrb.mxu2 %v5192_v20  ;;  %2799 = vmatpush.bf16.msrb.mxu3 %v5194_v55 }
 0x4b6   : > { %2761 = vmatpush.bf16.msrb.mxu0 %v5200_v16  ;;  %2774 = vmatpush.bf16.msrb.mxu1 %v5209_v23 }
 0x4b7   : > { %2787 = vmatpush.bf16.msrb.mxu2 %v5204_v33  ;;  %2800 = vmatpush.bf16.msrb.mxu3 %v7107_v32 }
 0x4b9   : > { %2762 = vmatmul.bf16.vlgmr.msrb.gmra.mxu0 %v2544_v58  ;;  %2775 = vmatmul.bf16.vlgmr.msrb.gmra.mxu1 %v2545_v34 }
 0x4ba   : > { %2868 = vmatpush.bf16.msra.mxu0 %v7108_v54  ;;  %2881 = vmatpush.bf16.msra.mxu1 %v7109_v53 }
 0x4bb   : > { %2788 = vmatmul.bf16.vlgmr.msrb.gmra.mxu2 %v2544_v58  ;;  %2801 = vmatmul.bf16.vlgmr.msrb.gmra.mxu3 %v2545_v34  ;;  %v7131_v58 = vld [vmem:[#allocation44_spill] sm:$0xff]  ;;  %v7133_v34 = vld [vmem:[#allocation49_spill] sm:$0xff] }
 0x4bc   : > { %2894 = vmatpush.bf16.msra.mxu2 %v7110_v9  ;;  %2907 = vmatpush.bf16.msra.mxu3 %v7111_v59 }
 0x4be   : > { %2869 = vmatpush.bf16.msra.mxu0 %v7112_v0  ;;  %2882 = vmatpush.bf16.msra.mxu1 %v7113_v45 }
 0x4c0   : > { %2895 = vmatpush.bf16.msra.mxu2 %v7114_v43  ;;  %2908 = vmatpush.bf16.msra.mxu3 %v7115_v2 }
 0x4c2   : > { %2870 = vmatpush.bf16.msra.mxu0 %v7116_v18  ;;  %2883 = vmatpush.bf16.msra.mxu1 %v7117_v17 }
 0x4c4   : > { %2896 = vmatpush.bf16.msra.mxu2 %v7118_v26  ;;  %2909 = vmatpush.bf16.msra.mxu3 %v7119_v46 }
 0x4c6   : > { %2871 = vmatpush.bf16.msra.mxu0 %v7120_v6  ;;  %2884 = vmatpush.bf16.msra.mxu1 %v7121_v47  ;;  %v4111_v47 = vld [vmem:[%s4893_s28 + $0x5] ss:$8 sm:$0x30] }
 0x4c7   : > { %v4112_v6 = vld [vmem:[%s4893_s28 + $0x35] ss:$8 sm:$0xf] }
 0x4c8   : > { %2897 = vmatpush.bf16.msra.mxu2 %v7122_v13  ;;  %2910 = vmatpush.bf16.msra.mxu3 %v7123_v29  ;;  %v7134_v29 = vld [vmem:[#allocation47_spill] sm:$0xff] }
 0x4c9   : > { %v4110_v13 = vld [vmem:[%s4893_s28 + $0x5] ss:$8 sm:$0xf] }
 0x4ca   : > { %2872 = vmatpush.bf16.msra.mxu0 %v7124_v22  ;;  %2885 = vmatpush.bf16.msra.mxu1 %v7125_v51  ;;  %v7135_v22 = vld [vmem:[#allocation48_spill] sm:$0xff]  ;;  %v7136_v51 = vld [vmem:[#allocation50_spill] sm:$0xff]  ;;  %v6143_v26 = vor.u32 %v4111_v47, %v4110_v13 }
 0x4cc   : > { %2898 = vmatpush.bf16.msra.mxu2 %v7126_v21  ;;  %2911 = vmatpush.bf16.msra.mxu3 %v7127_v15  ;;  %v7137_v21 = vld [vmem:[#allocation56_spill] sm:$0xff]  ;;  %v7138_v15 = vld [vmem:[#allocation53_spill] sm:$0xff] }
 0x4ce   : > { %2873 = vmatpush.bf16.msra.mxu0 %v7128_v10  ;;  %2886 = vmatpush.bf16.msra.mxu1 %v7129_v7  ;;  %v7139_v10 = vld [vmem:[#allocation57_spill] sm:$0xff]  ;;  %v7140_v7 = vld [vmem:[#allocation51_spill] sm:$0xff] }
 0x4d0   : > { %2899 = vmatpush.bf16.msra.mxu2 %v7130_v57  ;;  %2912 = vmatpush.bf16.msra.mxu3 %v7131_v58  ;;  %v7141_v57 = vld [vmem:[#allocation52_spill] sm:$0xff]  ;;  %v7142_v58 = vld [vmem:[#allocation54_spill] sm:$0xff] }
 0x4d2   : > { %2874 = vmatpush.bf16.msra.mxu0 %v7132_v4  ;;  %2887 = vmatpush.bf16.msra.mxu1 %v7133_v34  ;;  %v7143_v4 = vld [vmem:[#allocation55_spill] sm:$0xff] }
 0x4d3   : > { %v7144_v34 = vld [vmem:[#allocation59_spill] sm:$0xff] }
 0x4d4   : > { %2900 = vmatpush.bf16.msra.mxu2 %v7134_v29  ;;  %2913 = vmatpush.bf16.msra.mxu3 %v7135_v22  ;;  %v7145_v29 = vld [vmem:[#allocation62_spill] sm:$0xff]  ;;  %v7146_v22 = vld [vmem:[#allocation60_spill] sm:$0xff] }
 0x4d6   : > { %2875 = vmatpush.bf16.msra.mxu0 %v7136_v51  ;;  %2888 = vmatpush.bf16.msra.mxu1 %v7137_v21  ;;  %v7147_v51 = vld [vmem:[#allocation61_spill] sm:$0xff]  ;;  %v7148_v21 = vld [vmem:[#allocation63_spill] sm:$0xff] }
 0x4d8   : > { %2901 = vmatpush.bf16.msra.mxu2 %v7140_v7  ;;  %2914 = vmatpush.bf16.msra.mxu3 %v7141_v57  ;;  %v7151_v7 = vld [vmem:[#allocation65_spill] sm:$0xff]  ;;  %v7152_v57 = vld [vmem:[#allocation67_spill] sm:$0xff] }
 0x4da   : > { %2920 = vmatpush.bf16.msrb.mxu0 %v7138_v15  ;;  %2933 = vmatpush.bf16.msrb.mxu1 %v7139_v10  ;;  %v7149_v15 = vld [vmem:[#allocation66_spill] sm:$0xff]  ;;  %v7150_v10 = vld [vmem:[#allocation64_spill] sm:$0xff] }
 0x4dc   : > { %2946 = vmatpush.bf16.msrb.mxu2 %v7142_v58  ;;  %2959 = vmatpush.bf16.msrb.mxu3 %v7143_v4  ;;  %v7153_v58 = vld [vmem:[#allocation70_spill] sm:$0xff]  ;;  %v7154_v4 = vld [vmem:[#allocation68_spill] sm:$0xff] }
 0x4de   : > { %2921 = vmatpush.bf16.msrb.mxu0 %v7144_v34  ;;  %2934 = vmatpush.bf16.msrb.mxu1 %v7145_v29  ;;  %v7155_v34 = vld [vmem:[#allocation69_spill] sm:$0xff]  ;;  %v7156_v29 = vld [vmem:[#allocation71_spill] sm:$0xff] }
 0x4e0   : > { %2947 = vmatpush.bf16.msrb.mxu2 %v7146_v22  ;;  %2960 = vmatpush.bf16.msrb.mxu3 %v7147_v51  ;;  %v7157_v22 = vld [vmem:[#allocation74_spill] sm:$0xff]  ;;  %v7158_v51 = vld [vmem:[#allocation72_spill] sm:$0xff] }
 0x4e2   : > { %2922 = vmatpush.bf16.msrb.mxu0 %v7148_v21  ;;  %2935 = vmatpush.bf16.msrb.mxu1 %v7149_v15  ;;  %v7159_v21 = vld [vmem:[#allocation73_spill] sm:$0xff]  ;;  %v7160_v15 = vld [vmem:[#allocation75_spill] sm:$0xff] }
 0x4e4   : > { %2948 = vmatpush.bf16.msrb.mxu2 %v7150_v10  ;;  %2961 = vmatpush.bf16.msrb.mxu3 %v7151_v7  ;;  %v7161_v7 = vld [vmem:[#allocation78_spill] sm:$0xff] }
 0x4e6   : > { %2923 = vmatpush.bf16.msrb.mxu0 %v7152_v57  ;;  %2936 = vmatpush.bf16.msrb.mxu1 %v7153_v58  ;;  %v7162_v57 = vld [vmem:[#allocation76_spill] sm:$0xff]  ;;  %v7163_v58 = vld [vmem:[#allocation77_spill] sm:$0xff] }
 0x4e8   : > { %2949 = vmatpush.bf16.msrb.mxu2 %v7154_v4  ;;  %2962 = vmatpush.bf16.msrb.mxu3 %v7155_v34  ;;  %v7164_v34 = vld [vmem:[#allocation79_spill] sm:$0xff]  ;;  %v7170_v4 = vld [vmem:[#allocation84_spill] sm:$0xff] }
 0x4ea   : > { %2924 = vmatpush.bf16.msrb.mxu0 %v7156_v29  ;;  %2937 = vmatpush.bf16.msrb.mxu1 %v7157_v22  ;;  %v7165_v29 = vld [vmem:[#allocation82_spill] sm:$0xff]  ;;  %v7166_v22 = vld [vmem:[#allocation80_spill] sm:$0xff] }
 0x4ec   : > { %2950 = vmatpush.bf16.msrb.mxu2 %v7158_v51  ;;  %2963 = vmatpush.bf16.msrb.mxu3 %v7159_v21  ;;  %v7167_v51 = vld [vmem:[#allocation81_spill] sm:$0xff]  ;;  %v7168_v21 = vld [vmem:[#allocation83_spill] sm:$0xff] }
 0x4ee   : > { %2925 = vmatpush.bf16.msrb.mxu0 %v7160_v15  ;;  %2938 = vmatpush.bf16.msrb.mxu1 %v7161_v7  ;;  %v7169_v15 = vld [vmem:[#allocation89_spill] sm:$0xff] }
 0x4ef   : > { %v7171_v7 = vld [vmem:[#allocation85_spill] sm:$0xff] }
 0x4f0   : > { %2951 = vmatpush.bf16.msrb.mxu2 %v7162_v57  ;;  %2964 = vmatpush.bf16.msrb.mxu3 %v7163_v58 }
 0x4f2   : > { %2926 = vmatpush.bf16.msrb.mxu0 %v7164_v34  ;;  %2939 = vmatpush.bf16.msrb.mxu1 %v7165_v29  ;;  %v4113_v29 = vld [vmem:[%s4893_s28 + $0x35] ss:$8 sm:$0x30] }
 0x4f4   : > { %2952 = vmatpush.bf16.msrb.mxu2 %v7166_v22  ;;  %2965 = vmatpush.bf16.msrb.mxu3 %v7167_v51 }
 0x4f6   : > { %2927 = vmatpush.bf16.msrb.mxu0 %v7168_v21  ;;  %2940 = vmatpush.bf16.msrb.mxu1 %v7169_v15  ;;  %v6145_v15 = vor.u32 %v4113_v29, %v4112_v6 }
 0x4f8   : > { %2953 = vmatpush.bf16.msrb.mxu2 %v7170_v4  ;;  %2966 = vmatpush.bf16.msrb.mxu3 %v7171_v7 }
 0x515   : > { %v2557_v57 = vpop.f32.mrf.mxu0 }
 0x516   : > { %v2570_v10 = vpop.f32.mrf.mxu1 }
 0x517   : > { %v2571_v21 = vadd.f32 %v2570_v10, %v2557_v57 }
 0x51b   : > { %v2583_v58 = vpop.f32.mrf.mxu2 }
 0x51c   : > { %v2596_v34 = vpop.f32.mrf.mxu3 }
 0x51d   : > { %v2597_v46 = vadd.f32 %v2596_v34, %v2583_v58  ;;  %v2559_v22 = vpop.f32.mrf.mxu0 }
 0x51e   : > { %v2572_v51 = vpop.f32.mrf.mxu1 }
 0x51f   : > { %v2654_v17 = vrot.slane %v2597_v46, 7 }
 0x521   : > { %v2655_v4 = vsel %vm865_vm0, %v2571_v21, %v2654_v17  ;;  %v2656_v7 = vsel %vm867_vm1, %v2571_v21, %v2654_v17  ;;  %v2702_v21 = vrot.slane %v6143_v26, 2 }
 0x522   : > { %v2657_v18 = vrot.slane %v2656_v7, 1  ;;  %v2660_v2 = vadd.f32 %v2655_v4, %v6143_v26 }
 0x523   : > { %v2585_v43 = vpop.f32.mrf.mxu2 }
 0x524   : > { %v2661_v45 = vadd.f32 %v2657_v18, %v6145_v15  ;;  %v4114_v0 = vmul.f32 -1.442695, %v2660_v2  ;;  %v2598_v58 = vpop.f32.mrf.mxu3 }
 0x525   : > { %v2609_v22 = vpop.f32.mrf.mxu0 }
 0x526   : > { %4436 = vpow2.f32 %v4114_v0  ;;  %v4115_v47 = vmul.f32 -1.442695, %v2661_v45  ;;  %v2622_v13 = vpop.f32.mrf.mxu1  ;;  %v2703_v0 = vrot.slane %v6145_v15, 2 }
 0x527   : > { %v2623_v2 = vadd.f32 %v2622_v13, %v2609_v22 }
 0x528   : > { %4438 = vpow2.f32 %v4115_v47 }
 0x52b   : > { %v2635_v46 = vpop.f32.mrf.mxu2 }
 0x52c   : > { %v4437_v6 = vpop.eup %4436  ;;  %v2648_v29 = vpop.f32.mrf.mxu3 }
 0x52d   : > { %v2668_v51 = vadd.f32 1.0, %v4437_v6  ;;  %v2649_v10 = vadd.f32 %v2648_v29, %v2635_v46  ;;  %v2611_v57 = vpop.f32.mrf.mxu0 }
 0x52e   : > { %v4439_v17 = vpop.eup %4438  ;;  %v2624_v7 = vpop.f32.mrf.mxu1 }
 0x52f   : > { %v6152_v43 = vadd.f32 1.0, %v4439_v17  ;;  %4440 = vrcp.f32 %v2668_v51  ;;  %v2708_v18 = vrot.slane %v2649_v10, 7  ;;  %vm2675_vm6 = vweird.f32 %v2668_v51 }
 0x531   : > { %4442 = vrcp.f32 %v6152_v43  ;;  %v2709_v45 = vsel %vm865_vm0, %v2623_v2, %v2708_v18  ;;  %v2710_v4 = vsel %vm867_vm1, %v2623_v2, %v2708_v18  ;;  %vm2690_vm10 = vweird.f32 %v6152_v43 }
 0x532   : > { %v2711_v34 = vrot.slane %v2710_v4, 1  ;;  %v2714_v58 = vadd.f32 %v2709_v45, %v2702_v21 }
 0x533   : > { %v2637_v47 = vpop.f32.mrf.mxu2 }
 0x534   : > { %v2715_v46 = vadd.f32 %v2711_v34, %v2703_v0  ;;  %v4116_v6 = vmul.f32 -1.442695, %v2714_v58  ;;  %v2650_v29 = vpop.f32.mrf.mxu3  ;;  %v7172_v58 = vld [vmem:[#allocation110_spill] sm:$0xff] }
 0x535   : > { %v4441_v57 = vpop.eup %4440  ;;  %v2679_v29 = vand.u32 2147483647, %v2668_v51 }
 0x536   : > { %4444 = vpow2.f32 %v4116_v6  ;;  %v4117_v17 = vmul.f32 -1.442695, %v2715_v46  ;;  %v2763_v7 = vpop.f32.mrf.mxu0  ;;  %v2776_v22 = vpop.f32.mrf.mxu1  ;;  %v2671_v13 = vmul.f32 %v4441_v57, %v2668_v51  ;;  %vm2676_vm7 = vweird.f32 %v4441_v57  ;;  %v7173_v46 = vld [vmem:[#allocation111_spill] sm:$0xff] }
 0x537   : > { %v4443_v10 = vpop.eup %4442  ;;  %v2764_v47 = vadd.f32 %v2763_v7, %v7172_v58  ;;  %vm2677_vm9 = vmor %vm2675_vm6, %vm2676_vm7  ;;  %v2694_v7 = vand.u32 2147483647, %v6152_v43  ;;  %vm2680_vm12 = vcmp.eq.f32.partialorder %v2679_v29, 8.507059e+37 }
 0x538   : > { %4446 = vpow2.f32 %v4117_v17  ;;  %v2672_v59 = vsub.f32 1.0, %v2671_v13  ;;  %v2686_v9 = vmul.f32 %v4443_v10, %v6152_v43  ;;  %v2681_v17 = vand.u32 2147483648, %v2668_v51 }
 0x539   : > { %vm2691_vm8 = vweird.f32 %v4443_v10  ;;  %vm2695_vm13 = vcmp.eq.f32.partialorder %v2694_v7, 8.507059e+37 }
 0x53a   : > { %v2673_v53 = vmul.f32 %v4441_v57, %v2672_v59  ;;  %v2687_v54 = vsub.f32 1.0, %v2686_v9  ;;  %vm6167_vm11 = vmor %vm2690_vm10, %vm2691_vm8  ;;  %vm3498_vm8 = vcmask 1044480  }
 0x53c   : > { %v4445_v2 = vpop.eup %4444  ;;  %v2688_v18 = vmul.f32 %v4443_v10, %v2687_v54  ;;  %v2674_v45 = vadd.f32 %v4441_v57, %v2673_v53  ;;  %v2696_v53 = vand.u32 2147483648, %v6152_v43 }
 0x53d   : > { %v6159_v21 = vadd.f32 1.0, %v4445_v2 }
 0x53e   : > { %v2789_v0 = vpop.f32.mrf.mxu2  ;;  %v2802_v4 = vpop.f32.mrf.mxu3  ;;  %v2689_v54 = vadd.f32 %v4443_v10, %v2688_v18  ;;  %v2678_v2 = vsel %vm2677_vm9, %v4441_v57, %v2674_v45 }
 0x53f   : > { %v4447_v34 = vpop.eup %4446  ;;  %v2790_v6 = vadd.f32 %v2789_v0, %v7173_v46  ;;  %v2765_v13 = vpop.f32.mrf.mxu0  ;;  %4448 = vrcp.f32 %v6159_v21  ;;  %v2777_v0 = vadd.f32 %v2776_v22, %v2764_v47  ;;  %v2682_v46 = vor.u32 1.1754944e-38, %v2681_v17 }
 0x540   : > { %v2778_v32 = vpop.f32.mrf.mxu1  ;;  %v2723_v59 = vadd.f32 1.0, %v4447_v34  ;;  %v2693_v18 = vsel %vm6167_vm11, %v4443_v10, %v2689_v54  ;;  %v2816_v34 = vrot.slane %v6143_v26, 4  ;;  %v2817_v17 = vrot.slane %v6145_v15, 4 }
 0x541   : > { %v2803_v9 = vadd.f32 %v2802_v4, %v2790_v6  ;;  %v2683_v4 = vsel %vm2680_vm12, %v2682_v46, %v2678_v2  ;;  %v2697_v6 = vor.u32 1.1754944e-38, %v2696_v53  ;;  %v2735_v2 = vand.u32 2147483648, %v6159_v21 }
 0x542   : > { %4450 = vrcp.f32 %v2723_v59  ;;  %vm2729_vm14 = vweird.f32 %v6159_v21  ;;  %v2750_v15 = vand.u32 2147483648, %v2723_v59  ;;  %vm2744_vm3 = vweird.f32 %v2723_v59 }
 0x543   : > { %v2808_v32 = vrot.slane %v2803_v9, 7  ;;  %v2698_v51 = vsel %vm2695_vm13, %v2697_v6, %v2693_v18  ;;  %v2748_v6 = vand.u32 2147483647, %v2723_v59 }
 0x545   : > { %v2809_v57 = vsel %vm865_vm0, %v2777_v0, %v2808_v32  ;;  %v2810_v45 = vsel %vm867_vm1, %v2777_v0, %v2808_v32  ;;  %v4449_v43 = vpop.eup %4448  ;;  %v2733_v32 = vand.u32 2147483647, %v6159_v21  ;;  %vm2749_vm7 = vcmp.eq.f32.partialorder %v2748_v6, 8.507059e+37 }
 0x546   : > { %v2811_v22 = vrot.slane %v2810_v45, 1  ;;  %v2814_v47 = vmul.f32 %v2809_v57, %v2683_v4  ;;  %v2791_v13 = vpop.f32.mrf.mxu2  ;;  %v2804_v9 = vpop.f32.mrf.mxu3  ;;  %v2725_v29 = vmul.f32 %v4449_v43, %v6159_v21  ;;  %vm2730_vm4 = vweird.f32 %v4449_v43 }
 0x547   : > { %vm2731_vm2 = vmor %vm2729_vm14, %vm2730_vm4  ;;  %vm2734_vm5 = vcmp.eq.f32.partialorder %v2733_v32, 8.507059e+37 }
 0x548   : > { %v4451_v10 = vpop.eup %4450  ;;  %v2815_v54 = vmul.f32 %v2811_v22, %v2698_v51  ;;  %v2820_v26 = vadd.f32 %v2816_v34, %v2814_v47  ;;  %v2726_v46 = vsub.f32 1.0, %v2725_v29  ;;  %v2736_v34 = vor.u32 1.1754944e-38, %v2735_v2 }
 0x549   : > { %v2740_v53 = vmul.f32 %v4451_v10, %v2723_v59  ;;  %vm2745_vm15 = vweird.f32 %v4451_v10  ;;  %v2751_v47 = vor.u32 1.1754944e-38, %v2750_v15 }
 0x54a   : > { %v2821_v58 = vadd.f32 %v2817_v17, %v2815_v54  ;;  %4452 = vtanh.f32 %v2820_v26  ;;  %v2727_v0 = vmul.f32 %v4449_v43, %v2726_v46  ;;  %vm2746_vm6 = vmor %vm2744_vm3, %vm2745_vm15 }
 0x54b   : > { %v2741_v7 = vsub.f32 1.0, %v2740_v53 }
 0x54c   : > { %4454 = vtanh.f32 %v2821_v58  ;;  %v2728_v18 = vadd.f32 %v4449_v43, %v2727_v0 }
 0x54d   : > { %v2742_v4 = vmul.f32 %v4451_v10, %v2741_v7 }
 0x54e   : > { %v2732_v57 = vsel %vm2731_vm2, %v4449_v43, %v2728_v18 }
 0x54f   : > { %v2743_v45 = vadd.f32 %v4451_v10, %v2742_v4  ;;  %v2737_v17 = vsel %vm2734_vm5, %v2736_v34, %v2732_v57 }
 0x550   : > { %v4453_v22 = vpop.eup %4452 }
 0x551   : > { %v2747_v13 = vsel %vm2746_vm6, %v4451_v10, %v2743_v45  ;;  %v2824_v21 = vsub.f32 %v6021_v30, %v4453_v22 }
 0x552   : > { %v4455_v9 = vpop.eup %4454  ;;  %v2752_v58 = vsel %vm2749_vm7, %v2751_v47, %v2747_v13  ;;  %v7178_v13 = vld [vmem:[#allocation25_spill] sm:$0xff] }
 0x553   : > { %v2825_v29 = vsub.f32 %v6023_v8, %v4455_v9  ;;  %v2826_v51 = vmul.f32 %v2824_v21, %v2737_v17  ;;  %v7179_v21 = vld [vmem:[#allocation23_spill] sm:$0xff] }
 0x555   : > { %v2827_v54 = vmul.f32 %v2825_v29, %v2752_v58  ;;  %v6183_v26 = vadd.f32 %v4453_v22, %v2826_v51  ;;  %v7181_v58 = vld [vmem:[#allocation26_spill] sm:$0xff]  ;;  %v7182_v29 = vld [vmem:[#allocation29_spill] sm:$0xff]  ;;  %v7183_v51 = vld [vmem:[#allocation27_spill] sm:$0xff] }
 0x557   : > { %v6185_v59 = vadd.f32 %v4455_v9, %v2827_v54  ;;  %v2840_v43 = vperm.slane %v6183_v26, 0  ;;  %v2841_v46 = vperm.slane %v6183_v26, 1  ;;  %v7180_v9 = vld [vmem:[#allocation24_spill] sm:$0xff] }
 0x558   : > { %v7184_v54 = vld [vmem:[#allocation28_spill] sm:$0xff] }
 0x559   : > { %v2842_v10 = vperm.slane %v6185_v59, 0  ;;  %v2843_v53 = vperm.slane %v6185_v59, 1  ;;  %v6192_v30 = vsel %vm3498_vm8, %v6030_v39, %v2840_v43  ;;  %v6195_v8 = vsel %vm3498_vm8, %v6033_v35, %v2841_v46 }
 0x55a   : > { %v2848_v2 = vpack.c.bf16 %v2840_v43, %v2840_v43  ;;  %v2849_v15 = vpack.c.bf16 %v2841_v46, %v2841_v46  ;;  %v7185_v43 = vld [vmem:[#allocation30_spill] sm:$0xff]  ;;  %v7186_v46 = vld [vmem:[#allocation33_spill] sm:$0xff] }
 0x55b   : > { %v6198_v0 = vsel %vm3498_vm8, %v6036_v62, %v2842_v10  ;;  %v6201_v7 = vsel %vm3498_vm8, %v6039_v63, %v2843_v53  ;;  %v2850_v32 = vpack.c.bf16 %v2842_v10, %v2842_v10  ;;  %v2851_v4 = vpack.c.bf16 %v2843_v53, %v2843_v53  ;;  %v7176_v62 = vld [vmem:[#allocation109_spill] sm:$0xff]  ;;  %v7177_v63 = vld [vmem:[#allocation22_spill] sm:$0xff]  ;;  %v7187_v10 = vld [vmem:[#allocation31_spill] sm:$0xff] }
 0x55c   : > { %v2856_v34 = vunpack.c.l.b16 %v2848_v2  ;;  %v2857_v45 = vunpack.c.l.b16 %v2849_v15  ;;  %v7188_v53 = vld [vmem:[#allocation32_spill] sm:$0xff]  ;;  %v7189_v2 = vld [vmem:[#allocation34_spill] sm:$0xff]  ;;  %v7191_v15 = vld [vmem:[#allocation35_spill] sm:$0xff] }
 0x55d   : > { %v2858_v18 = vunpack.c.l.b16 %v2850_v32  ;;  %v2859_v6 = vunpack.c.l.b16 %v2851_v4  ;;  %v7190_v32 = vld [vmem:[#allocation37_spill] sm:$0xff]  ;;  %v7192_v4 = vld [vmem:[#allocation36_spill] sm:$0xff] }
 0x55f   : > { %v2860_v57 = vrot.slane %v2858_v18, 7  ;;  %v2862_v39 = vrot.slane %v2859_v6, 7  ;;  %v7193_v18 = vld [vmem:[#allocation38_spill] sm:$0xff]  ;;  %v7194_v6 = vld [vmem:[#allocation41_spill] sm:$0xff] }
 0x561   : > { %v2861_v22 = vsel %vm867_vm1, %v2860_v57, %v2856_v34  ;;  %v2863_v47 = vsel %vm867_vm1, %v2862_v39, %v2857_v45  ;;  %v7195_v34 = vld [vmem:[#allocation39_spill] sm:$0xff]  ;;  %v7196_v57 = vld [vmem:[#allocation40_spill] sm:$0xff]  ;;  %v7197_v45 = vld [vmem:[#allocation42_spill] sm:$0xff] }
 0x562   : > { %v2864_v35 = vpack.c.b16 %v2861_v22, %v2861_v22  ;;  %v2865_v17 = vpack.c.b16 %v2863_v47, %v2863_v47  ;;  %v7198_v39 = vld [vmem:[#allocation45_spill] sm:$0xff]  ;;  %v7199_v22 = vld [vmem:[#allocation43_spill] sm:$0xff]  ;;  %v7201_v47 = vld [vmem:[#allocation46_spill] sm:$0xff] }
 0x564   : > { %2876 = vmatmul.bf16.vlgmr.msra.gmra.mxu0 %v2864_v35  ;;  %2902 = vmatmul.bf16.vlgmr.msra.gmra.mxu2 %v2864_v35 }
 0x565   : > { %2889 = vmatmul.bf16.vlgmr.msra.gmra.mxu1 %v2865_v17  ;;  %2915 = vmatmul.bf16.vlgmr.msra.gmra.mxu3 %v2865_v17 }
 0x566   : > { %3074 = vmatpush.bf16.msra.mxu0 %v6834_v41  ;;  %3087 = vmatpush.bf16.msra.mxu1 %v6835_v28 }
 0x567   : > { %3100 = vmatpush.bf16.msra.mxu2 %v6836_v11  ;;  %3113 = vmatpush.bf16.msra.mxu3 %v6837_v56 }
 0x56a   : > { %3075 = vmatpush.bf16.msra.mxu0 %v6838_v19  ;;  %3088 = vmatpush.bf16.msra.mxu1 %v6839_v44 }
 0x56b   : > { %3101 = vmatpush.bf16.msra.mxu2 %v6840_v14  ;;  %3114 = vmatpush.bf16.msra.mxu3 %v6841_v36 }
 0x56e   : > { %3076 = vmatpush.bf16.msra.mxu0 %v6842_v1  ;;  %3089 = vmatpush.bf16.msra.mxu1 %v6843_v42 }
 0x56f   : > { %3102 = vmatpush.bf16.msra.mxu2 %v6844_v48  ;;  %3115 = vmatpush.bf16.msra.mxu3 %v6845_v12 }
 0x572   : > { %3077 = vmatpush.bf16.msra.mxu0 %v6846_v24  ;;  %3090 = vmatpush.bf16.msra.mxu1 %v6847_v31 }
 0x573   : > { %3103 = vmatpush.bf16.msra.mxu2 %v6848_v5  ;;  %3116 = vmatpush.bf16.msra.mxu3 %v6849_v37 }
 0x574   : > { %2928 = vmatmul.bf16.vlgmr.msrb.gmra.mxu0 %v2864_v35  ;;  %2954 = vmatmul.bf16.vlgmr.msrb.gmra.mxu2 %v2864_v35 }
 0x575   : > { %2941 = vmatmul.bf16.vlgmr.msrb.gmra.mxu1 %v2865_v17  ;;  %2967 = vmatmul.bf16.vlgmr.msrb.gmra.mxu3 %v2865_v17 }
 0x576   : > { %3078 = vmatpush.bf16.msra.mxu0 %v6850_v27  ;;  %3091 = vmatpush.bf16.msra.mxu1 %v6851_v52 }
 0x577   : > { %3104 = vmatpush.bf16.msra.mxu2 %v6852_v3  ;;  %3117 = vmatpush.bf16.msra.mxu3 %v6853_v60 }
 0x57a   : > { %3079 = vmatpush.bf16.msra.mxu0 %v5176_v25  ;;  %3092 = vmatpush.bf16.msra.mxu1 %v5185_v38 }
 0x57b   : > { %3105 = vmatpush.bf16.msra.mxu2 %v6854_v40  ;;  %3118 = vmatpush.bf16.msra.mxu3 %v6855_v61 }
 0x57e   : > { %3080 = vmatpush.bf16.msra.mxu0 %v5188_v49  ;;  %3093 = vmatpush.bf16.msra.mxu1 %v5197_v50 }
 0x57f   : > { %3106 = vmatpush.bf16.msra.mxu2 %v5192_v20  ;;  %3119 = vmatpush.bf16.msra.mxu3 %v5194_v55 }
 0x582   : > { %3081 = vmatpush.bf16.msra.mxu0 %v5200_v16  ;;  %3094 = vmatpush.bf16.msra.mxu1 %v5209_v23 }
 0x583   : > { %3107 = vmatpush.bf16.msra.mxu2 %v5204_v33  ;;  %3120 = vmatpush.bf16.msra.mxu3 %v7176_v62 }
 0x585   : > { %3082 = vmatmul.bf16.vlgmr.msra.gmra.mxu0 %v2864_v35  ;;  %3095 = vmatmul.bf16.vlgmr.msra.gmra.mxu1 %v2865_v17 }
 0x586   : > { %3188 = vmatpush.bf16.msrb.mxu0 %v7177_v63  ;;  %3201 = vmatpush.bf16.msrb.mxu1 %v7178_v13  ;;  %v7203_v63 = vld [vmem:[#allocation47_spill] sm:$0xff]  ;;  %v7204_v13 = vld [vmem:[#allocation48_spill] sm:$0xff] }
 0x587   : > { %3108 = vmatmul.bf16.vlgmr.msra.gmra.mxu2 %v2864_v35  ;;  %3121 = vmatmul.bf16.vlgmr.msra.gmra.mxu3 %v2865_v17  ;;  %v7200_v35 = vld [vmem:[#allocation44_spill] sm:$0xff]  ;;  %v7202_v17 = vld [vmem:[#allocation49_spill] sm:$0xff] }
 0x588   : > { %3214 = vmatpush.bf16.msrb.mxu2 %v7179_v21  ;;  %3227 = vmatpush.bf16.msrb.mxu3 %v7180_v9  ;;  %v7205_v21 = vld [vmem:[#allocation50_spill] sm:$0xff]  ;;  %v7206_v9 = vld [vmem:[#allocation56_spill] sm:$0xff] }
 0x58a   : > { %3189 = vmatpush.bf16.msrb.mxu0 %v7181_v58  ;;  %3202 = vmatpush.bf16.msrb.mxu1 %v7182_v29  ;;  %v7207_v58 = vld [vmem:[#allocation53_spill] sm:$0xff] }
 0x58b   : > { %v7208_v29 = vld [vmem:[#allocation57_spill] sm:$0xff] }
 0x58c   : > { %3215 = vmatpush.bf16.msrb.mxu2 %v7183_v51  ;;  %3228 = vmatpush.bf16.msrb.mxu3 %v7184_v54  ;;  %v7209_v51 = vld [vmem:[#allocation51_spill] sm:$0xff]  ;;  %v7210_v54 = vld [vmem:[#allocation52_spill] sm:$0xff] }
 0x58e   : > { %3190 = vmatpush.bf16.msrb.mxu0 %v7185_v43  ;;  %3203 = vmatpush.bf16.msrb.mxu1 %v7186_v46  ;;  %v7211_v43 = vld [vmem:[#allocation54_spill] sm:$0xff]  ;;  %v7212_v46 = vld [vmem:[#allocation55_spill] sm:$0xff] }
 0x590   : > { %3216 = vmatpush.bf16.msrb.mxu2 %v7187_v10  ;;  %3229 = vmatpush.bf16.msrb.mxu3 %v7188_v53  ;;  %v7213_v10 = vld [vmem:[#allocation59_spill] sm:$0xff]  ;;  %v7214_v53 = vld [vmem:[#allocation62_spill] sm:$0xff] }
 0x592   : > { %3191 = vmatpush.bf16.msrb.mxu0 %v7189_v2  ;;  %3204 = vmatpush.bf16.msrb.mxu1 %v7190_v32  ;;  %v7215_v2 = vld [vmem:[#allocation60_spill] sm:$0xff]  ;;  %v7216_v32 = vld [vmem:[#allocation61_spill] sm:$0xff] }
 0x594   : > { %3217 = vmatpush.bf16.msrb.mxu2 %v7191_v15  ;;  %3230 = vmatpush.bf16.msrb.mxu3 %v7192_v4  ;;  %v7217_v15 = vld [vmem:[#allocation63_spill] sm:$0xff]  ;;  %v7218_v4 = vld [vmem:[#allocation66_spill] sm:$0xff] }
 0x596   : > { %3192 = vmatpush.bf16.msrb.mxu0 %v7193_v18  ;;  %3205 = vmatpush.bf16.msrb.mxu1 %v7194_v6  ;;  %v7219_v18 = vld [vmem:[#allocation64_spill] sm:$0xff]  ;;  %v7220_v6 = vld [vmem:[#allocation65_spill] sm:$0xff] }
 0x598   : > { %3218 = vmatpush.bf16.msrb.mxu2 %v7195_v34  ;;  %3231 = vmatpush.bf16.msrb.mxu3 %v7196_v57  ;;  %v7221_v34 = vld [vmem:[#allocation67_spill] sm:$0xff]  ;;  %v7222_v57 = vld [vmem:[#allocation70_spill] sm:$0xff] }
 0x59a   : > { %3193 = vmatpush.bf16.msrb.mxu0 %v7197_v45  ;;  %3206 = vmatpush.bf16.msrb.mxu1 %v7198_v39  ;;  %v7223_v45 = vld [vmem:[#allocation68_spill] sm:$0xff]  ;;  %v7224_v39 = vld [vmem:[#allocation69_spill] sm:$0xff] }
 0x59c   : > { %3219 = vmatpush.bf16.msrb.mxu2 %v7199_v22  ;;  %3232 = vmatpush.bf16.msrb.mxu3 %v7200_v35  ;;  %v7225_v22 = vld [vmem:[#allocation71_spill] sm:$0xff]  ;;  %v7226_v35 = vld [vmem:[#allocation74_spill] sm:$0xff] }
 0x59e   : > { %3194 = vmatpush.bf16.msrb.mxu0 %v7201_v47  ;;  %3207 = vmatpush.bf16.msrb.mxu1 %v7202_v17  ;;  %v7227_v47 = vld [vmem:[#allocation72_spill] sm:$0xff]  ;;  %v7228_v17 = vld [vmem:[#allocation73_spill] sm:$0xff] }
 0x5a0   : > { %3220 = vmatpush.bf16.msrb.mxu2 %v7203_v63  ;;  %3233 = vmatpush.bf16.msrb.mxu3 %v7204_v13  ;;  %v7229_v63 = vld [vmem:[#allocation75_spill] sm:$0xff]  ;;  %v7230_v13 = vld [vmem:[#allocation78_spill] sm:$0xff] }
 0x5a2   : > { %3195 = vmatpush.bf16.msrb.mxu0 %v7205_v21  ;;  %3208 = vmatpush.bf16.msrb.mxu1 %v7206_v9  ;;  %v7231_v21 = vld [vmem:[#allocation76_spill] sm:$0xff]  ;;  %v7232_v9 = vld [vmem:[#allocation77_spill] sm:$0xff] }
 0x5a4   : > { %3221 = vmatpush.bf16.msrb.mxu2 %v7209_v51  ;;  %3234 = vmatpush.bf16.msrb.mxu3 %v7210_v54  ;;  %v7235_v51 = vld [vmem:[#allocation80_spill] sm:$0xff]  ;;  %v7236_v54 = vld [vmem:[#allocation81_spill] sm:$0xff] }
 0x5a6   : > { %3240 = vmatpush.bf16.msra.mxu0 %v7207_v58  ;;  %3253 = vmatpush.bf16.msra.mxu1 %v7208_v29  ;;  %v7233_v58 = vld [vmem:[#allocation79_spill] sm:$0xff]  ;;  %v7234_v29 = vld [vmem:[#allocation82_spill] sm:$0xff] }
 0x5a8   : > { %3266 = vmatpush.bf16.msra.mxu2 %v7211_v43  ;;  %3279 = vmatpush.bf16.msra.mxu3 %v7212_v46  ;;  %v7237_v43 = vld [vmem:[#allocation83_spill] sm:$0xff]  ;;  %v7238_v46 = vld [vmem:[#allocation89_spill] sm:$0xff] }
 0x5aa   : > { %3241 = vmatpush.bf16.msra.mxu0 %v7213_v10  ;;  %3254 = vmatpush.bf16.msra.mxu1 %v7214_v53  ;;  %v7239_v10 = vld [vmem:[#allocation84_spill] sm:$0xff]  ;;  %v7240_v53 = vld [vmem:[#allocation85_spill] sm:$0xff] }
 0x5ac   : > { %3267 = vmatpush.bf16.msra.mxu2 %v7215_v2  ;;  %3280 = vmatpush.bf16.msra.mxu3 %v7216_v32 }
 0x5ae   : > { %3242 = vmatpush.bf16.msra.mxu0 %v7217_v15  ;;  %3255 = vmatpush.bf16.msra.mxu1 %v7218_v4  ;;  %v4118_v4 = vld [vmem:[%s4893_s28 + $0x6] ss:$8 sm:$0xf] }
 0x5b0   : > { %3268 = vmatpush.bf16.msra.mxu2 %v7219_v18  ;;  %3281 = vmatpush.bf16.msra.mxu3 %v7220_v6  ;;  %v4119_v18 = vld [vmem:[%s4893_s28 + $0x6] ss:$8 sm:$0x30] }
 0x5b2   : > { %3243 = vmatpush.bf16.msra.mxu0 %v7221_v34  ;;  %3256 = vmatpush.bf16.msra.mxu1 %v7222_v57  ;;  %v4120_v34 = vld [vmem:[%s4893_s28 + $0x36] ss:$8 sm:$0xf] }
 0x5b3   : > { %v4121_v57 = vld [vmem:[%s4893_s28 + $0x36] ss:$8 sm:$0x30] }
 0x5b4   : > { %3269 = vmatpush.bf16.msra.mxu2 %v7223_v45  ;;  %3282 = vmatpush.bf16.msra.mxu3 %v7224_v39 }
 0x5b6   : > { %3244 = vmatpush.bf16.msra.mxu0 %v7225_v22  ;;  %3257 = vmatpush.bf16.msra.mxu1 %v7226_v35  ;;  %v6305_v22 = vor.u32 %v4119_v18, %v4118_v4 }
 0x5b8   : > { %3270 = vmatpush.bf16.msra.mxu2 %v7227_v47  ;;  %3283 = vmatpush.bf16.msra.mxu3 %v7228_v17 }
 0x5ba   : > { %3245 = vmatpush.bf16.msra.mxu0 %v7229_v63  ;;  %3258 = vmatpush.bf16.msra.mxu1 %v7230_v13  ;;  %v6307_v63 = vor.u32 %v4121_v57, %v4120_v34  ;;  %v3022_v57 = vrot.slane %v6305_v22, 2 }
 0x5bc   : > { %3271 = vmatpush.bf16.msra.mxu2 %v7231_v21  ;;  %3284 = vmatpush.bf16.msra.mxu3 %v7232_v9 }
 0x5be   : > { %3246 = vmatpush.bf16.msra.mxu0 %v7233_v58  ;;  %3259 = vmatpush.bf16.msra.mxu1 %v7234_v29 }
 0x5c0   : > { %3272 = vmatpush.bf16.msra.mxu2 %v7235_v51  ;;  %3285 = vmatpush.bf16.msra.mxu3 %v7236_v54 }
 0x5c2   : > { %3247 = vmatpush.bf16.msra.mxu0 %v7237_v43  ;;  %3260 = vmatpush.bf16.msra.mxu1 %v7238_v46 }
 0x5c4   : > { %3273 = vmatpush.bf16.msra.mxu2 %v7239_v10  ;;  %3286 = vmatpush.bf16.msra.mxu3 %v7240_v53 }
 0x5e1   : > { %v2877_v2 = vpop.f32.mrf.mxu0 }
 0x5e2   : > { %v2890_v32 = vpop.f32.mrf.mxu1 }
 0x5e3   : > { %v2891_v47 = vadd.f32 %v2890_v32, %v2877_v2 }
 0x5e7   : > { %v2903_v15 = vpop.f32.mrf.mxu2 }
 0x5e8   : > { %v2916_v6 = vpop.f32.mrf.mxu3 }
 0x5e9   : > { %v2917_v45 = vadd.f32 %v2916_v6, %v2903_v15  ;;  %v2879_v39 = vpop.f32.mrf.mxu0 }
 0x5ea   : > { %v2892_v35 = vpop.f32.mrf.mxu1 }
 0x5eb   : > { %v2974_v17 = vrot.slane %v2917_v45, 7 }
 0x5ed   : > { %v2975_v13 = vsel %vm865_vm0, %v2891_v47, %v2974_v17  ;;  %v2976_v21 = vsel %vm867_vm1, %v2891_v47, %v2974_v17  ;;  %v3023_v17 = vrot.slane %v6307_v63, 2 }
 0x5ee   : > { %v2977_v9 = vrot.slane %v2976_v21, 1  ;;  %v2980_v58 = vadd.f32 %v2975_v13, %v6305_v22 }
 0x5ef   : > { %v2905_v29 = vpop.f32.mrf.mxu2 }
 0x5f0   : > { %v2981_v51 = vadd.f32 %v2977_v9, %v6307_v63  ;;  %v4122_v54 = vmul.f32 -1.442695, %v2980_v58  ;;  %v2918_v43 = vpop.f32.mrf.mxu3 }
 0x5f1   : > { %v2929_v46 = vpop.f32.mrf.mxu0 }
 0x5f2   : > { %4456 = vpow2.f32 %v4122_v54  ;;  %v4123_v10 = vmul.f32 -1.442695, %v2981_v51  ;;  %v2942_v53 = vpop.f32.mrf.mxu1 }
 0x5f3   : > { %v2943_v35 = vadd.f32 %v2942_v53, %v2929_v46 }
 0x5f4   : > { %4458 = vpow2.f32 %v4123_v10 }
 0x5f7   : > { %v2955_v2 = vpop.f32.mrf.mxu2 }
 0x5f8   : > { %v4457_v32 = vpop.eup %4456  ;;  %v2968_v15 = vpop.f32.mrf.mxu3 }
 0x5f9   : > { %v2988_v4 = vadd.f32 1.0, %v4457_v32  ;;  %v2969_v18 = vadd.f32 %v2968_v15, %v2955_v2  ;;  %v2931_v6 = vpop.f32.mrf.mxu0 }
 0x5fa   : > { %v4459_v34 = vpop.eup %4458  ;;  %v2944_v45 = vpop.f32.mrf.mxu1 }
 0x5fb   : > { %v6314_v39 = vadd.f32 1.0, %v4459_v34  ;;  %4460 = vrcp.f32 %v2988_v4  ;;  %v3028_v47 = vrot.slane %v2969_v18, 7  ;;  %vm2995_vm9 = vweird.f32 %v2988_v4 }
 0x5fd   : > { %4462 = vrcp.f32 %v6314_v39  ;;  %v3029_v13 = vsel %vm865_vm0, %v2943_v35, %v3028_v47  ;;  %v3030_v21 = vsel %vm867_vm1, %v2943_v35, %v3028_v47  ;;  %vm3010_vm13 = vweird.f32 %v6314_v39 }
 0x5fe   : > { %v3031_v9 = vrot.slane %v3030_v21, 1  ;;  %v3034_v58 = vadd.f32 %v3029_v13, %v3022_v57 }
 0x5ff   : > { %v2957_v29 = vpop.f32.mrf.mxu2 }
 0x600   : > { %v3035_v51 = vadd.f32 %v3031_v9, %v3023_v17  ;;  %v4124_v54 = vmul.f32 -1.442695, %v3034_v58  ;;  %v2970_v43 = vpop.f32.mrf.mxu3  ;;  %v7241_v58 = vld [vmem:[#allocation110_spill] sm:$0xff] }
 0x601   : > { %v4461_v10 = vpop.eup %4460  ;;  %v2999_v43 = vand.u32 2147483647, %v2988_v4 }
 0x602   : > { %4464 = vpow2.f32 %v4124_v54  ;;  %v4125_v2 = vmul.f32 -1.442695, %v3035_v51  ;;  %v3083_v32 = vpop.f32.mrf.mxu0  ;;  %v3096_v46 = vpop.f32.mrf.mxu1  ;;  %v2991_v53 = vmul.f32 %v4461_v10, %v2988_v4  ;;  %vm2996_vm10 = vweird.f32 %v4461_v10  ;;  %v7242_v51 = vld [vmem:[#allocation111_spill] sm:$0xff] }
 0x603   : > { %v4463_v15 = vpop.eup %4462  ;;  %v3084_v29 = vadd.f32 %v3083_v32, %v7241_v58  ;;  %vm2997_vm12 = vmor %vm2995_vm9, %vm2996_vm10  ;;  %v3014_v32 = vand.u32 2147483647, %v6314_v39  ;;  %vm3000_vm14 = vcmp.eq.f32.partialorder %v2999_v43, 8.507059e+37 }
 0x604   : > { %4466 = vpow2.f32 %v4125_v2  ;;  %v2992_v18 = vsub.f32 1.0, %v2991_v53  ;;  %v3006_v6 = vmul.f32 %v4463_v15, %v6314_v39  ;;  %v3001_v2 = vand.u32 2147483648, %v2988_v4 }
 0x605   : > { %vm3011_vm11 = vweird.f32 %v4463_v15  ;;  %vm3015_vm15 = vcmp.eq.f32.partialorder %v3014_v32, 8.507059e+37 }
 0x606   : > { %v2993_v34 = vmul.f32 %v4461_v10, %v2992_v18  ;;  %v3007_v45 = vsub.f32 1.0, %v3006_v6  ;;  %vm6329_vm4 = vmor %vm3010_vm13, %vm3011_vm11  ;;  %vm3503_vm11 = vcmask 1045504  }
 0x608   : > { %v4465_v35 = vpop.eup %4464  ;;  %v3008_v47 = vmul.f32 %v4463_v15, %v3007_v45  ;;  %v2994_v13 = vadd.f32 %v4461_v10, %v2993_v34  ;;  %v3016_v34 = vand.u32 2147483648, %v6314_v39 }
 0x609   : > { %v6321_v57 = vadd.f32 1.0, %v4465_v35 }
 0x60a   : > { %v3109_v17 = vpop.f32.mrf.mxu2  ;;  %v3122_v21 = vpop.f32.mrf.mxu3  ;;  %v3009_v6 = vadd.f32 %v4463_v15, %v3008_v47  ;;  %v2998_v35 = vsel %vm2997_vm12, %v4461_v10, %v2994_v13 }
 0x60b   : > { %v4467_v9 = vpop.eup %4466  ;;  %v3110_v54 = vadd.f32 %v3109_v17, %v7242_v51  ;;  %v3085_v53 = vpop.f32.mrf.mxu0  ;;  %4468 = vrcp.f32 %v6321_v57  ;;  %v3097_v17 = vadd.f32 %v3096_v46, %v3084_v29  ;;  %v3002_v51 = vor.u32 1.1754944e-38, %v3001_v2 }
 0x60c   : > { %v3098_v62 = vpop.f32.mrf.mxu1  ;;  %v3043_v18 = vadd.f32 1.0, %v4467_v9  ;;  %v3013_v47 = vsel %vm6329_vm4, %v4463_v15, %v3009_v6  ;;  %v3136_v9 = vrot.slane %v6305_v22, 4  ;;  %v3137_v2 = vrot.slane %v6307_v63, 4 }
 0x60d   : > { %v3123_v45 = vadd.f32 %v3122_v21, %v3110_v54  ;;  %v3003_v21 = vsel %vm3000_vm14, %v3002_v51, %v2998_v35  ;;  %v3017_v54 = vor.u32 1.1754944e-38, %v3016_v34  ;;  %v3055_v35 = vand.u32 2147483648, %v6321_v57 }
 0x60e   : > { %4470 = vrcp.f32 %v3043_v18  ;;  %vm3049_vm3 = vweird.f32 %v6321_v57  ;;  %v3070_v63 = vand.u32 2147483648, %v3043_v18  ;;  %vm3064_vm7 = vweird.f32 %v3043_v18 }
 0x60f   : > { %v3128_v62 = vrot.slane %v3123_v45, 7  ;;  %v3018_v4 = vsel %vm3015_vm15, %v3017_v54, %v3013_v47  ;;  %v3068_v54 = vand.u32 2147483647, %v3043_v18 }
 0x611   : > { %v3129_v10 = vsel %vm865_vm0, %v3097_v17, %v3128_v62  ;;  %v3130_v13 = vsel %vm867_vm1, %v3097_v17, %v3128_v62  ;;  %v4469_v39 = vpop.eup %4468  ;;  %v3053_v62 = vand.u32 2147483647, %v6321_v57  ;;  %vm3069_vm10 = vcmp.eq.f32.partialorder %v3068_v54, 8.507059e+37 }
 0x612   : > { %v3131_v46 = vrot.slane %v3130_v13, 1  ;;  %v3134_v29 = vmul.f32 %v3129_v10, %v3003_v21  ;;  %v3111_v53 = vpop.f32.mrf.mxu2  ;;  %v3124_v45 = vpop.f32.mrf.mxu3  ;;  %v3045_v43 = vmul.f32 %v4469_v39, %v6321_v57  ;;  %vm3050_vm2 = vweird.f32 %v4469_v39 }
 0x613   : > { %vm3051_vm6 = vmor %vm3049_vm3, %vm3050_vm2  ;;  %vm3054_vm8 = vcmp.eq.f32.partialorder %v3053_v62, 8.507059e+37 }
 0x614   : > { %v4471_v15 = vpop.eup %4470  ;;  %v3135_v6 = vmul.f32 %v3131_v46, %v3018_v4  ;;  %v3140_v22 = vadd.f32 %v3136_v9, %v3134_v29  ;;  %v3046_v51 = vsub.f32 1.0, %v3045_v43  ;;  %v3056_v9 = vor.u32 1.1754944e-38, %v3055_v35 }
 0x615   : > { %v3060_v34 = vmul.f32 %v4471_v15, %v3043_v18  ;;  %vm3065_vm5 = vweird.f32 %v4471_v15  ;;  %v3071_v29 = vor.u32 1.1754944e-38, %v3070_v63 }
 0x616   : > { %v3141_v58 = vadd.f32 %v3137_v2, %v3135_v6  ;;  %4472 = vtanh.f32 %v3140_v22  ;;  %v3047_v17 = vmul.f32 %v4469_v39, %v3046_v51  ;;  %vm3066_vm9 = vmor %vm3064_vm7, %vm3065_vm5 }
 0x617   : > { %v3061_v32 = vsub.f32 1.0, %v3060_v34 }
 0x618   : > { %4474 = vtanh.f32 %v3141_v58  ;;  %v3048_v47 = vadd.f32 %v4469_v39, %v3047_v17 }
 0x619   : > { %v3062_v21 = vmul.f32 %v4471_v15, %v3061_v32 }
 0x61a   : > { %v3052_v10 = vsel %vm3051_vm6, %v4469_v39, %v3048_v47 }
 0x61b   : > { %v3063_v13 = vadd.f32 %v4471_v15, %v3062_v21  ;;  %v3057_v2 = vsel %vm3054_vm8, %v3056_v9, %v3052_v10 }
 0x61c   : > { %v4473_v46 = vpop.eup %4472 }
 0x61d   : > { %v3067_v53 = vsel %vm3066_vm9, %v4471_v15, %v3063_v13  ;;  %v3144_v57 = vsub.f32 %v6183_v26, %v4473_v46 }
 0x61e   : > { %v4475_v45 = vpop.eup %4474  ;;  %v3072_v58 = vsel %vm3069_vm10, %v3071_v29, %v3067_v53 }
 0x61f   : > { %v3145_v43 = vsub.f32 %v6185_v59, %v4475_v45  ;;  %v3146_v4 = vmul.f32 %v3144_v57, %v3057_v2 }
 0x621   : > { %v3147_v6 = vmul.f32 %v3145_v43, %v3072_v58  ;;  %v6345_v22 = vadd.f32 %v4473_v46, %v3146_v4 }
 0x623   : > { %v6347_v18 = vadd.f32 %v4475_v45, %v3147_v6  ;;  %v3160_v39 = vperm.slane %v6345_v22, 0  ;;  %v3161_v51 = vperm.slane %v6345_v22, 1 }
 0x625   : > { %v3162_v15 = vperm.slane %v6347_v18, 0  ;;  %v3163_v34 = vperm.slane %v6347_v18, 1  ;;  %v6354_v26 = vsel %vm3503_vm11, %v6192_v30, %v3160_v39  ;;  %v6357_v59 = vsel %vm3503_vm11, %v6195_v8, %v3161_v51 }
 0x626   : > { %v3168_v35 = vpack.c.bf16 %v3160_v39, %v3160_v39  ;;  %v3169_v63 = vpack.c.bf16 %v3161_v51, %v3161_v51 }
 0x627   : > { %v6360_v17 = vsel %vm3503_vm11, %v6198_v0, %v3162_v15  ;;  %v6363_v32 = vsel %vm3503_vm11, %v6201_v7, %v3163_v34  ;;  %v3170_v62 = vpack.c.bf16 %v3162_v15, %v3162_v15  ;;  %v3171_v21 = vpack.c.bf16 %v3163_v34, %v3163_v34 }
 0x628   : > { %v3176_v9 = vunpack.c.l.b16 %v3168_v35  ;;  %v3177_v13 = vunpack.c.l.b16 %v3169_v63 }
 0x629   : > { %v3178_v47 = vunpack.c.l.b16 %v3170_v62  ;;  %v3179_v54 = vunpack.c.l.b16 %v3171_v21 }
 0x62b   : > { %v3180_v10 = vrot.slane %v3178_v47, 7  ;;  %v3182_v30 = vrot.slane %v3179_v54, 7 }
 0x62d   : > { %v3181_v46 = vsel %vm867_vm1, %v3180_v10, %v3176_v9  ;;  %v3183_v29 = vsel %vm867_vm1, %v3182_v30, %v3177_v13 }
 0x62e   : > { %v3184_v8 = vpack.c.b16 %v3181_v46, %v3181_v46  ;;  %v3185_v2 = vpack.c.b16 %v3183_v29, %v3183_v29 }
 0x630   : > { %3196 = vmatmul.bf16.vlgmr.msrb.gmra.mxu0 %v3184_v8  ;;  %3222 = vmatmul.bf16.vlgmr.msrb.gmra.mxu2 %v3184_v8 }
 0x631   : > { %3209 = vmatmul.bf16.vlgmr.msrb.gmra.mxu1 %v3185_v2  ;;  %3235 = vmatmul.bf16.vlgmr.msrb.gmra.mxu3 %v3185_v2 }
 0x632   : > { %3394 = vmatpush.bf16.msrb.mxu0 %v6834_v41  ;;  %3407 = vmatpush.bf16.msrb.mxu1 %v6835_v28  ;;  %v4127_v41 = vld [vmem:[%s4893_s28 + $0x7] ss:$8 sm:$0x30] }
 0x633   : > { %3420 = vmatpush.bf16.msrb.mxu2 %v6836_v11  ;;  %3433 = vmatpush.bf16.msrb.mxu3 %v6837_v56  ;;  %v4129_v11 = vld [vmem:[%s4893_s28 + $0x37] ss:$8 sm:$0x30] }
 0x636   : > { %3395 = vmatpush.bf16.msrb.mxu0 %v6838_v19  ;;  %3408 = vmatpush.bf16.msrb.mxu1 %v6839_v44 }
 0x637   : > { %3421 = vmatpush.bf16.msrb.mxu2 %v6840_v14  ;;  %3434 = vmatpush.bf16.msrb.mxu3 %v6841_v36 }
 0x63a   : > { %3396 = vmatpush.bf16.msrb.mxu0 %v6842_v1  ;;  %3409 = vmatpush.bf16.msrb.mxu1 %v6843_v42 }
 0x63b   : > { %3422 = vmatpush.bf16.msrb.mxu2 %v6844_v48  ;;  %3435 = vmatpush.bf16.msrb.mxu3 %v6845_v12 }
 0x63e   : > { %3397 = vmatpush.bf16.msrb.mxu0 %v6846_v24  ;;  %3410 = vmatpush.bf16.msrb.mxu1 %v6847_v31 }
 0x63f   : > { %3423 = vmatpush.bf16.msrb.mxu2 %v6848_v5  ;;  %3436 = vmatpush.bf16.msrb.mxu3 %v6849_v37 }
 0x640   : > { %3248 = vmatmul.bf16.vlgmr.msra.gmra.mxu0 %v3184_v8  ;;  %3274 = vmatmul.bf16.vlgmr.msra.gmra.mxu2 %v3184_v8 }
 0x641   : > { %3261 = vmatmul.bf16.vlgmr.msra.gmra.mxu1 %v3185_v2  ;;  %3287 = vmatmul.bf16.vlgmr.msra.gmra.mxu3 %v3185_v2 }
 0x642   : > { %3398 = vmatpush.bf16.msrb.mxu0 %v6850_v27  ;;  %3411 = vmatpush.bf16.msrb.mxu1 %v6851_v52 }
 0x643   : > { %3424 = vmatpush.bf16.msrb.mxu2 %v6852_v3  ;;  %3437 = vmatpush.bf16.msrb.mxu3 %v6853_v60 }
 0x646   : > { %3399 = vmatpush.bf16.msrb.mxu0 %v5176_v25  ;;  %3412 = vmatpush.bf16.msrb.mxu1 %v5185_v38  ;;  %v7245_v25 = vld [vmem:[#allocation109_spill] sm:$0xff] }
 0x647   : > { %3425 = vmatpush.bf16.msrb.mxu2 %v6854_v40  ;;  %3438 = vmatpush.bf16.msrb.mxu3 %v6855_v61 }
 0x64a   : > { %3400 = vmatpush.bf16.msrb.mxu0 %v5188_v49  ;;  %3413 = vmatpush.bf16.msrb.mxu1 %v5197_v50 }
 0x64b   : > { %3426 = vmatpush.bf16.msrb.mxu2 %v5192_v20  ;;  %3439 = vmatpush.bf16.msrb.mxu3 %v5194_v55  ;;  %v4126_v20 = vld [vmem:[%s4893_s28 + $0x7] ss:$8 sm:$0xf] }
 0x64c   : > { %v4128_v55 = vld [vmem:[%s4893_s28 + $0x37] ss:$8 sm:$0xf]  ;;  %v6403_v19 = vor.u32 %v4127_v41, %v4126_v20 }
 0x64d   : > { %v6405_v14 = vor.u32 %v4129_v11, %v4128_v55  ;;  %v7246_v55 = vld [vmem:[#allocation110_spill] sm:$0xff] }
 0x64e   : > { %3401 = vmatpush.bf16.msrb.mxu0 %v5200_v16  ;;  %3414 = vmatpush.bf16.msrb.mxu1 %v5209_v23  ;;  %v3342_v57 = vrot.slane %v6403_v19, 2 }
 0x64f   : > { %3427 = vmatpush.bf16.msrb.mxu2 %v5204_v33  ;;  %3440 = vmatpush.bf16.msrb.mxu3 %v7245_v25  ;;  %v3343_v6 = vrot.slane %v6405_v14, 2 }
 0x651   : > { %3402 = vmatmul.bf16.vlgmr.msrb.gmra.mxu0 %v3184_v8  ;;  %3415 = vmatmul.bf16.vlgmr.msrb.gmra.mxu1 %v3185_v2 }
 0x652   : > { %3428 = vmatmul.bf16.vlgmr.msrb.gmra.mxu2 %v3184_v8  ;;  %3441 = vmatmul.bf16.vlgmr.msrb.gmra.mxu3 %v3185_v2 }
 0x6ad   : > { %v3197_v38 = vpop.f32.mrf.mxu0 }
 0x6ae   : > { %v3210_v49 = vpop.f32.mrf.mxu1 }
 0x6af   : > { %v3211_v33 = vadd.f32 %v3210_v49, %v3197_v38 }
 0x6b3   : > { %v3223_v50 = vpop.f32.mrf.mxu2 }
 0x6b4   : > { %v3236_v28 = vpop.f32.mrf.mxu3 }
 0x6b5   : > { %v3237_v56 = vadd.f32 %v3236_v28, %v3223_v50  ;;  %v3199_v16 = vpop.f32.mrf.mxu0 }
 0x6b6   : > { %v3212_v23 = vpop.f32.mrf.mxu1 }
 0x6b7   : > { %v3294_v44 = vrot.slane %v3237_v56, 7  ;;  %v7247_v56 = vld [vmem:[#allocation111_spill] sm:$0xff] }
 0x6b9   : > { %v3295_v36 = vsel %vm865_vm0, %v3211_v33, %v3294_v44  ;;  %v3296_v1 = vsel %vm867_vm1, %v3211_v33, %v3294_v44 }
 0x6ba   : > { %v3297_v42 = vrot.slane %v3296_v1, 1  ;;  %v3300_v48 = vadd.f32 %v3295_v36, %v6403_v19 }
 0x6bb   : > { %v3225_v12 = vpop.f32.mrf.mxu2 }
 0x6bc   : > { %v3301_v24 = vadd.f32 %v3297_v42, %v6405_v14  ;;  %v4130_v31 = vmul.f32 -1.442695, %v3300_v48  ;;  %v3238_v5 = vpop.f32.mrf.mxu3 }
 0x6bd   : > { %v3249_v37 = vpop.f32.mrf.mxu0 }
 0x6be   : > { %4476 = vpow2.f32 %v4130_v31  ;;  %v4131_v27 = vmul.f32 -1.442695, %v3301_v24  ;;  %v3262_v52 = vpop.f32.mrf.mxu1 }
 0x6bf   : > { %v3263_v43 = vadd.f32 %v3262_v52, %v3249_v37 }
 0x6c0   : > { %4478 = vpow2.f32 %v4131_v27 }
 0x6c3   : > { %v3275_v3 = vpop.f32.mrf.mxu2 }
 0x6c4   : > { %v4477_v60 = vpop.eup %4476  ;;  %v3288_v40 = vpop.f32.mrf.mxu3 }
 0x6c5   : > { %v3308_v61 = vadd.f32 1.0, %v4477_v60  ;;  %v3289_v0 = vadd.f32 %v3288_v40, %v3275_v3  ;;  %v3251_v7 = vpop.f32.mrf.mxu0  ;;  %v3456_v60 = vrot.slane %v6403_v19, 4 }
 0x6c6   : > { %v4479_v53 = vpop.eup %4478  ;;  %v3264_v45 = vpop.f32.mrf.mxu1 }
 0x6c7   : > { %v6412_v58 = vadd.f32 1.0, %v4479_v53  ;;  %4480 = vrcp.f32 %v3308_v61  ;;  %v3348_v4 = vrot.slane %v3289_v0, 7  ;;  %vm3315_vm12 = vweird.f32 %v3308_v61 }
 0x6c8   : > { %v3319_v23 = vand.u32 2147483647, %v3308_v61  ;;  %v3321_v33 = vand.u32 2147483648, %v3308_v61 }
 0x6c9   : > { %4482 = vrcp.f32 %v6412_v58  ;;  %v3349_v39 = vsel %vm865_vm0, %v3263_v43, %v3348_v4  ;;  %v3350_v51 = vsel %vm867_vm1, %v3263_v43, %v3348_v4  ;;  %v3336_v48 = vand.u32 2147483648, %v6412_v58 }
 0x6ca   : > { %v3351_v15 = vrot.slane %v3350_v51, 1  ;;  %v3354_v34 = vadd.f32 %v3349_v39, %v3342_v57  ;;  %vm3330_vm15 = vweird.f32 %v6412_v58  ;;  %v3334_v31 = vand.u32 2147483647, %v6412_v58 }
 0x6cb   : > { %v3277_v35 = vpop.f32.mrf.mxu2  ;;  %v3322_v37 = vor.u32 1.1754944e-38, %v3321_v33  ;;  %vm3320_vm3 = vcmp.eq.f32.partialorder %v3319_v23, 8.507059e+37 }
 0x6cc   : > { %v3355_v62 = vadd.f32 %v3351_v15, %v3343_v6  ;;  %v4132_v63 = vmul.f32 -1.442695, %v3354_v34  ;;  %v3290_v21 = vpop.f32.mrf.mxu3  ;;  %vm3335_vm5 = vcmp.eq.f32.partialorder %v3334_v31, 8.507059e+37 }
 0x6cd   : > { %v4481_v47 = vpop.eup %4480 }
 0x6ce   : > { %4484 = vpow2.f32 %v4132_v63  ;;  %v4133_v54 = vmul.f32 -1.442695, %v3355_v62  ;;  %v3403_v9 = vpop.f32.mrf.mxu0  ;;  %v3416_v10 = vpop.f32.mrf.mxu1  ;;  %v3311_v13 = vmul.f32 %v4481_v47, %v3308_v61  ;;  %vm3316_vm13 = vweird.f32 %v4481_v47 }
 0x6cf   : > { %v4483_v30 = vpop.eup %4482  ;;  %v3404_v11 = vadd.f32 %v3403_v9, %v7246_v55  ;;  %vm3317_vm14 = vmor %vm3315_vm12, %vm3316_vm13  ;;  %v3337_v61 = vor.u32 1.1754944e-38, %v3336_v48  ;;  %vm3508_vm12 = vcmask 1046528  }
 0x6d0   : > { %4486 = vpow2.f32 %v4133_v54  ;;  %v3312_v46 = vsub.f32 1.0, %v3311_v13  ;;  %v3326_v8 = vmul.f32 %v4483_v30, %v6412_v58  ;;  %vm3331_vm4 = vweird.f32 %v4483_v30 }
 0x6d1   : > { %v3417_v5 = vadd.f32 %v3416_v10, %v3404_v11  ;;  %vm6427_vm2 = vmor %vm3330_vm15, %vm3331_vm4  ;;  %v3457_v58 = vrot.slane %v6405_v14, 4 }
 0x6d2   : > { %v3313_v29 = vmul.f32 %v4481_v47, %v3312_v46  ;;  %v3327_v2 = vsub.f32 1.0, %v3326_v8 }
 0x6d4   : > { %v4485_v25 = vpop.eup %4484  ;;  %v3328_v38 = vmul.f32 %v4483_v30, %v3327_v2  ;;  %v3314_v20 = vadd.f32 %v4481_v47, %v3313_v29 }
 0x6d5   : > { %v6419_v49 = vadd.f32 1.0, %v4485_v25  ;;  %v3429_v50 = vpop.f32.mrf.mxu2  ;;  %v3442_v41 = vpop.f32.mrf.mxu3 }
 0x6d6   : > { %v4487_v28 = vpop.eup %4486  ;;  %v3430_v16 = vadd.f32 %v3429_v50, %v7247_v56  ;;  %v3405_v44 = vpop.f32.mrf.mxu0  ;;  %v3329_v42 = vadd.f32 %v4483_v30, %v3328_v38  ;;  %v3318_v24 = vsel %vm3317_vm14, %v4481_v47, %v3314_v20 }
 0x6d7   : > { %v3418_v36 = vpop.f32.mrf.mxu1  ;;  %v3363_v1 = vadd.f32 1.0, %v4487_v28  ;;  %4488 = vrcp.f32 %v6419_v49  ;;  %v3323_v40 = vsel %vm3320_vm3, %v3322_v37, %v3318_v24  ;;  %v3375_v62 = vand.u32 2147483648, %v6419_v49 }
 0x6d8   : > { %v3443_v12 = vadd.f32 %v3442_v41, %v3430_v16  ;;  %v3333_v3 = vsel %vm6427_vm2, %v4483_v30, %v3329_v42  ;;  %v3373_v54 = vand.u32 2147483647, %v6419_v49 }
 0x6d9   : > { %4490 = vrcp.f32 %v3363_v1  ;;  %v3338_v39 = vsel %vm3335_vm5, %v3337_v61, %v3333_v3  ;;  %v3390_v14 = vand.u32 2147483648, %v3363_v1  ;;  %v3388_v13 = vand.u32 2147483647, %v3363_v1 }
 0x6da   : > { %v3448_v52 = vrot.slane %v3443_v12, 7  ;;  %v3376_v30 = vor.u32 1.1754944e-38, %v3375_v62  ;;  %vm3384_vm8 = vweird.f32 %v3363_v1  ;;  %vm3374_vm9 = vcmp.eq.f32.partialorder %v3373_v54, 8.507059e+37 }
 0x6db   : > { %v3391_v2 = vor.u32 1.1754944e-38, %v3390_v14  ;;  %vm3389_vm11 = vcmp.eq.f32.partialorder %v3388_v13, 8.507059e+37 }
 0x6dc   : > { %v3449_v0 = vsel %vm865_vm0, %v3417_v5, %v3448_v52  ;;  %v3450_v7 = vsel %vm867_vm1, %v3417_v5, %v3448_v52  ;;  %vm3369_vm1 = vweird.f32 %v6419_v49 }
 0x6dd   : > { %v4489_v53 = vpop.eup %4488  ;;  %v3451_v57 = vrot.slane %v3450_v7, 1  ;;  %v3454_v45 = vmul.f32 %v3449_v0, %v3323_v40  ;;  %v3431_v43 = vpop.f32.mrf.mxu2 }
 0x6de   : > { %v3444_v4 = vpop.f32.mrf.mxu3  ;;  %v3365_v6 = vmul.f32 %v4489_v53, %v6419_v49  ;;  %vm3370_vm0 = vweird.f32 %v4489_v53 }
 0x6df   : > { %v4491_v51 = vpop.eup %4490  ;;  %v3455_v15 = vmul.f32 %v3451_v57, %v3338_v39  ;;  %v3460_v19 = vadd.f32 %v3456_v60, %v3454_v45  ;;  %vm3371_vm7 = vmor %vm3369_vm1, %vm3370_vm0 }
 0x6e0   : > { %v3366_v34 = vsub.f32 1.0, %v3365_v6  ;;  %v3380_v35 = vmul.f32 %v4491_v51, %v3363_v1  ;;  %vm3385_vm6 = vweird.f32 %v4491_v51 }
 0x6e1   : > { %v3461_v63 = vadd.f32 %v3457_v58, %v3455_v15  ;;  %4492 = vtanh.f32 %v3460_v19  ;;  %vm3386_vm10 = vmor %vm3384_vm8, %vm3385_vm6 }
 0x6e2   : > { %v3367_v21 = vmul.f32 %v4489_v53, %v3366_v34  ;;  %v3381_v47 = vsub.f32 1.0, %v3380_v35 }
 0x6e3   : > { %4494 = vtanh.f32 %v3461_v63 }
 0x6e4   : > { %v3382_v9 = vmul.f32 %v4491_v51, %v3381_v47  ;;  %v3368_v10 = vadd.f32 %v4489_v53, %v3367_v21 }
 0x6e6   : > { %v3372_v46 = vsel %vm3371_vm7, %v4489_v53, %v3368_v10  ;;  %v3383_v8 = vadd.f32 %v4491_v51, %v3382_v9 }
 0x6e7   : > { %v4493_v29 = vpop.eup %4492  ;;  %v3377_v25 = vsel %vm3374_vm9, %v3376_v30, %v3372_v46 }
 0x6e8   : > { %v3387_v38 = vsel %vm3386_vm10, %v4491_v51, %v3383_v8  ;;  %v3464_v49 = vsub.f32 %v6345_v22, %v4493_v29 }
 0x6e9   : > { %v4495_v50 = vpop.eup %4494  ;;  %v3392_v20 = vsel %vm3389_vm11, %v3391_v2, %v3387_v38 }
 0x6ea   : > { %v3465_v41 = vsub.f32 %v6347_v18, %v4495_v50  ;;  %v3466_v28 = vmul.f32 %v3464_v49, %v3377_v25 }
 0x6ec   : > { %v3467_v55 = vmul.f32 %v3465_v41, %v3392_v20  ;;  %v3468_v11 = vadd.f32 %v4493_v29, %v3466_v28 }
 0x6ee   : > { %v3469_v56 = vadd.f32 %v4495_v50, %v3467_v55  ;;  %v3472_v16 = vperm.slane %v3468_v11, 0  ;;  %v3473_v23 = vperm.slane %v3468_v11, 1  ;;  %3517 = vst [vmem:[#allocation1] ss:$2 sm:$0xff] %v3468_v11 }
 0x6f0   : > { %v3474_v33 = vperm.slane %v3469_v56, 0  ;;  %v3475_v44 = vperm.slane %v3469_v56, 1  ;;  %v3509_v22 = vsel %vm3508_vm12, %v6354_v26, %v3472_v16  ;;  %v3510_v36 = vsel %vm3508_vm12, %v6357_v59, %v3473_v23  ;;  %3519 = vst [vmem:[#allocation1 + $0x1] ss:$2 sm:$0xff] %v3469_v56 }
 0x6f1   : > { %3513 = vst [vmem:[%s4908_s26] sm:$0xff] %v3509_v22 }
 0x6f2   : > { %v3511_v18 = vsel %vm3508_vm12, %v6360_v17, %v3474_v33  ;;  %v3512_v1 = vsel %vm3508_vm12, %v6363_v32, %v3475_v44  ;;  %3514 = vst [vmem:[%s4908_s26 + $0x8] sm:$0xff] %v3510_v36 }
 0x6f3   : > { %3515 = vst [vmem:[%s4908_s26 + $0x10] sm:$0xff] %v3511_v18 }
 0x6f4   : > { %3516 = vst [vmem:[%s4908_s26 + $0x18] sm:$0xff] %v3512_v1  ;;  %3526 = sbr.rel (%p4134_p4) target bundleno = 1795 (0x703), region = 64 }
 0x6f7   : > { %v3520_v42 = vld [vmem:[#allocation1] sm:$0xff] }
 0x6f8   : > { %3522 = vst [vmem:[#allocation2] sm:$0xf] %v3520_v42 }
 0x6f9   : > { %3527 = vst [vmem:[#allocation1] ss:$2 sm:$0xff] %v3468_v11 }
 0x6fa   : > { %3529 = vst [vmem:[#allocation1 + $0x1] ss:$2 sm:$0xff] %v3469_v56 }
 0x701   : > { %v3530_v48 = vld [vmem:[#allocation1] sm:$0xff] }
 0x702   : > { %3532 = vst [vmem:[#allocation12] sm:$0xf] %v3530_v48 }
 0x703 PF: > { %s4238_s13 = sshll.u32 %s4794_s25, 4  ;;  %s3546_s19 = sshll.u32 %s4908_s26, 4  ;;  %s3547_s19 = int_to_ptr.vmem [resolvable:$true] %s3546_s19 }
 0x704   : > { %s3545_s18 = scalar_lea.hbm %s6500_s5, %s4238_s13  ;;  %s3534_s17 = scalar_lea.sflag [#allocation5], %s4889_s14 }
 0x705   : > { %s3548_s1 = sshll.u32 %s3545_s18, 4  ;;  %s4636_s3 = scalar_lea.hbm %s6500_s5, 64  ;;  %s3549_s1 = int_to_ptr.hbm [resolvable:$true] %s3548_s1 }
 0x706   : > { %s4630_s15 = sshra.s32 %s3549_s1, 4  ;;  %s4631_s15 = int_to_ptr.hbm [resolvable:$true] %s4630_s15 }
 0x707   : > { %s4632_s27 = scalar_lea.hbm %s4631_s15, 32  ;;  %p4637_p2 = scmp.lt.s32.totalorder %s4631_s15, %s6500_s5 }
 0x708   : > { %p4633_p6 = scmp.ne.s32.totalorder %s4631_s15, %s4632_s27  ;;  %p4638_p9 = scmp.lt.s32.totalorder %s4636_s3, %s4632_s27 }
 0x70a   : > { %p4634_p13 = pnand %p4633_p6, %p4827_p11  ;;  %p4639_p5 = por %p4638_p9, %p4637_p2 }
 0x70c   : > { %p4635_p1 = pneg %p4634_p13 }
 0x70e   : > { %p4640_p10 = pnand %p4639_p5, %p4635_p1 }
 0x710   : > { %4643 = shalt.err (!%p4640_p10)
}
 0x711   : > { %s4734_s14 = smov 256   ;;  %s4735_s16 = smov 512  }
 0x712   : > { %s4736_s28 = smov 16   ;;  %s3563_s8 = sshll.u32 %s6501_s6, 4  ;;  %s3564_s8 = int_to_ptr.hbm [resolvable:$true] %s3563_s8 }
 0x713   : > { %4256 = dma.vmem_to_hbm [thread:$0]  (%p4827_p11), %s3547_s19, 512, %s3549_s1, %s3534_s17, %s4734_s14, %s4735_s16, %s4736_s28  }
 0x714   : > { %s4737_s12 = smov [#allocation12]   ;;  %p7250_p0 = scmp.eq.s32.totalorder %s4794_s25, 1 }
 0x715   : > { %s3561_s13 = sshll.u32 %s4737_s12, 4  ;;  %s3562_s13 = int_to_ptr.vmem [resolvable:$true] %s3561_s13 }
 0x716   : > { %4258 = dma.vmem_to_hbm [thread:$0]  (%p7250_p0), %s3562_s13, 64, %s3564_s8, [#allocation13]  }
 0x717   : > { %p7251_p3 = pmov %p7250_p0 }
 0x718   : > { %p7252_p8 = pmov %p7250_p0 }
 0x719   : > { %4701 = dma.done.wait (%p7251_p3), [#allocation13], 64  }
 0x71a   : > { %4703 = vsyncadd (%p7252_p8), [#allocation13], 4294967232 }
 0x71b PF: > { %s3580_s9 = sand.u32 1, %s4710_s21   ;;  %p7254_p11 = scmp.ge.s32.totalorder %s4722_s24, 2 }
 0x71c   : > { %s3581_s29 = scalar_lea.sflag [#allocation5], %s3580_s9 }
 0x71d   : > { %p4277_p7 = pnand %p7254_p11, %p4831_p12 }
 0x71f   : > { %p4278_p4 = pneg %p4277_p7 }
 0x721   : > { %4705 = dma.done.wait (%p4278_p4), %s3581_s29, 512  }
 0x722   : > { %4707 = vsyncadd (%p4278_p4), %s3581_s29, 4294966784  ;;  %s7255_s24 = sld [smem:[#allocation19_spill]]  ;;  %s7257_s21 = smov %s4714_s22 }
 0x723   : > { %s7256_s18 = sld [smem:[#allocation20_spill]]  ;;  %s7258_s22 = smov %s4718_s23 }
 0x728   : > { %p23_p6 = scmp.ge.s32.totalorder %s7255_s24, 4  }
 0x729   : > { %s7259_s23 = smov %s7256_s18 }
 0x72a   :  { %25 = sbr.rel (!%p23_p6) target bundleno = 12 (0xc), region = 131 }
 0x72f   :  { %3587 = vsyncpa [#allocation4], 1 }
 0x730   :  { %3589 = vsyncpa [#allocation4 + $0x1], 1 }
 0x731   :  { %3590 = vsyncpa [#allocation7], 1 }
 0x732   :  { %3591 = vsyncpa [#allocation10], 1 }
 0x733   :  { %3592 = vsyncpa [#allocation5], 1 }
 0x734   :  { %3594 = vsyncpa [#allocation5 + $0x1], 1 }
 0x735   :  { %3595 = vsyncpa [#allocation13], 1 }

</bundles_post_ra>
